<compile_context>
chip_gen: v7x
topology: tpu7x:2x2x1
jax: 0.10.0
libtpu: 0.0.40
codegen_flags: <defaults>
</compile_context>

<pallas_src>
import jax
import jax.numpy as jnp
from jax.experimental import pallas as pl
from jax.experimental.pallas import tpu as pltpu


def gru_seq_kernel(x_ref,
                   wi_r_ref, wi_z_ref, wi_n_ref,
                   wh_r_ref, wh_z_ref, wh_n_ref,
                   b_r_ref, b_z_ref, b_in_ref, b_hn_ref,
                   w_lin_ref, b_lin_ref,
                   out_ref):
    Bt, T = x_ref.shape
    H = wh_r_ref.shape[0]

    # ---- Hoisted, h-independent work (off the serial critical path) -------
    # Time-major (T, Bt, H): gi_*[t] selects whole tiles -> no per-step relayout.
    x_tb = x_ref[...].T[:, :, None]                       # (T, Bt, 1), transposed once
    gi_r = x_tb * wi_r_ref[...] + b_r_ref[...]            # (T, Bt, H)  b_r = b_ir+b_hr
    gi_z = x_tb * wi_z_ref[...] + b_z_ref[...]            # (T, Bt, H)  b_z = b_iz+b_hz
    gi_n = x_tb * wi_n_ref[...] + b_in_ref[...]           # (T, Bt, H)  input-side bias only

    wh_r = wh_r_ref[...]                                  # (H, H), loaded once
    wh_z = wh_z_ref[...]
    wh_n = wh_n_ref[...]
    b_hn = b_hn_ref[...]                                  # (1, H) hidden-side bias, gated by r

    # ---- Serial GRU recurrence (fully unrolled, per-gate -> lane aligned) --
    hs = []

    # Step 0: h == 0, so all three hidden matmuls vanish (gh_r = gh_z = 0,
    # gh_n = b_hn).  Skipping them shortens the serial chain by one MXU round.
    r0 = jax.nn.sigmoid(gi_r[0])
    z0 = jax.nn.sigmoid(gi_z[0])
    n0 = jnp.tanh(gi_n[0] + r0 * b_hn)
    h = jnp.maximum((1.0 - z0) * n0, 0.0)                 # h_0 = relu(gru1(x_0, 0))
    hs.append(h)

    for t in range(1, T):
        gh_r = jnp.dot(h, wh_r, preferred_element_type=jnp.float32)
        gh_z = jnp.dot(h, wh_z, preferred_element_type=jnp.float32)
        gh_n = jnp.dot(h, wh_n, preferred_element_type=jnp.float32) + b_hn
        r = jax.nn.sigmoid(gi_r[t] + gh_r)
        z = jax.nn.sigmoid(gi_z[t] + gh_z)
        n = jnp.tanh(gi_n[t] + r * gh_n)
        h = jnp.maximum((1.0 - z) * n + z * h, 0.0)       # h_t = relu(gru1(x_t, h))
        hs.append(h)

    # ---- Deferred linear head + one dense store (epilogue) -----------------
    h_all = jnp.stack(hs, axis=0)                                   # (T, Bt, H)
    y = jnp.sum(h_all * w_lin_ref[...], axis=-1) + b_lin_ref[...]   # (T, Bt)
    out_ref[...] = y.T.astype(out_ref.dtype)                        # (Bt, T)
    # TODO(synk): the `future > 0` autoregressive branch and gru2 of
    # Sequence.forward are not implemented (default future=0; gru2 unused).


def sequence_forward(x, params, *, b_tile=None):
    """x: (B, T) float32 (input_size=1 squeezed). Returns (B, T) = outputs.squeeze(2)."""
    B, T = x.shape
    H = params[3].shape[0]                   # wh_r is (H, H)
    if b_tile is None:
        b_tile = B if B <= 128 else 128      # fatter LHS tiles -> better MXU row use
    assert B % b_tile == 0, "batch must be a multiple of the batch tile"
    assert b_tile % 8 == 0, "batch tile must be a sublane multiple (8)"

    weight_spec_hh = pl.BlockSpec((H, H), lambda i: (0, 0))
    weight_spec_1h = pl.BlockSpec((1, H), lambda i: (0, 0))

    return pl.pallas_call(
        gru_seq_kernel,
        out_shape=jax.ShapeDtypeStruct((B, T), jnp.float32),
        grid=(B // b_tile,),
        in_specs=[
            pl.BlockSpec((b_tile, T), lambda i: (i, 0)),     # x
            weight_spec_1h, weight_spec_1h, weight_spec_1h,  # wi_r, wi_z, wi_n
            weight_spec_hh, weight_spec_hh, weight_spec_hh,  # wh_r, wh_z, wh_n
            weight_spec_1h, weight_spec_1h,                  # b_r, b_z
            weight_spec_1h, weight_spec_1h,                  # b_in, b_hn
            weight_spec_1h,                                  # w_lin
            pl.BlockSpec((1, 1), lambda i: (0, 0)),          # b_lin
        ],
        out_specs=pl.BlockSpec((b_tile, T), lambda i: (i, 0)),
        compiler_params=pltpu.CompilerParams(
            dimension_semantics=("parallel",)),   # independent batch tiles -> 2 TCs on v7x
    )(x, *params)


def init_raw_params(key, input_size=1, hidden_size=150, output_size=1):
    """torch-layout params, U(-1/sqrt(H), 1/sqrt(H)) like nn.GRUCell / nn.Linear."""
    k = 1.0 / float(hidden_size) ** 0.5
    ks = jax.random.split(key, 6)
    w_ih = jax.random.uniform(ks[0], (3 * hidden_size, input_size), jnp.float32, -k, k)
    w_hh = jax.random.uniform(ks[1], (3 * hidden_size, hidden_size), jnp.float32, -k, k)
    b_ih = jax.random.uniform(ks[2], (3 * hidden_size,), jnp.float32, -k, k)
    b_hh = jax.random.uniform(ks[3], (3 * hidden_size,), jnp.float32, -k, k)
    w_lin = jax.random.uniform(ks[4], (output_size, hidden_size), jnp.float32, -k, k)
    b_lin = jax.random.uniform(ks[5], (output_size,), jnp.float32, -k, k)
    return w_ih, w_hh, b_ih, b_hh, w_lin, b_lin


def pack_params(w_ih, w_hh, b_ih, b_hh, w_lin, b_lin):
    """Split torch GRUCell params into per-gate (r, z, n), kernel-layout slabs."""
    H = w_hh.shape[1]

    def gate(a, g):
        return a[g * H:(g + 1) * H]

    # input weights: (H, 1) per gate -> (1, H) row vectors (input_size == 1)
    wi_r = gate(w_ih, 0)[:, 0].reshape(1, H)
    wi_z = gate(w_ih, 1)[:, 0].reshape(1, H)
    wi_n = gate(w_ih, 2)[:, 0].reshape(1, H)
    # recurrent weights: (H, H) per gate, pre-transposed so gh = h @ wh_g
    wh_r = gate(w_hh, 0).T
    wh_z = gate(w_hh, 1).T
    wh_n = gate(w_hh, 2).T
    # r/z biases can be merged (b_ih + b_hh); n keeps them separate because the
    # hidden-side bias is gated by r: n = tanh(gi_n + r * (h @ Whn^T + b_hn)).
    b_r = (gate(b_ih, 0) + gate(b_hh, 0)).reshape(1, H)
    b_z = (gate(b_ih, 1) + gate(b_hh, 1)).reshape(1, H)
    b_in = gate(b_ih, 2).reshape(1, H)
    b_hn = gate(b_hh, 2).reshape(1, H)
    return (wi_r, wi_z, wi_n, wh_r, wh_z, wh_n,
            b_r, b_z, b_in, b_hn,
            w_lin.reshape(1, H), b_lin.reshape(1, 1))


def sequence_forward_ref(x, raw_params):
    """Pure-JAX port of Sequence.forward (future=0), written straight from the
    torch GRUCell formula / torch weight layout (validates the kernel packing)."""
    w_ih, w_hh, b_ih, b_hh, w_lin, b_lin = raw_params
    B, T = x.shape
    H = w_hh.shape[1]
    h = jnp.zeros((B, H), jnp.float32)
    outs = []
    for t in range(T):
        x_t = x[:, t:t + 1]                              # (B, 1)
        gi = x_t @ w_ih.T + b_ih                         # (B, 3H)
        gh = h @ w_hh.T + b_hh                           # (B, 3H)
        r = jax.nn.sigmoid(gi[:, :H] + gh[:, :H])
        z = jax.nn.sigmoid(gi[:, H:2 * H] + gh[:, H:2 * H])
        n = jnp.tanh(gi[:, 2 * H:] + r * gh[:, 2 * H:])
        h = jnp.maximum((1.0 - z) * n + z * h, 0.0)      # h_t = relu(gru1(x_t, h_t))
        outs.append(h @ w_lin.T + b_lin)                 # (B, 1)
    return jnp.concatenate(outs, axis=1)                 # (B, T) == outputs.squeeze(2)


if __name__ == "__main__":
    B, T, H = 8, 8, 150     # batch = sublane multiple, seq = 8, hidden = module default
    key = jax.random.PRNGKey(0)
    kx, kp = jax.random.split(key)
    x = jax.random.normal(kx, (B, T), jnp.float32)
    raw = init_raw_params(kp, input_size=1, hidden_size=H, output_size=1)
    params = pack_params(*raw)

    out = jax.block_until_ready(sequence_forward(x, params))
    ref = jax.block_until_ready(sequence_forward_ref(x, raw))

    assert out.shape == (B, T), out.shape
    assert jnp.allclose(out, ref, atol=1e-3, rtol=1e-3), (out, ref)
    print("KERNEL_OK")
</pallas_src>

<mosaic_0001>
module attributes {stable_mosaic.version = 11 : i64} {
  func.func @gru_seq_kernel(%arg0: i32, %arg1: memref<8x8xf32, #tpu.memory_space<vmem>>, %arg2: memref<1x150xf32, #tpu.memory_space<vmem>>, %arg3: memref<1x150xf32, #tpu.memory_space<vmem>>, %arg4: memref<1x150xf32, #tpu.memory_space<vmem>>, %arg5: memref<150x150xf32, #tpu.memory_space<vmem>>, %arg6: memref<150x150xf32, #tpu.memory_space<vmem>>, %arg7: memref<150x150xf32, #tpu.memory_space<vmem>>, %arg8: memref<1x150xf32, #tpu.memory_space<vmem>>, %arg9: memref<1x150xf32, #tpu.memory_space<vmem>>, %arg10: memref<1x150xf32, #tpu.memory_space<vmem>>, %arg11: memref<1x150xf32, #tpu.memory_space<vmem>>, %arg12: memref<1x150xf32, #tpu.memory_space<vmem>>, %arg13: memref<1x1xf32, #tpu.memory_space<vmem>>, %arg14: memref<8x8xf32, #tpu.memory_space<vmem>>) attributes {dimension_semantics = [#tpu.dimension_semantics<parallel>], iteration_bounds = array<i64: 1>, scalar_prefetch = 0 : i64, scratch_operands = 0 : i64, tpu.core_type = #tpu.core_type<tc>, window_params = [{transform_indices = @transform_0, window_bounds = array<i64: 8, 8>}, {pipeline_mode = #tpu.pipeline_mode<synchronous>, transform_indices = @transform_1, window_bounds = array<i64: 1, 150>}, {pipeline_mode = #tpu.pipeline_mode<synchronous>, transform_indices = @transform_2, window_bounds = array<i64: 1, 150>}, {pipeline_mode = #tpu.pipeline_mode<synchronous>, transform_indices = @transform_3, window_bounds = array<i64: 1, 150>}, {pipeline_mode = #tpu.pipeline_mode<synchronous>, transform_indices = @transform_4, window_bounds = array<i64: 150, 150>}, {pipeline_mode = #tpu.pipeline_mode<synchronous>, transform_indices = @transform_5, window_bounds = array<i64: 150, 150>}, {pipeline_mode = #tpu.pipeline_mode<synchronous>, transform_indices = @transform_6, window_bounds = array<i64: 150, 150>}, {pipeline_mode = #tpu.pipeline_mode<synchronous>, transform_indices = @transform_7, window_bounds = array<i64: 1, 150>}, {pipeline_mode = #tpu.pipeline_mode<synchronous>, transform_indices = @transform_8, window_bounds = array<i64: 1, 150>}, {pipeline_mode = #tpu.pipeline_mode<synchronous>, transform_indices = @transform_9, window_bounds = array<i64: 1, 150>}, {pipeline_mode = #tpu.pipeline_mode<synchronous>, transform_indices = @transform_10, window_bounds = array<i64: 1, 150>}, {pipeline_mode = #tpu.pipeline_mode<synchronous>, transform_indices = @transform_11, window_bounds = array<i64: 1, 150>}, {pipeline_mode = #tpu.pipeline_mode<synchronous>, transform_indices = @transform_12, window_bounds = array<i64: 1, 1>}, {transform_indices = @transform_13, window_bounds = array<i64: 8, 8>}]} {
    %c0 = arith.constant 0 : index
    %c0_0 = arith.constant 0 : index
    %0 = vector.load %arg1[%c0, %c0_0] : memref<8x8xf32, #tpu.memory_space<vmem>>, vector<8x8xf32>
    %1 = tpu.transpose %0, [1, 0] : vector<8x8xf32> -> vector<8x8xf32>
    %2 = vector.shape_cast %1 : vector<8x8xf32> to vector<8x8x1xf32>
    %c0_1 = arith.constant 0 : index
    %c0_2 = arith.constant 0 : index
    %3 = vector.load %arg2[%c0_1, %c0_2] : memref<1x150xf32, #tpu.memory_space<vmem>>, vector<1x150xf32>
    %4 = vector.shape_cast %3 : vector<1x150xf32> to vector<1x1x150xf32>
    %5 = vector.broadcast %2 : vector<8x8x1xf32> to vector<8x8x150xf32>
    %6 = vector.broadcast %4 : vector<1x1x150xf32> to vector<8x8x150xf32>
    %7 = arith.mulf %5, %6 : vector<8x8x150xf32>
    %c0_3 = arith.constant 0 : index
    %c0_4 = arith.constant 0 : index
    %8 = vector.load %arg8[%c0_3, %c0_4] : memref<1x150xf32, #tpu.memory_space<vmem>>, vector<1x150xf32>
    %9 = vector.shape_cast %8 : vector<1x150xf32> to vector<1x1x150xf32>
    %10 = vector.broadcast %9 : vector<1x1x150xf32> to vector<8x8x150xf32>
    %11 = arith.addf %7, %10 : vector<8x8x150xf32>
    %c0_5 = arith.constant 0 : index
    %c0_6 = arith.constant 0 : index
    %12 = vector.load %arg3[%c0_5, %c0_6] : memref<1x150xf32, #tpu.memory_space<vmem>>, vector<1x150xf32>
    %13 = vector.shape_cast %12 : vector<1x150xf32> to vector<1x1x150xf32>
    %14 = vector.broadcast %2 : vector<8x8x1xf32> to vector<8x8x150xf32>
    %15 = vector.broadcast %13 : vector<1x1x150xf32> to vector<8x8x150xf32>
    %16 = arith.mulf %14, %15 : vector<8x8x150xf32>
    %c0_7 = arith.constant 0 : index
    %c0_8 = arith.constant 0 : index
    %17 = vector.load %arg9[%c0_7, %c0_8] : memref<1x150xf32, #tpu.memory_space<vmem>>, vector<1x150xf32>
    %18 = vector.shape_cast %17 : vector<1x150xf32> to vector<1x1x150xf32>
    %19 = vector.broadcast %18 : vector<1x1x150xf32> to vector<8x8x150xf32>
    %20 = arith.addf %16, %19 : vector<8x8x150xf32>
    %c0_9 = arith.constant 0 : index
    %c0_10 = arith.constant 0 : index
    %21 = vector.load %arg4[%c0_9, %c0_10] : memref<1x150xf32, #tpu.memory_space<vmem>>, vector<1x150xf32>
    %22 = vector.shape_cast %21 : vector<1x150xf32> to vector<1x1x150xf32>
    %23 = vector.broadcast %2 : vector<8x8x1xf32> to vector<8x8x150xf32>
    %24 = vector.broadcast %22 : vector<1x1x150xf32> to vector<8x8x150xf32>
    %25 = arith.mulf %23, %24 : vector<8x8x150xf32>
    %c0_11 = arith.constant 0 : index
    %c0_12 = arith.constant 0 : index
    %26 = vector.load %arg10[%c0_11, %c0_12] : memref<1x150xf32, #tpu.memory_space<vmem>>, vector<1x150xf32>
    %27 = vector.shape_cast %26 : vector<1x150xf32> to vector<1x1x150xf32>
    %28 = vector.broadcast %27 : vector<1x1x150xf32> to vector<8x8x150xf32>
    %29 = arith.addf %25, %28 : vector<8x8x150xf32>
    %c0_13 = arith.constant 0 : index
    %c0_14 = arith.constant 0 : index
    %30 = vector.load %arg5[%c0_13, %c0_14] : memref<150x150xf32, #tpu.memory_space<vmem>>, vector<150x150xf32>
    %c0_15 = arith.constant 0 : index
    %c0_16 = arith.constant 0 : index
    %31 = vector.load %arg6[%c0_15, %c0_16] : memref<150x150xf32, #tpu.memory_space<vmem>>, vector<150x150xf32>
    %c0_17 = arith.constant 0 : index
    %c0_18 = arith.constant 0 : index
    %32 = vector.load %arg7[%c0_17, %c0_18] : memref<150x150xf32, #tpu.memory_space<vmem>>, vector<150x150xf32>
    %c0_19 = arith.constant 0 : index
    %c0_20 = arith.constant 0 : index
    %33 = vector.load %arg11[%c0_19, %c0_20] : memref<1x150xf32, #tpu.memory_space<vmem>>, vector<1x150xf32>
    %34 = vector.extract_strided_slice %11 {offsets = [0, 0, 0], sizes = [1, 8, 150], strides = [1, 1, 1]} : vector<8x8x150xf32> to vector<1x8x150xf32>
    %35 = vector.shape_cast %34 : vector<1x8x150xf32> to vector<8x150xf32>
    %36 = arith.negf %35 : vector<8x150xf32>
    %37 = math.exp %36 : vector<8x150xf32>
    %cst = arith.constant 1.000000e+00 : f32
    %38 = vector.broadcast %cst : f32 to vector<8x150xf32>
    %39 = arith.addf %38, %37 : vector<8x150xf32>
    %40 = arith.divf %38, %39 : vector<8x150xf32>
    %41 = vector.extract_strided_slice %20 {offsets = [0, 0, 0], sizes = [1, 8, 150], strides = [1, 1, 1]} : vector<8x8x150xf32> to vector<1x8x150xf32>
    %42 = vector.shape_cast %41 : vector<1x8x150xf32> to vector<8x150xf32>
    %43 = arith.negf %42 : vector<8x150xf32>
    %44 = math.exp %43 : vector<8x150xf32>
    %cst_21 = arith.constant 1.000000e+00 : f32
    %45 = vector.broadcast %cst_21 : f32 to vector<8x150xf32>
    %46 = arith.addf %45, %44 : vector<8x150xf32>
    %47 = arith.divf %45, %46 : vector<8x150xf32>
    %48 = vector.extract_strided_slice %29 {offsets = [0, 0, 0], sizes = [1, 8, 150], strides = [1, 1, 1]} : vector<8x8x150xf32> to vector<1x8x150xf32>
    %49 = vector.shape_cast %48 : vector<1x8x150xf32> to vector<8x150xf32>
    %50 = vector.broadcast %33 : vector<1x150xf32> to vector<8x150xf32>
    %51 = arith.mulf %40, %50 : vector<8x150xf32>
    %52 = arith.addf %49, %51 : vector<8x150xf32>
    %53 = math.tanh %52 : vector<8x150xf32>
    %cst_22 = arith.constant 1.000000e+00 : f32
    %54 = vector.broadcast %cst_22 : f32 to vector<8x150xf32>
    %55 = arith.subf %54, %47 : vector<8x150xf32>
    %56 = arith.mulf %55, %53 : vector<8x150xf32>
    %cst_23 = arith.constant 0.000000e+00 : f32
    %57 = vector.broadcast %cst_23 : f32 to vector<8x150xf32>
    %58 = arith.maximumf %56, %57 : vector<8x150xf32>
    %cst_24 = arith.constant dense<0.000000e+00> : vector<8x150xf32>
    %59 = tpu.matmul %58, %30, %cst_24 {dimension_numbers = #tpu.dot_dimension_numbers<[1], [0], [0], [1], [0, 0, 1, 1], [], []>} : vector<8x150xf32>, vector<150x150xf32>, vector<8x150xf32> -> vector<8x150xf32>
    %cst_25 = arith.constant dense<0.000000e+00> : vector<8x150xf32>
    %60 = tpu.matmul %58, %31, %cst_25 {dimension_numbers = #tpu.dot_dimension_numbers<[1], [0], [0], [1], [0, 0, 1, 1], [], []>} : vector<8x150xf32>, vector<150x150xf32>, vector<8x150xf32> -> vector<8x150xf32>
    %cst_26 = arith.constant dense<0.000000e+00> : vector<8x150xf32>
    %61 = tpu.matmul %58, %32, %cst_26 {dimension_numbers = #tpu.dot_dimension_numbers<[1], [0], [0], [1], [0, 0, 1, 1], [], []>} : vector<8x150xf32>, vector<150x150xf32>, vector<8x150xf32> -> vector<8x150xf32>
    %62 = vector.broadcast %33 : vector<1x150xf32> to vector<8x150xf32>
    %63 = arith.addf %61, %62 : vector<8x150xf32>
    %64 = vector.extract_strided_slice %11 {offsets = [1, 0, 0], sizes = [1, 8, 150], strides = [1, 1, 1]} : vector<8x8x150xf32> to vector<1x8x150xf32>
    %65 = vector.shape_cast %64 : vector<1x8x150xf32> to vector<8x150xf32>
    %66 = arith.addf %65, %59 : vector<8x150xf32>
    %67 = arith.negf %66 : vector<8x150xf32>
    %68 = math.exp %67 : vector<8x150xf32>
    %cst_27 = arith.constant 1.000000e+00 : f32
    %69 = vector.broadcast %cst_27 : f32 to vector<8x150xf32>
    %70 = arith.addf %69, %68 : vector<8x150xf32>
    %71 = arith.divf %69, %70 : vector<8x150xf32>
    %72 = vector.extract_strided_slice %20 {offsets = [1, 0, 0], sizes = [1, 8, 150], strides = [1, 1, 1]} : vector<8x8x150xf32> to vector<1x8x150xf32>
    %73 = vector.shape_cast %72 : vector<1x8x150xf32> to vector<8x150xf32>
    %74 = arith.addf %73, %60 : vector<8x150xf32>
    %75 = arith.negf %74 : vector<8x150xf32>
    %76 = math.exp %75 : vector<8x150xf32>
    %cst_28 = arith.constant 1.000000e+00 : f32
    %77 = vector.broadcast %cst_28 : f32 to vector<8x150xf32>
    %78 = arith.addf %77, %76 : vector<8x150xf32>
    %79 = arith.divf %77, %78 : vector<8x150xf32>
    %80 = vector.extract_strided_slice %29 {offsets = [1, 0, 0], sizes = [1, 8, 150], strides = [1, 1, 1]} : vector<8x8x150xf32> to vector<1x8x150xf32>
    %81 = vector.shape_cast %80 : vector<1x8x150xf32> to vector<8x150xf32>
    %82 = arith.mulf %71, %63 : vector<8x150xf32>
    %83 = arith.addf %81, %82 : vector<8x150xf32>
    %84 = math.tanh %83 : vector<8x150xf32>
    %cst_29 = arith.constant 1.000000e+00 : f32
    %85 = vector.broadcast %cst_29 : f32 to vector<8x150xf32>
    %86 = arith.subf %85, %79 : vector<8x150xf32>
    %87 = arith.mulf %86, %84 : vector<8x150xf32>
    %88 = arith.mulf %79, %58 : vector<8x150xf32>
    %89 = arith.addf %87, %88 : vector<8x150xf32>
    %cst_30 = arith.constant 0.000000e+00 : f32
    %90 = vector.broadcast %cst_30 : f32 to vector<8x150xf32>
    %91 = arith.maximumf %89, %90 : vector<8x150xf32>
    %cst_31 = arith.constant dense<0.000000e+00> : vector<8x150xf32>
    %92 = tpu.matmul %91, %30, %cst_31 {dimension_numbers = #tpu.dot_dimension_numbers<[1], [0], [0], [1], [0, 0, 1, 1], [], []>} : vector<8x150xf32>, vector<150x150xf32>, vector<8x150xf32> -> vector<8x150xf32>
    %cst_32 = arith.constant dense<0.000000e+00> : vector<8x150xf32>
    %93 = tpu.matmul %91, %31, %cst_32 {dimension_numbers = #tpu.dot_dimension_numbers<[1], [0], [0], [1], [0, 0, 1, 1], [], []>} : vector<8x150xf32>, vector<150x150xf32>, vector<8x150xf32> -> vector<8x150xf32>
    %cst_33 = arith.constant dense<0.000000e+00> : vector<8x150xf32>
    %94 = tpu.matmul %91, %32, %cst_33 {dimension_numbers = #tpu.dot_dimension_numbers<[1], [0], [0], [1], [0, 0, 1, 1], [], []>} : vector<8x150xf32>, vector<150x150xf32>, vector<8x150xf32> -> vector<8x150xf32>
    %95 = vector.broadcast %33 : vector<1x150xf32> to vector<8x150xf32>
    %96 = arith.addf %94, %95 : vector<8x150xf32>
    %97 = vector.extract_strided_slice %11 {offsets = [2, 0, 0], sizes = [1, 8, 150], strides = [1, 1, 1]} : vector<8x8x150xf32> to vector<1x8x150xf32>
    %98 = vector.shape_cast %97 : vector<1x8x150xf32> to vector<8x150xf32>
    %99 = arith.addf %98, %92 : vector<8x150xf32>
    %100 = arith.negf %99 : vector<8x150xf32>
    %101 = math.exp %100 : vector<8x150xf32>
    %cst_34 = arith.constant 1.000000e+00 : f32
    %102 = vector.broadcast %cst_34 : f32 to vector<8x150xf32>
    %103 = arith.addf %102, %101 : vector<8x150xf32>
    %104 = arith.divf %102, %103 : vector<8x150xf32>
    %105 = vector.extract_strided_slice %20 {offsets = [2, 0, 0], sizes = [1, 8, 150], strides = [1, 1, 1]} : vector<8x8x150xf32> to vector<1x8x150xf32>
    %106 = vector.shape_cast %105 : vector<1x8x150xf32> to vector<8x150xf32>
    %107 = arith.addf %106, %93 : vector<8x150xf32>
    %108 = arith.negf %107 : vector<8x150xf32>
    %109 = math.exp %108 : vector<8x150xf32>
    %cst_35 = arith.constant 1.000000e+00 : f32
    %110 = vector.broadcast %cst_35 : f32 to vector<8x150xf32>
    %111 = arith.addf %110, %109 : vector<8x150xf32>
    %112 = arith.divf %110, %111 : vector<8x150xf32>
    %113 = vector.extract_strided_slice %29 {offsets = [2, 0, 0], sizes = [1, 8, 150], strides = [1, 1, 1]} : vector<8x8x150xf32> to vector<1x8x150xf32>
    %114 = vector.shape_cast %113 : vector<1x8x150xf32> to vector<8x150xf32>
    %115 = arith.mulf %104, %96 : vector<8x150xf32>
    %116 = arith.addf %114, %115 : vector<8x150xf32>
    %117 = math.tanh %116 : vector<8x150xf32>
    %cst_36 = arith.constant 1.000000e+00 : f32
    %118 = vector.broadcast %cst_36 : f32 to vector<8x150xf32>
    %119 = arith.subf %118, %112 : vector<8x150xf32>
    %120 = arith.mulf %119, %117 : vector<8x150xf32>
    %121 = arith.mulf %112, %91 : vector<8x150xf32>
    %122 = arith.addf %120, %121 : vector<8x150xf32>
    %cst_37 = arith.constant 0.000000e+00 : f32
    %123 = vector.broadcast %cst_37 : f32 to vector<8x150xf32>
    %124 = arith.maximumf %122, %123 : vector<8x150xf32>
    %cst_38 = arith.constant dense<0.000000e+00> : vector<8x150xf32>
    %125 = tpu.matmul %124, %30, %cst_38 {dimension_numbers = #tpu.dot_dimension_numbers<[1], [0], [0], [1], [0, 0, 1, 1], [], []>} : vector<8x150xf32>, vector<150x150xf32>, vector<8x150xf32> -> vector<8x150xf32>
    %cst_39 = arith.constant dense<0.000000e+00> : vector<8x150xf32>
    %126 = tpu.matmul %124, %31, %cst_39 {dimension_numbers = #tpu.dot_dimension_numbers<[1], [0], [0], [1], [0, 0, 1, 1], [], []>} : vector<8x150xf32>, vector<150x150xf32>, vector<8x150xf32> -> vector<8x150xf32>
    %cst_40 = arith.constant dense<0.000000e+00> : vector<8x150xf32>
    %127 = tpu.matmul %124, %32, %cst_40 {dimension_numbers = #tpu.dot_dimension_numbers<[1], [0], [0], [1], [0, 0, 1, 1], [], []>} : vector<8x150xf32>, vector<150x150xf32>, vector<8x150xf32> -> vector<8x150xf32>
    %128 = vector.broadcast %33 : vector<1x150xf32> to vector<8x150xf32>
    %129 = arith.addf %127, %128 : vector<8x150xf32>
    %130 = vector.extract_strided_slice %11 {offsets = [3, 0, 0], sizes = [1, 8, 150], strides = [1, 1, 1]} : vector<8x8x150xf32> to vector<1x8x150xf32>
    %131 = vector.shape_cast %130 : vector<1x8x150xf32> to vector<8x150xf32>
    %132 = arith.addf %131, %125 : vector<8x150xf32>
    %133 = arith.negf %132 : vector<8x150xf32>
    %134 = math.exp %133 : vector<8x150xf32>
    %cst_41 = arith.constant 1.000000e+00 : f32
    %135 = vector.broadcast %cst_41 : f32 to vector<8x150xf32>
    %136 = arith.addf %135, %134 : vector<8x150xf32>
    %137 = arith.divf %135, %136 : vector<8x150xf32>
    %138 = vector.extract_strided_slice %20 {offsets = [3, 0, 0], sizes = [1, 8, 150], strides = [1, 1, 1]} : vector<8x8x150xf32> to vector<1x8x150xf32>
    %139 = vector.shape_cast %138 : vector<1x8x150xf32> to vector<8x150xf32>
    %140 = arith.addf %139, %126 : vector<8x150xf32>
    %141 = arith.negf %140 : vector<8x150xf32>
    %142 = math.exp %141 : vector<8x150xf32>
    %cst_42 = arith.constant 1.000000e+00 : f32
    %143 = vector.broadcast %cst_42 : f32 to vector<8x150xf32>
    %144 = arith.addf %143, %142 : vector<8x150xf32>
    %145 = arith.divf %143, %144 : vector<8x150xf32>
    %146 = vector.extract_strided_slice %29 {offsets = [3, 0, 0], sizes = [1, 8, 150], strides = [1, 1, 1]} : vector<8x8x150xf32> to vector<1x8x150xf32>
    %147 = vector.shape_cast %146 : vector<1x8x150xf32> to vector<8x150xf32>
    %148 = arith.mulf %137, %129 : vector<8x150xf32>
    %149 = arith.addf %147, %148 : vector<8x150xf32>
    %150 = math.tanh %149 : vector<8x150xf32>
    %cst_43 = arith.constant 1.000000e+00 : f32
    %151 = vector.broadcast %cst_43 : f32 to vector<8x150xf32>
    %152 = arith.subf %151, %145 : vector<8x150xf32>
    %153 = arith.mulf %152, %150 : vector<8x150xf32>
    %154 = arith.mulf %145, %124 : vector<8x150xf32>
    %155 = arith.addf %153, %154 : vector<8x150xf32>
    %cst_44 = arith.constant 0.000000e+00 : f32
    %156 = vector.broadcast %cst_44 : f32 to vector<8x150xf32>
    %157 = arith.maximumf %155, %156 : vector<8x150xf32>
    %cst_45 = arith.constant dense<0.000000e+00> : vector<8x150xf32>
    %158 = tpu.matmul %157, %30, %cst_45 {dimension_numbers = #tpu.dot_dimension_numbers<[1], [0], [0], [1], [0, 0, 1, 1], [], []>} : vector<8x150xf32>, vector<150x150xf32>, vector<8x150xf32> -> vector<8x150xf32>
    %cst_46 = arith.constant dense<0.000000e+00> : vector<8x150xf32>
    %159 = tpu.matmul %157, %31, %cst_46 {dimension_numbers = #tpu.dot_dimension_numbers<[1], [0], [0], [1], [0, 0, 1, 1], [], []>} : vector<8x150xf32>, vector<150x150xf32>, vector<8x150xf32> -> vector<8x150xf32>
    %cst_47 = arith.constant dense<0.000000e+00> : vector<8x150xf32>
    %160 = tpu.matmul %157, %32, %cst_47 {dimension_numbers = #tpu.dot_dimension_numbers<[1], [0], [0], [1], [0, 0, 1, 1], [], []>} : vector<8x150xf32>, vector<150x150xf32>, vector<8x150xf32> -> vector<8x150xf32>
    %161 = vector.broadcast %33 : vector<1x150xf32> to vector<8x150xf32>
    %162 = arith.addf %160, %161 : vector<8x150xf32>
    %163 = vector.extract_strided_slice %11 {offsets = [4, 0, 0], sizes = [1, 8, 150], strides = [1, 1, 1]} : vector<8x8x150xf32> to vector<1x8x150xf32>
    %164 = vector.shape_cast %163 : vector<1x8x150xf32> to vector<8x150xf32>
    %165 = arith.addf %164, %158 : vector<8x150xf32>
    %166 = arith.negf %165 : vector<8x150xf32>
    %167 = math.exp %166 : vector<8x150xf32>
    %cst_48 = arith.constant 1.000000e+00 : f32
    %168 = vector.broadcast %cst_48 : f32 to vector<8x150xf32>
    %169 = arith.addf %168, %167 : vector<8x150xf32>
    %170 = arith.divf %168, %169 : vector<8x150xf32>
    %171 = vector.extract_strided_slice %20 {offsets = [4, 0, 0], sizes = [1, 8, 150], strides = [1, 1, 1]} : vector<8x8x150xf32> to vector<1x8x150xf32>
    %172 = vector.shape_cast %171 : vector<1x8x150xf32> to vector<8x150xf32>
    %173 = arith.addf %172, %159 : vector<8x150xf32>
    %174 = arith.negf %173 : vector<8x150xf32>
    %175 = math.exp %174 : vector<8x150xf32>
    %cst_49 = arith.constant 1.000000e+00 : f32
    %176 = vector.broadcast %cst_49 : f32 to vector<8x150xf32>
    %177 = arith.addf %176, %175 : vector<8x150xf32>
    %178 = arith.divf %176, %177 : vector<8x150xf32>
    %179 = vector.extract_strided_slice %29 {offsets = [4, 0, 0], sizes = [1, 8, 150], strides = [1, 1, 1]} : vector<8x8x150xf32> to vector<1x8x150xf32>
    %180 = vector.shape_cast %179 : vector<1x8x150xf32> to vector<8x150xf32>
    %181 = arith.mulf %170, %162 : vector<8x150xf32>
    %182 = arith.addf %180, %181 : vector<8x150xf32>
    %183 = math.tanh %182 : vector<8x150xf32>
    %cst_50 = arith.constant 1.000000e+00 : f32
    %184 = vector.broadcast %cst_50 : f32 to vector<8x150xf32>
    %185 = arith.subf %184, %178 : vector<8x150xf32>
    %186 = arith.mulf %185, %183 : vector<8x150xf32>
    %187 = arith.mulf %178, %157 : vector<8x150xf32>
    %188 = arith.addf %186, %187 : vector<8x150xf32>
    %cst_51 = arith.constant 0.000000e+00 : f32
    %189 = vector.broadcast %cst_51 : f32 to vector<8x150xf32>
    %190 = arith.maximumf %188, %189 : vector<8x150xf32>
    %cst_52 = arith.constant dense<0.000000e+00> : vector<8x150xf32>
    %191 = tpu.matmul %190, %30, %cst_52 {dimension_numbers = #tpu.dot_dimension_numbers<[1], [0], [0], [1], [0, 0, 1, 1], [], []>} : vector<8x150xf32>, vector<150x150xf32>, vector<8x150xf32> -> vector<8x150xf32>
    %cst_53 = arith.constant dense<0.000000e+00> : vector<8x150xf32>
    %192 = tpu.matmul %190, %31, %cst_53 {dimension_numbers = #tpu.dot_dimension_numbers<[1], [0], [0], [1], [0, 0, 1, 1], [], []>} : vector<8x150xf32>, vector<150x150xf32>, vector<8x150xf32> -> vector<8x150xf32>
    %cst_54 = arith.constant dense<0.000000e+00> : vector<8x150xf32>
    %193 = tpu.matmul %190, %32, %cst_54 {dimension_numbers = #tpu.dot_dimension_numbers<[1], [0], [0], [1], [0, 0, 1, 1], [], []>} : vector<8x150xf32>, vector<150x150xf32>, vector<8x150xf32> -> vector<8x150xf32>
    %194 = vector.broadcast %33 : vector<1x150xf32> to vector<8x150xf32>
    %195 = arith.addf %193, %194 : vector<8x150xf32>
    %196 = vector.extract_strided_slice %11 {offsets = [5, 0, 0], sizes = [1, 8, 150], strides = [1, 1, 1]} : vector<8x8x150xf32> to vector<1x8x150xf32>
    %197 = vector.shape_cast %196 : vector<1x8x150xf32> to vector<8x150xf32>
    %198 = arith.addf %197, %191 : vector<8x150xf32>
    %199 = arith.negf %198 : vector<8x150xf32>
    %200 = math.exp %199 : vector<8x150xf32>
    %cst_55 = arith.constant 1.000000e+00 : f32
    %201 = vector.broadcast %cst_55 : f32 to vector<8x150xf32>
    %202 = arith.addf %201, %200 : vector<8x150xf32>
    %203 = arith.divf %201, %202 : vector<8x150xf32>
    %204 = vector.extract_strided_slice %20 {offsets = [5, 0, 0], sizes = [1, 8, 150], strides = [1, 1, 1]} : vector<8x8x150xf32> to vector<1x8x150xf32>
    %205 = vector.shape_cast %204 : vector<1x8x150xf32> to vector<8x150xf32>
    %206 = arith.addf %205, %192 : vector<8x150xf32>
    %207 = arith.negf %206 : vector<8x150xf32>
    %208 = math.exp %207 : vector<8x150xf32>
    %cst_56 = arith.constant 1.000000e+00 : f32
    %209 = vector.broadcast %cst_56 : f32 to vector<8x150xf32>
    %210 = arith.addf %209, %208 : vector<8x150xf32>
    %211 = arith.divf %209, %210 : vector<8x150xf32>
    %212 = vector.extract_strided_slice %29 {offsets = [5, 0, 0], sizes = [1, 8, 150], strides = [1, 1, 1]} : vector<8x8x150xf32> to vector<1x8x150xf32>
    %213 = vector.shape_cast %212 : vector<1x8x150xf32> to vector<8x150xf32>
    %214 = arith.mulf %203, %195 : vector<8x150xf32>
    %215 = arith.addf %213, %214 : vector<8x150xf32>
    %216 = math.tanh %215 : vector<8x150xf32>
    %cst_57 = arith.constant 1.000000e+00 : f32
    %217 = vector.broadcast %cst_57 : f32 to vector<8x150xf32>
    %218 = arith.subf %217, %211 : vector<8x150xf32>
    %219 = arith.mulf %218, %216 : vector<8x150xf32>
    %220 = arith.mulf %211, %190 : vector<8x150xf32>
    %221 = arith.addf %219, %220 : vector<8x150xf32>
    %cst_58 = arith.constant 0.000000e+00 : f32
    %222 = vector.broadcast %cst_58 : f32 to vector<8x150xf32>
    %223 = arith.maximumf %221, %222 : vector<8x150xf32>
    %cst_59 = arith.constant dense<0.000000e+00> : vector<8x150xf32>
    %224 = tpu.matmul %223, %30, %cst_59 {dimension_numbers = #tpu.dot_dimension_numbers<[1], [0], [0], [1], [0, 0, 1, 1], [], []>} : vector<8x150xf32>, vector<150x150xf32>, vector<8x150xf32> -> vector<8x150xf32>
    %cst_60 = arith.constant dense<0.000000e+00> : vector<8x150xf32>
    %225 = tpu.matmul %223, %31, %cst_60 {dimension_numbers = #tpu.dot_dimension_numbers<[1], [0], [0], [1], [0, 0, 1, 1], [], []>} : vector<8x150xf32>, vector<150x150xf32>, vector<8x150xf32> -> vector<8x150xf32>
    %cst_61 = arith.constant dense<0.000000e+00> : vector<8x150xf32>
    %226 = tpu.matmul %223, %32, %cst_61 {dimension_numbers = #tpu.dot_dimension_numbers<[1], [0], [0], [1], [0, 0, 1, 1], [], []>} : vector<8x150xf32>, vector<150x150xf32>, vector<8x150xf32> -> vector<8x150xf32>
    %227 = vector.broadcast %33 : vector<1x150xf32> to vector<8x150xf32>
    %228 = arith.addf %226, %227 : vector<8x150xf32>
    %229 = vector.extract_strided_slice %11 {offsets = [6, 0, 0], sizes = [1, 8, 150], strides = [1, 1, 1]} : vector<8x8x150xf32> to vector<1x8x150xf32>
    %230 = vector.shape_cast %229 : vector<1x8x150xf32> to vector<8x150xf32>
    %231 = arith.addf %230, %224 : vector<8x150xf32>
    %232 = arith.negf %231 : vector<8x150xf32>
    %233 = math.exp %232 : vector<8x150xf32>
    %cst_62 = arith.constant 1.000000e+00 : f32
    %234 = vector.broadcast %cst_62 : f32 to vector<8x150xf32>
    %235 = arith.addf %234, %233 : vector<8x150xf32>
    %236 = arith.divf %234, %235 : vector<8x150xf32>
    %237 = vector.extract_strided_slice %20 {offsets = [6, 0, 0], sizes = [1, 8, 150], strides = [1, 1, 1]} : vector<8x8x150xf32> to vector<1x8x150xf32>
    %238 = vector.shape_cast %237 : vector<1x8x150xf32> to vector<8x150xf32>
    %239 = arith.addf %238, %225 : vector<8x150xf32>
    %240 = arith.negf %239 : vector<8x150xf32>
    %241 = math.exp %240 : vector<8x150xf32>
    %cst_63 = arith.constant 1.000000e+00 : f32
    %242 = vector.broadcast %cst_63 : f32 to vector<8x150xf32>
    %243 = arith.addf %242, %241 : vector<8x150xf32>
    %244 = arith.divf %242, %243 : vector<8x150xf32>
    %245 = vector.extract_strided_slice %29 {offsets = [6, 0, 0], sizes = [1, 8, 150], strides = [1, 1, 1]} : vector<8x8x150xf32> to vector<1x8x150xf32>
    %246 = vector.shape_cast %245 : vector<1x8x150xf32> to vector<8x150xf32>
    %247 = arith.mulf %236, %228 : vector<8x150xf32>
    %248 = arith.addf %246, %247 : vector<8x150xf32>
    %249 = math.tanh %248 : vector<8x150xf32>
    %cst_64 = arith.constant 1.000000e+00 : f32
    %250 = vector.broadcast %cst_64 : f32 to vector<8x150xf32>
    %251 = arith.subf %250, %244 : vector<8x150xf32>
    %252 = arith.mulf %251, %249 : vector<8x150xf32>
    %253 = arith.mulf %244, %223 : vector<8x150xf32>
    %254 = arith.addf %252, %253 : vector<8x150xf32>
    %cst_65 = arith.constant 0.000000e+00 : f32
    %255 = vector.broadcast %cst_65 : f32 to vector<8x150xf32>
    %256 = arith.maximumf %254, %255 : vector<8x150xf32>
    %cst_66 = arith.constant dense<0.000000e+00> : vector<8x150xf32>
    %257 = tpu.matmul %256, %30, %cst_66 {dimension_numbers = #tpu.dot_dimension_numbers<[1], [0], [0], [1], [0, 0, 1, 1], [], []>} : vector<8x150xf32>, vector<150x150xf32>, vector<8x150xf32> -> vector<8x150xf32>
    %cst_67 = arith.constant dense<0.000000e+00> : vector<8x150xf32>
    %258 = tpu.matmul %256, %31, %cst_67 {dimension_numbers = #tpu.dot_dimension_numbers<[1], [0], [0], [1], [0, 0, 1, 1], [], []>} : vector<8x150xf32>, vector<150x150xf32>, vector<8x150xf32> -> vector<8x150xf32>
    %cst_68 = arith.constant dense<0.000000e+00> : vector<8x150xf32>
    %259 = tpu.matmul %256, %32, %cst_68 {dimension_numbers = #tpu.dot_dimension_numbers<[1], [0], [0], [1], [0, 0, 1, 1], [], []>} : vector<8x150xf32>, vector<150x150xf32>, vector<8x150xf32> -> vector<8x150xf32>
    %260 = vector.broadcast %33 : vector<1x150xf32> to vector<8x150xf32>
    %261 = arith.addf %259, %260 : vector<8x150xf32>
    %262 = vector.extract_strided_slice %11 {offsets = [7, 0, 0], sizes = [1, 8, 150], strides = [1, 1, 1]} : vector<8x8x150xf32> to vector<1x8x150xf32>
    %263 = vector.shape_cast %262 : vector<1x8x150xf32> to vector<8x150xf32>
    %264 = arith.addf %263, %257 : vector<8x150xf32>
    %265 = arith.negf %264 : vector<8x150xf32>
    %266 = math.exp %265 : vector<8x150xf32>
    %cst_69 = arith.constant 1.000000e+00 : f32
    %267 = vector.broadcast %cst_69 : f32 to vector<8x150xf32>
    %268 = arith.addf %267, %266 : vector<8x150xf32>
    %269 = arith.divf %267, %268 : vector<8x150xf32>
    %270 = vector.extract_strided_slice %20 {offsets = [7, 0, 0], sizes = [1, 8, 150], strides = [1, 1, 1]} : vector<8x8x150xf32> to vector<1x8x150xf32>
    %271 = vector.shape_cast %270 : vector<1x8x150xf32> to vector<8x150xf32>
    %272 = arith.addf %271, %258 : vector<8x150xf32>
    %273 = arith.negf %272 : vector<8x150xf32>
    %274 = math.exp %273 : vector<8x150xf32>
    %cst_70 = arith.constant 1.000000e+00 : f32
    %275 = vector.broadcast %cst_70 : f32 to vector<8x150xf32>
    %276 = arith.addf %275, %274 : vector<8x150xf32>
    %277 = arith.divf %275, %276 : vector<8x150xf32>
    %278 = vector.extract_strided_slice %29 {offsets = [7, 0, 0], sizes = [1, 8, 150], strides = [1, 1, 1]} : vector<8x8x150xf32> to vector<1x8x150xf32>
    %279 = vector.shape_cast %278 : vector<1x8x150xf32> to vector<8x150xf32>
    %280 = arith.mulf %269, %261 : vector<8x150xf32>
    %281 = arith.addf %279, %280 : vector<8x150xf32>
    %282 = math.tanh %281 : vector<8x150xf32>
    %cst_71 = arith.constant 1.000000e+00 : f32
    %283 = vector.broadcast %cst_71 : f32 to vector<8x150xf32>
    %284 = arith.subf %283, %277 : vector<8x150xf32>
    %285 = arith.mulf %284, %282 : vector<8x150xf32>
    %286 = arith.mulf %277, %256 : vector<8x150xf32>
    %287 = arith.addf %285, %286 : vector<8x150xf32>
    %cst_72 = arith.constant 0.000000e+00 : f32
    %288 = vector.broadcast %cst_72 : f32 to vector<8x150xf32>
    %289 = arith.maximumf %287, %288 : vector<8x150xf32>
    %290 = vector.shape_cast %58 : vector<8x150xf32> to vector<1x8x150xf32>
    %291 = vector.shape_cast %91 : vector<8x150xf32> to vector<1x8x150xf32>
    %292 = vector.shape_cast %124 : vector<8x150xf32> to vector<1x8x150xf32>
    %293 = vector.shape_cast %157 : vector<8x150xf32> to vector<1x8x150xf32>
    %294 = vector.shape_cast %190 : vector<8x150xf32> to vector<1x8x150xf32>
    %295 = vector.shape_cast %223 : vector<8x150xf32> to vector<1x8x150xf32>
    %296 = vector.shape_cast %256 : vector<8x150xf32> to vector<1x8x150xf32>
    %297 = vector.shape_cast %289 : vector<8x150xf32> to vector<1x8x150xf32>
    %298 = tpu.concatenate %290, %291, %292, %293, %294, %295, %296, %297 in 0 : vector<1x8x150xf32>, vector<1x8x150xf32>, vector<1x8x150xf32>, vector<1x8x150xf32>, vector<1x8x150xf32>, vector<1x8x150xf32>, vector<1x8x150xf32>, vector<1x8x150xf32> -> vector<8x8x150xf32>
    %c0_73 = arith.constant 0 : index
    %c0_74 = arith.constant 0 : index
    %299 = vector.load %arg12[%c0_73, %c0_74] : memref<1x150xf32, #tpu.memory_space<vmem>>, vector<1x150xf32>
    %300 = vector.shape_cast %299 : vector<1x150xf32> to vector<1x1x150xf32>
    %301 = vector.broadcast %300 : vector<1x1x150xf32> to vector<8x8x150xf32>
    %302 = arith.mulf %298, %301 : vector<8x8x150xf32>
    %cst_75 = arith.constant dense<0.000000e+00> : vector<8x8xf32>
    %303 = vector.multi_reduction <add>, %302, %cst_75 [2] : vector<8x8x150xf32> to vector<8x8xf32>
    %c0_76 = arith.constant 0 : index
    %c0_77 = arith.constant 0 : index
    %304 = vector.load %arg13[%c0_76, %c0_77] : memref<1x1xf32, #tpu.memory_space<vmem>>, vector<1x1xf32>
    %305 = vector.broadcast %304 : vector<1x1xf32> to vector<8x8xf32>
    %306 = arith.addf %303, %305 : vector<8x8xf32>
    %307 = tpu.transpose %306, [1, 0] : vector<8x8xf32> -> vector<8x8xf32>
    %c0_78 = arith.constant 0 : index
    %c0_79 = arith.constant 0 : index
    %308 = vector.load %arg14[%c0_78, %c0_79] : memref<8x8xf32, #tpu.memory_space<vmem>>, vector<8x8xf32>
    tpu.vector_store %arg14[%c0_78, %c0_79], %307 {strides = array<i32>} : memref<8x8xf32, #tpu.memory_space<vmem>>, vector<8x8xf32>,
    return
  }
  func.func @transform_0(%arg0: i32) -> (i32, i32) {
    %c0_i32 = arith.constant 0 : i32
    %c0_i32_0 = arith.constant 0 : i32
    return %arg0, %c0_i32 : i32, i32
  }
  func.func @transform_1(%arg0: i32) -> (i32, i32) {
    %c0_i32 = arith.constant 0 : i32
    %c0_i32_0 = arith.constant 0 : i32
    %c0_i32_1 = arith.constant 0 : i32
    return %c0_i32, %c0_i32_0 : i32, i32
  }
  func.func @transform_2(%arg0: i32) -> (i32, i32) {
    %c0_i32 = arith.constant 0 : i32
    %c0_i32_0 = arith.constant 0 : i32
    %c0_i32_1 = arith.constant 0 : i32
    return %c0_i32, %c0_i32_0 : i32, i32
  }
  func.func @transform_3(%arg0: i32) -> (i32, i32) {
    %c0_i32 = arith.constant 0 : i32
    %c0_i32_0 = arith.constant 0 : i32
    %c0_i32_1 = arith.constant 0 : i32
    return %c0_i32, %c0_i32_0 : i32, i32
  }
  func.func @transform_4(%arg0: i32) -> (i32, i32) {
    %c0_i32 = arith.constant 0 : i32
    %c0_i32_0 = arith.constant 0 : i32
    %c0_i32_1 = arith.constant 0 : i32
    return %c0_i32, %c0_i32_0 : i32, i32
  }
  func.func @transform_5(%arg0: i32) -> (i32, i32) {
    %c0_i32 = arith.constant 0 : i32
    %c0_i32_0 = arith.constant 0 : i32
    %c0_i32_1 = arith.constant 0 : i32
    return %c0_i32, %c0_i32_0 : i32, i32
  }
  func.func @transform_6(%arg0: i32) -> (i32, i32) {
    %c0_i32 = arith.constant 0 : i32
    %c0_i32_0 = arith.constant 0 : i32
    %c0_i32_1 = arith.constant 0 : i32
    return %c0_i32, %c0_i32_0 : i32, i32
  }
  func.func @transform_7(%arg0: i32) -> (i32, i32) {
    %c0_i32 = arith.constant 0 : i32
    %c0_i32_0 = arith.constant 0 : i32
    %c0_i32_1 = arith.constant 0 : i32
    return %c0_i32, %c0_i32_0 : i32, i32
  }
  func.func @transform_8(%arg0: i32) -> (i32, i32) {
    %c0_i32 = arith.constant 0 : i32
    %c0_i32_0 = arith.constant 0 : i32
    %c0_i32_1 = arith.constant 0 : i32
    return %c0_i32, %c0_i32_0 : i32, i32
  }
  func.func @transform_9(%arg0: i32) -> (i32, i32) {
    %c0_i32 = arith.constant 0 : i32
    %c0_i32_0 = arith.constant 0 : i32
    %c0_i32_1 = arith.constant 0 : i32
    return %c0_i32, %c0_i32_0 : i32, i32
  }
  func.func @transform_10(%arg0: i32) -> (i32, i32) {
    %c0_i32 = arith.constant 0 : i32
    %c0_i32_0 = arith.constant 0 : i32
    %c0_i32_1 = arith.constant 0 : i32
    return %c0_i32, %c0_i32_0 : i32, i32
  }
  func.func @transform_11(%arg0: i32) -> (i32, i32) {
    %c0_i32 = arith.constant 0 : i32
    %c0_i32_0 = arith.constant 0 : i32
    %c0_i32_1 = arith.constant 0 : i32
    return %c0_i32, %c0_i32_0 : i32, i32
  }
  func.func @transform_12(%arg0: i32) -> (i32, i32) {
    %c0_i32 = arith.constant 0 : i32
    %c0_i32_0 = arith.constant 0 : i32
    %c0_i32_1 = arith.constant 0 : i32
    return %c0_i32, %c0_i32_0 : i32, i32
  }
  func.func @transform_13(%arg0: i32) -> (i32, i32) {
    %c0_i32 = arith.constant 0 : i32
    %c0_i32_0 = arith.constant 0 : i32
    return %arg0, %c0_i32 : i32, i32
  }
}

</mosaic_0001>

<bundles_post_ra>
// kernel: tpu_custom_call.1
= control target key start
LH: loop header
LB: loop body
LE: loop exit
PB: predicated region body
PF: predicated region fallthrough
CT: control target
= control target key end

     0   :  { %s4928_s0 = inlined_call_operand.hbm [shape: f32[8,8], index: 0, kind: input, shape index: {}]   ;;  %s4929_s1 = inlined_call_operand.vmem [shape: f32[1,150], index: 1, kind: input, shape index: {}]   ;;  %s4930_s2 = inlined_call_operand.vmem [shape: f32[1,150], index: 2, kind: input, shape index: {}]   ;;  %s4931_s3 = inlined_call_operand.vmem [shape: f32[1,150], index: 3, kind: input, shape index: {}]   ;;  %s4932_s4 = inlined_call_operand.hbm [shape: f32[150,150], index: 4, kind: input, shape index: {}]   ;;  %s4933_s5 = inlined_call_operand.hbm [shape: f32[150,150], index: 5, kind: input, shape index: {}]   ;;  %s4934_s6 = inlined_call_operand.hbm [shape: f32[150,150], index: 6, kind: input, shape index: {}]   ;;  %s4935_s7 = inlined_call_operand.vmem [shape: f32[1,150], index: 7, kind: input, shape index: {}]   ;;  %s4936_s8 = inlined_call_operand.vmem [shape: f32[1,150], index: 8, kind: input, shape index: {}]   ;;  %s4937_s9 = inlined_call_operand.vmem [shape: f32[1,150], index: 9, kind: input, shape index: {}]   ;;  %s4938_s10 = inlined_call_operand.vmem [shape: f32[1,150], index: 10, kind: input, shape index: {}]   ;;  %s4939_s11 = inlined_call_operand.vmem [shape: f32[1,150], index: 11, kind: input, shape index: {}]   ;;  %s4940_s12 = inlined_call_operand.<no memory space> [shape: f32[1,1], index: 12, kind: input, shape index: {}]   ;;  %s4941_s13 = inlined_call_operand.hbm [shape: f32[8,8], index: 13, kind: output, shape index: {}]  }
   0x1   :  { %v18_v0 = vstv %s4940_s12 }
   0x2   :  { %19 = vst [vmem:[#allocation2] sm:$0x1] %v18_v0 }
   0x3   :  { %20 = vsyncpa [#allocation4], 0 }
   0x4   :  { %21 = vsyncpa [#allocation7], 0 }
   0x5   :  { %22 = vsyncpa [#allocation10], 0 }
   0x6   :  { %23 = vsyncpa [#allocation5], 0  ;;  %s3692_s27 = smov [#allocation6]   ;;  %s3574_s14 = scalar_lea.hbm %s4932_s4, 4864 }
   0x7   :  { %s45_s28 = sshll.u32 %s3692_s27, 4  ;;  %p3575_p0 = scmp.ne.s32.totalorder %s4932_s4, %s3574_s14  ;;  %s46_s28 = int_to_ptr.vmem [resolvable:$true] %s45_s28 }
   0x8   :  { %p3578_p1 = scmp.lt.u32.totalorder %s3574_s14, %s4932_s4 }
   0xa   :  { %p3580_p2 = pnand %p3578_p1, %p3575_p0 }
   0xc   :  { %3583 = shalt.err (!%p3580_p2)
}
   0xd   :  { %s3584_s12 = scalar_lea.vmem %s46_s28, 4864  ;;  %p3589_p4 = scmp.lt.s32.totalorder %s46_s28, %s46_s28 }
   0xe   :  { %p3585_p3 = scmp.ne.s32.totalorder %s46_s28, %s3584_s12  ;;  %p3590_p5 = scmp.lt.s32.totalorder %s3584_s12, %s3584_s12 }
  0x10   :  { %p3591_p6 = por %p3590_p5, %p3589_p4 }
  0x12   :  { %p3592_p7 = pnand %p3591_p6, %p3585_p3 }
  0x14   :  { %3595 = shalt.err (!%p3592_p7)
}
  0x15   :  { %s3693_s19 = smov 256   ;;  %s3694_s20 = smov 16  }
  0x16   :  { %51 = dma.hbm_to_vmem [thread:$0]  %s4932_s4, 4864, %s46_s28, [#allocation7], %s3693_s19, %s3693_s19, %s3694_s20  }
  0x17   :  { %s3695_s23 = smov [#allocation3]   ;;  %s3696_s25 = smov [#allocation8]  }
  0x18   :  { %s30_s24 = sshll.u32 %s3695_s23, 4  ;;  %s57_s26 = sshll.u32 %s3696_s25, 4  ;;  %s31_s24 = int_to_ptr.vmem [resolvable:$true] %s30_s24  ;;  %s58_s26 = int_to_ptr.vmem [resolvable:$true] %s57_s26 }
  0x19   :  { %s3596_s30 = scalar_lea.hbm %s4928_s0, 128 }
  0x1a   :  { %p3597_p8 = scmp.ne.s32.totalorder %s4928_s0, %s3596_s30  ;;  %p3600_p9 = scmp.lt.u32.totalorder %s3596_s30, %s4928_s0 }
  0x1c   :  { %p3602_p10 = pnand %p3600_p9, %p3597_p8 }
  0x1e   :  { %3605 = shalt.err (!%p3602_p10)
}
  0x1f   :  { %s3606_s4 = scalar_lea.vmem %s31_s24, 128  ;;  %p3611_p12 = scmp.lt.s32.totalorder %s31_s24, %s31_s24 }
  0x20   :  { %p3607_p11 = scmp.ne.s32.totalorder %s31_s24, %s3606_s4  ;;  %p3612_p13 = scmp.lt.s32.totalorder %s3606_s4, %s3606_s4 }
  0x22   :  { %p3613_p0 = por %p3612_p13, %p3611_p12 }
  0x24   :  { %p3614_p1 = pnand %p3613_p0, %p3607_p11 }
  0x26   :  { %3617 = shalt.err (!%p3614_p1)
}
  0x27   :  { %33 = dma.hbm_to_vmem [thread:$0]  %s4928_s0, 128, %s31_s24, [#allocation4]  }
  0x28   :  { %s3618_s22 = scalar_lea.hbm %s4933_s5, 4864 }
  0x29   :  { %p3619_p2 = scmp.ne.s32.totalorder %s4933_s5, %s3618_s22  ;;  %p3622_p3 = scmp.lt.u32.totalorder %s3618_s22, %s4933_s5 }
  0x2b   :  { %p3624_p4 = pnand %p3622_p3, %p3619_p2 }
  0x2d   :  { %3627 = shalt.err (!%p3624_p4)
}
  0x2e   :  { %s3628_s30 = scalar_lea.vmem %s58_s26, 4864  ;;  %p3633_p6 = scmp.lt.s32.totalorder %s58_s26, %s58_s26 }
  0x2f   :  { %p3629_p5 = scmp.ne.s32.totalorder %s58_s26, %s3628_s30  ;;  %p3634_p7 = scmp.lt.s32.totalorder %s3628_s30, %s3628_s30 }
  0x31   :  { %p3635_p8 = por %p3634_p7, %p3633_p6 }
  0x33   :  { %p3636_p9 = pnand %p3635_p8, %p3629_p5 }
  0x35   :  { %3639 = shalt.err (!%p3636_p9)
}
  0x36   :  { %63 = dma.hbm_to_vmem [thread:$0]  %s4933_s5, 4864, %s58_s26, [#allocation7], %s3693_s19, %s3693_s19, %s3694_s20  }
  0x37   :  { %s3697_s14 = smov [#allocation9]   ;;  %s3640_s4 = scalar_lea.hbm %s4934_s6, 4864 }
  0x38   :  { %s69_s15 = sshll.u32 %s3697_s14, 4  ;;  %p3641_p10 = scmp.ne.s32.totalorder %s4934_s6, %s3640_s4  ;;  %s70_s15 = int_to_ptr.vmem [resolvable:$true] %s69_s15 }
  0x39   :  { %p3644_p11 = scmp.lt.u32.totalorder %s3640_s4, %s4934_s6 }
  0x3b   :  { %p3646_p12 = pnand %p3644_p11, %p3641_p10 }
  0x3d   :  { %3649 = shalt.err (!%p3646_p12)
}
  0x3e   :  { %s3650_s22 = scalar_lea.vmem %s70_s15, 4864  ;;  %p3655_p0 = scmp.lt.s32.totalorder %s70_s15, %s70_s15 }
  0x3f   :  { %p3651_p13 = scmp.ne.s32.totalorder %s70_s15, %s3650_s22  ;;  %p3656_p1 = scmp.lt.s32.totalorder %s3650_s22, %s3650_s22 }
  0x41   :  { %p3657_p2 = por %p3656_p1, %p3655_p0 }
  0x43   :  { %p3658_p3 = pnand %p3657_p2, %p3651_p13 }
  0x45   :  { %3661 = shalt.err (!%p3658_p3)
}
  0x46   :  { %75 = dma.hbm_to_vmem [thread:$0]  %s4934_s6, 4864, %s70_s15, [#allocation10], %s3693_s19, %s3693_s19, %s3694_s20  }
  0x47   :  { %3684 = dma.done.wait [#allocation4], 128  }
  0x48   :  { %3685 = vsyncadd [#allocation4], 4294967168 }
  0x49   :  { %3686 = dma.done.wait [#allocation7], 9728  }
  0x4a   :  { %3687 = vsyncadd [#allocation7], 4294957568 }
  0x4b   :  { %3688 = dma.done.wait [#allocation10], 4864  }
  0x4c   :  { %3689 = vsyncadd [#allocation10], 4294962432  ;;  %v100_v1 = vld [vmem:[#allocation3] sm:$0xff]  ;;  %v4942_v2 = vlaneseq  ;;  %v358_v10 = vld [vmem:[#allocation6 + $0x8] sm:$0xff]  ;;  %vm523_vm0 = vcmask 1045504   ;;  %vm519_vm1 = vcmask 179200  }
  0x4d   :  { %101 = vxpose.xlu0.b32.start.end [1/1] (short) (narrow) %v100_v1, 8  ;;  %v360_v11 = vld [vmem:[#allocation6 + $0x18] sm:$0xff]  ;;  %v357_v12 = vld [vmem:[#allocation6] sm:$0xff]  ;;  %v359_v13 = vld [vmem:[#allocation6 + $0x10] sm:$0xff]  ;;  %vm2479_vm2 = vcmask 1041409   ;;  %vm2481_vm3 = vcmask 1042434  }
  0x4e   :  { %v3831_v3 = vshrl.u32 %v4942_v2, 7  ;;  %v396_v14 = vld [vmem:[#allocation8 + $0x8] sm:$0xff]  ;;  %v3846_v15 = vpack.c.bf16 %v360_v11, %v358_v10  ;;  %v3848_v16 = vpack.c.bf16 %v359_v13, %v357_v12  ;;  %v398_v17 = vld [vmem:[#allocation8 + $0x18] sm:$0xff]  ;;  %v395_v18 = vld [vmem:[#allocation8] sm:$0xff]  ;;  %vm2483_vm4 = vcmask 1043459  }
  0x4f   :  { %v397_v19 = vld [vmem:[#allocation8 + $0x10] sm:$0xff]  ;;  %v3850_v20 = vpack.c.bf16 %v398_v17, %v396_v14  ;;  %v362_v24 = vld [vmem:[#allocation6 + $0x28] sm:$0xff]  ;;  %v364_v25 = vld [vmem:[#allocation6 + $0x38] sm:$0xff]  ;;  %vm2485_vm5 = vcmask 1044484   ;;  %vm2487_vm6 = vcmask 1045509   ;;  %vm2489_vm7 = vcmask 1046534  }
  0x50   :  { %4996 = vst [vmem:[#allocation16_spill] sm:$0xff] %v3831_v3  ;;  %v3834_v4 = vsub.s32 1, %v3831_v3  ;;  %v3837_v5 = vsub.s32 0, %v3831_v3  ;;  %v149_v9 = vsub.s32 2, %v3831_v3  ;;  %4997 = vst [vmem:[#allocation17_spill] sm:$0xff] %v3846_v15  ;;  %v3852_v21 = vpack.c.bf16 %v397_v19, %v395_v18  ;;  %2642 = vmatprep.subr.bf16.mxu0 %v3846_v15  ;;  %v361_v27 = vld [vmem:[#allocation6 + $0x20] sm:$0xff] }
  0x51   :  { %v156_v23 = vsub.s32 3, %v3831_v3  ;;  %2644 = vmatpush1.bf16.msra.mxu0 %v3848_v16  ;;  %2678 = vmatprep.subr.bf16.mxu1 %v3850_v20  ;;  %v3859_v26 = vpack.c.bf16 %v364_v25, %v362_v24  ;;  %v363_v28 = vld [vmem:[#allocation6 + $0x30] sm:$0xff]  ;;  %v400_v29 = vld [vmem:[#allocation8 + $0x28] sm:$0xff]  ;;  %v402_v31 = vld [vmem:[#allocation8 + $0x38] sm:$0xff]  ;;  %v163_v37 = vsub.s32 4, %v3831_v3  ;;  %v170_v51 = vsub.s32 5, %v3831_v3 }
  0x52   :  { %2680 = vmatpush1.bf16.msra.mxu1 %v3852_v21  ;;  %v3862_v30 = vpack.c.bf16 %v363_v28, %v361_v27  ;;  %v399_v32 = vld [vmem:[#allocation8 + $0x20] sm:$0xff]  ;;  %v401_v33 = vld [vmem:[#allocation8 + $0x30] sm:$0xff]  ;;  %v3865_v34 = vpack.c.bf16 %v402_v31, %v400_v29  ;;  %v366_v38 = vld [vmem:[#allocation6 + $0x48] sm:$0xff]  ;;  %v177_v1 = vsub.s32 6, %v3831_v3  ;;  %v184_v24 = vsub.s32 7, %v3831_v3 }
  0x53   :  { %2646 = vmatprep.subr.bf16.mxu0 %v3859_v26  ;;  %v3867_v35 = vpack.c.bf16 %v401_v33, %v399_v32  ;;  %v368_v39 = vld [vmem:[#allocation6 + $0x58] sm:$0xff]  ;;  %v365_v41 = vld [vmem:[#allocation6 + $0x40] sm:$0xff]  ;;  %v367_v42 = vld [vmem:[#allocation6 + $0x50] sm:$0xff]  ;;  %vm2491_vm8 = vcmask 1047559   ;;  %vm2526_vm9 = vcmask 64512  }
  0x54   :  { %4998 = vst [vmem:[#allocation18_spill] sm:$0xff] %v3865_v34  ;;  %2682 = vmatprep.subr.bf16.mxu1 %v3865_v34  ;;  %v3873_v40 = vpack.c.bf16 %v368_v39, %v366_v38  ;;  %v404_v43 = vld [vmem:[#allocation8 + $0x48] sm:$0xff]  ;;  %v3876_v44 = vpack.c.bf16 %v367_v42, %v365_v41  ;;  %v406_v45 = vld [vmem:[#allocation8 + $0x58] sm:$0xff]  ;;  %v403_v46 = vld [vmem:[#allocation8 + $0x40] sm:$0xff] }
  0x55   :  { %4999 = vst [vmem:[#allocation19_spill] sm:$0xff] %v3867_v35  ;;  %2648 = vmatpush1.bf16.msra.mxu0 %v3862_v30  ;;  %v405_v47 = vld [vmem:[#allocation8 + $0x50] sm:$0xff]  ;;  %v3879_v48 = vpack.c.bf16 %v406_v45, %v404_v43  ;;  %v370_v52 = vld [vmem:[#allocation6 + $0x68] sm:$0xff]  ;;  %v372_v53 = vld [vmem:[#allocation6 + $0x78] sm:$0xff] }
  0x56   :  { %2684 = vmatpush1.bf16.msra.mxu1 %v3867_v35  ;;  %2650 = vmatprep.subr.bf16.mxu0 %v3873_v40  ;;  %v3881_v49 = vpack.c.bf16 %v405_v47, %v403_v46  ;;  %v3887_v54 = vpack.c.bf16 %v372_v53, %v370_v52  ;;  %v369_v55 = vld [vmem:[#allocation6 + $0x60] sm:$0xff]  ;;  %v371_v56 = vld [vmem:[#allocation6 + $0x70] sm:$0xff]  ;;  %v408_v57 = vld [vmem:[#allocation8 + $0x68] sm:$0xff] }
  0x57   :  { %5000 = vst [vmem:[#allocation20_spill] sm:$0xff] %v3879_v48  ;;  %2686 = vmatprep.subr.bf16.mxu1 %v3879_v48  ;;  %v3890_v58 = vpack.c.bf16 %v371_v56, %v369_v55  ;;  %v410_v59 = vld [vmem:[#allocation8 + $0x78] sm:$0xff]  ;;  %v407_v60 = vld [vmem:[#allocation8 + $0x60] sm:$0xff]  ;;  %v409_v61 = vld [vmem:[#allocation8 + $0x70] sm:$0xff] }
  0x58   :  { %5001 = vst [vmem:[#allocation21_spill] sm:$0xff] %v3881_v49  ;;  %v3893_v62 = vpack.c.bf16 %v410_v59, %v408_v57  ;;  %v3895_v63 = vpack.c.bf16 %v409_v61, %v407_v60  ;;  %v373_v10 = vld [vmem:[#allocation6 + $0x80] sm:$0xff]  ;;  %v375_v11 = vld [vmem:[#allocation6 + $0x90] sm:$0xff]  ;;  %v412_v12 = vld [vmem:[#allocation8 + $0x88] sm:$0xff] }
  0x59   :  { %2652 = vmatpush1.bf16.msra.mxu0 %v3876_v44  ;;  %v3904_v13 = vpack.c.bf16 %v375_v11, %v373_v10  ;;  %v414_v14 = vld [vmem:[#allocation8 + $0x98] sm:$0xff]  ;;  %v411_v17 = vld [vmem:[#allocation8 + $0x80] sm:$0xff]  ;;  %v413_v18 = vld [vmem:[#allocation8 + $0x90] sm:$0xff] }
  0x5a   :  { %2688 = vmatpush1.bf16.msra.mxu1 %v3881_v49  ;;  %2654 = vmatprep.subr.bf16.mxu0 %v3887_v54  ;;  %5002 = vst [vmem:[#allocation22_spill] sm:$0xff] %v3893_v62  ;;  %5003 = vst [vmem:[#allocation23_spill] sm:$0xff] %v3895_v63  ;;  %v3907_v19 = vpack.c.bf16 %v414_v14, %v412_v12  ;;  %v378_v25 = vld [vmem:[#allocation6 + $0xa8] sm:$0xff]  ;;  %v380_v27 = vld [vmem:[#allocation6 + $0xb8] sm:$0xff] }
  0x5b   :  { %2690 = vmatprep.subr.bf16.mxu1 %v3893_v62  ;;  %v3915_v28 = vpack.c.bf16 %v380_v27, %v378_v25  ;;  %v377_v29 = vld [vmem:[#allocation6 + $0xa0] sm:$0xff]  ;;  %v379_v31 = vld [vmem:[#allocation6 + $0xb0] sm:$0xff]  ;;  %v416_v32 = vld [vmem:[#allocation8 + $0xa8] sm:$0xff] }
  0x5c   :  { %5004 = vst [vmem:[#allocation24_spill] sm:$0xff] %v3907_v19  ;;  %v3918_v33 = vpack.c.bf16 %v379_v31, %v377_v29  ;;  %v417_v38 = vld [vmem:[#allocation8 + $0xb0] sm:$0xff]  ;;  %v382_v43 = vld [vmem:[#allocation6 + $0xc8] sm:$0xff]  ;;  %v384_v45 = vld [vmem:[#allocation6 + $0xd8] sm:$0xff] }
  0x5d   :  { %2656 = vmatpush1.bf16.msra.mxu0 %v3890_v58  ;;  %v381_v46 = vld [vmem:[#allocation6 + $0xc0] sm:$0xff]  ;;  %v3928_v47 = vpack.c.bf16 %v384_v45, %v382_v43  ;;  %v422_v52 = vld [vmem:[#allocation8 + $0xd8] sm:$0xff]  ;;  %v388_v60 = vld [vmem:[#allocation6 + $0xf8] sm:$0xff] }
  0x5e   :  { %2692 = vmatpush1.bf16.msra.mxu1 %v3895_v63  ;;  %v421_v56 = vld [vmem:[#allocation8 + $0xd0] sm:$0xff]  ;;  %v386_v57 = vld [vmem:[#allocation6 + $0xe8] sm:$0xff]  ;;  %v423_v10 = vld [vmem:[#allocation8 + $0xe0] sm:$0xff] }
  0x5f   :  { %2694 = vmatprep.subr.bf16.mxu1 %v3907_v19  ;;  %v385_v61 = vld [vmem:[#allocation6 + $0xe0] sm:$0xff]  ;;  %v391_v27 = vld [vmem:[#allocation6 + $0x110] sm:$0xff]  ;;  %v428_v29 = vld [vmem:[#allocation8 + $0x108] sm:$0xff] }
  0x60   :  { %v425_v14 = vld [vmem:[#allocation8 + $0xf0] sm:$0xff]  ;;  %v430_v31 = vld [vmem:[#allocation8 + $0x118] sm:$0xff]  ;;  %v3965_v45 = vld [vmem:[#allocation8 + $0x128] sm:$0x3f] }
  0x61   :  { %v389_v25 = vld [vmem:[#allocation6 + $0x100] sm:$0xff]  ;;  %v3963_v43 = vld [vmem:[#allocation6 + $0x128] sm:$0x3f]  ;;  %5014 = vst [vmem:[#allocation34_spill] sm:$0xff] %v3965_v45 }
  0xcd   :  { %v3839_v6 = vpop.trf.xlu0 }
  0xce   :  { %v143_v7 = vrot.slane %v3839_v6, %v3834_v4  ;;  %v136_v8 = vrot.slane %v3839_v6, %v3837_v5  ;;  %v150_v22 = vrot.slane %v3839_v6, %v149_v9  ;;  %v157_v36 = vrot.slane %v3839_v6, %v156_v23 }
  0xcf   :  { %v164_v50 = vrot.slane %v3839_v6, %v163_v37  ;;  %v171_v0 = vrot.slane %v3839_v6, %v170_v51  ;;  %v178_v23 = vrot.slane %v3839_v6, %v177_v1  ;;  %v415_v37 = vld [vmem:[#allocation8 + $0xa0] sm:$0xff]  ;;  %v185_v42 = vrot.slane %v3839_v6, %v184_v24  ;;  %v420_v51 = vld [vmem:[#allocation8 + $0xc8] sm:$0xff] }
  0xd0   :  { %145 = vbcast.lane.b32.xlu1 %v143_v7, 256  ;;  %138 = vbcast.lane.b32.xlu0 %v136_v8, 256  ;;  %v374_v7 = vld [vmem:[#allocation6 + $0x88] sm:$0xff]  ;;  %v376_v8 = vld [vmem:[#allocation6 + $0x98] sm:$0xff]  ;;  %v3923_v41 = vpack.c.bf16 %v417_v38, %v415_v37  ;;  %v3933_v55 = vpack.c.bf16 %v422_v52, %v420_v51  ;;  %v419_v6 = vld [vmem:[#allocation8 + $0xc0] sm:$0xff]  ;;  %v3939_v1 = vpack.c.bf16 %v388_v60, %v386_v57 }
  0xd1   :  { %v3901_v9 = vpack.c.bf16 %v376_v8, %v374_v7  ;;  %v3936_v59 = vpack.c.bf16 %v421_v56, %v419_v6  ;;  %v424_v7 = vld [vmem:[#allocation8 + $0xe8] sm:$0xff]  ;;  %v426_v8 = vld [vmem:[#allocation8 + $0xf8] sm:$0xff]  ;;  %v3953_v37 = vpack.c.bf16 %v430_v31, %v428_v29  ;;  %v3956_v38 = vpack.c.bf16 %v391_v27, %v389_v25  ;;  %v3975_v52 = vld [vmem:[#allocation8 + $0x120] sm:$0x3f] }
  0xd2   :  { %5007 = vst [vmem:[#allocation27_spill] sm:$0xff] %v3923_v41  ;;  %5008 = vst [vmem:[#allocation28_spill] sm:$0xff] %v3933_v55  ;;  %v3944_v12 = vpack.c.bf16 %v426_v8, %v424_v7  ;;  %v436_v51 = vld [vmem:[#allocation9 + $0x18] sm:$0xff] }
  0xd3   :  { %2658 = vmatprep.subr.bf16.mxu0 %v3901_v9  ;;  %5009 = vst [vmem:[#allocation29_spill] sm:$0xff] %v3936_v59  ;;  %5012 = vst [vmem:[#allocation32_spill] sm:$0xff] %v3953_v37  ;;  %v189_v56 = vld [vmem:[%s4929_s1] sm:$0x3] }
  0xd4   :  { %152 = vbcast.lane.b32.xlu1 %v150_v22, 256  ;;  %v3909_v22 = vpack.c.bf16 %v413_v18, %v411_v17  ;;  %2660 = vmatpush1.bf16.msra.mxu0 %v3904_v13  ;;  %5010 = vst [vmem:[#allocation30_spill] sm:$0xff] %v3944_v12  ;;  %v390_v17 = vld [vmem:[#allocation6 + $0x108] sm:$0xff]  ;;  %v392_v18 = vld [vmem:[#allocation6 + $0x118] sm:$0xff]  ;;  %5016 = vst [vmem:[#allocation36_spill] sm:$0xff] %v3975_v52  ;;  %v4001_v7 = vrot.slane %v189_v56, %v3834_v4 }
  0xd5   :  { %2662 = vmatprep.subr.bf16.mxu0 %v3915_v28  ;;  %v3950_v24 = vpack.c.bf16 %v392_v18, %v390_v17  ;;  %v245_v57 = vld [vmem:[%s4930_s2] sm:$0x3] }
  0xd6   :  { %5005 = vst [vmem:[#allocation25_spill] sm:$0xff] %v3909_v22  ;;  %2696 = vmatpush1.bf16.msra.mxu1 %v3909_v22  ;;  %v217_v60 = vld [vmem:[%s4935_s7] sm:$0x3]  ;;  %v4004_v8 = vrot.slane %v245_v57, %v3837_v5 }
  0xd7   :  { %v4013_v17 = vrot.slane %v217_v60, %v3834_v4  ;;  %v301_v27 = vld [vmem:[%s4931_s3] sm:$0x3] }
  0xd8   :  { %159 = vbcast.lane.b32.xlu1 %v157_v36, 256  ;;  %v418_v36 = vld [vmem:[#allocation8 + $0xb8] sm:$0xff]  ;;  %2664 = vmatpush1.bf16.msra.mxu0 %v3918_v33 }
  0xd9   :  { %v3921_v39 = vpack.c.bf16 %v418_v36, %v416_v32  ;;  %2666 = vmatprep.subr.bf16.mxu0 %v3928_v47  ;;  %v427_v32 = vld [vmem:[#allocation8 + $0x100] sm:$0xff]  ;;  %v429_v36 = vld [vmem:[#allocation8 + $0x110] sm:$0xff] }
  0xdb   :  { %5006 = vst [vmem:[#allocation26_spill] sm:$0xff] %v3921_v39  ;;  %2698 = vmatprep.subr.bf16.mxu1 %v3921_v39 }
  0xdc   :  { %166 = vbcast.lane.b32.xlu1 %v164_v50, 256  ;;  %v383_v50 = vld [vmem:[#allocation6 + $0xd0] sm:$0xff]  ;;  %2700 = vmatpush1.bf16.msra.mxu1 %v3923_v41 }
  0xdd   :  { %v3931_v53 = vpack.c.bf16 %v383_v50, %v381_v46  ;;  %2702 = vmatprep.subr.bf16.mxu1 %v3933_v55  ;;  %v3971_v46 = vld [vmem:[#allocation6 + $0x120] sm:$0x3f]  ;;  %v434_v50 = vld [vmem:[#allocation9 + $0x8] sm:$0xff] }
  0xde   :  { %5015 = vst [vmem:[#allocation35_spill] sm:$0xff] %v3971_v46  ;;  %v3977_v6 = vpack.c.bf16 %v436_v51, %v434_v50 }
  0xdf   :  { %2668 = vmatpush1.bf16.msra.mxu0 %v3931_v53 }
  0xe0   :  { %173 = vbcast.lane.b32.xlu1 %v171_v0, 256  ;;  %v387_v0 = vld [vmem:[#allocation6 + $0xf0] sm:$0xff]  ;;  %2704 = vmatpush1.bf16.msra.mxu1 %v3936_v59  ;;  %5017 = vst [vmem:[#allocation37_spill] sm:$0xff] %v3977_v6 }
  0xe1   :  { %v3942_v11 = vpack.c.bf16 %v387_v0, %v385_v61  ;;  %2670 = vmatprep.subr.bf16.mxu0 %v3939_v1  ;;  %2706 = vmatprep.subr.bf16.mxu1 %v3944_v12  ;;  %v273_v61 = vld [vmem:[%s4936_s8] sm:$0x3]  ;;  %v3998_v0 = vrot.slane %v189_v56, %v3837_v5 }
  0xe2   :  { %v4016_v18 = vrot.slane %v273_v61, %v3837_v5  ;;  %v4019_v25 = vrot.slane %v273_v61, %v3834_v4 }
  0xe3   :  { %2672 = vmatpush1.bf16.msra.mxu0 %v3942_v11 }
  0xe4   :  { %180 = vbcast.lane.b32.xlu1 %v178_v23, 256  ;;  %v3948_v23 = vpack.c.bf16 %v425_v14, %v423_v10  ;;  %2674 = vmatprep.subr.bf16.mxu0 %v3950_v24  ;;  %v4007_v10 = vrot.slane %v245_v57, %v3834_v4  ;;  %v4010_v14 = vrot.slane %v217_v60, %v3837_v5 }
  0xe5   :  { %v4038_v57 = vrot.slane %v301_v27, %v3837_v5  ;;  %v4041_v60 = vrot.slane %v301_v27, %v3834_v4 }
  0xe6   :  { %5011 = vst [vmem:[#allocation31_spill] sm:$0xff] %v3948_v23  ;;  %2708 = vmatpush1.bf16.msra.mxu1 %v3948_v23 }
  0xe7   :  { %2710 = vmatprep.subr.bf16.mxu1 %v3953_v37  ;;  %2676 = vmatpush1.bf16.msra.mxu0 %v3956_v38 }
  0xe8   :  { %187 = vbcast.lane.b32.xlu1 %v185_v42, 256  ;;  %v3960_v42 = vpack.c.bf16 %v429_v36, %v427_v32  ;;  %2549 = vmatprep.subr.msk.mxu0 %vm523_vm0, %v3963_v43  ;;  %v329_v32 = vld [vmem:[%s4937_s9] sm:$0x3] }
  0xe9   :  { %v4053_v37 = vrot.slane %v329_v32, %v3834_v4 }
  0xea   :  { %5013 = vst [vmem:[#allocation33_spill] sm:$0xff] %v3960_v42  ;;  %2712 = vmatpush1.bf16.msra.mxu1 %v3960_v42  ;;  %v4050_v42 = vrot.slane %v329_v32, %v3837_v5 }
  0xeb   :  { %2552 = vmatprep.subr.msk.mxu1 %vm523_vm0, %v3965_v45  ;;  %2550 = vmatpush1.msk.msra.mxu0 %vm523_vm0, %v3971_v46 }
  0xec   :  { %2714 = vmatprep.subr.bf16.mxu0 %v3977_v6 }
  0xee   :  { %2553 = vmatpush1.msk.msra.mxu1 %vm523_vm0, %v3975_v52 }
  0xef   :  { %2750 = vmatprep.subr.bf16.mxu1 %v3846_v15 }
 0x142   :  { %v146_v29 = vpop.permute.xlu1 %145  ;;  %v4024_v31 = vpop.permute.xlu0 %138 }
 0x143   :  { %v201_v36 = vmul.f32 %v3998_v0, %v4024_v31  ;;  %v202_v50 = vmul.f32 %v4001_v7, %v4024_v31  ;;  %v257_v51 = vmul.f32 %v4004_v8, %v4024_v31  ;;  %v258_v56 = vmul.f32 %v4007_v10, %v4024_v31 }
 0x144   :  { %v203_v61 = vmul.f32 %v3998_v0, %v146_v29  ;;  %v259_v2 = vmul.f32 %v4004_v8, %v146_v29  ;;  %v315_v41 = vmul.f32 %v4038_v57, %v146_v29  ;;  %v316_v32 = vmul.f32 %v4041_v60, %v146_v29 }
 0x145   :  { %v229_v3 = vadd.f32 %v4010_v14, %v201_v36  ;;  %v230_v15 = vadd.f32 %v4013_v17, %v202_v50  ;;  %v285_v52 = vadd.f32 %v4016_v18, %v257_v51  ;;  %v286_v45 = vadd.f32 %v4019_v25, %v258_v56 }
 0x146   :  { %v153_v27 = vpop.permute.xlu1 %152  ;;  %v4056_v23 = vadd.f32 %v4010_v14, %v203_v61  ;;  %v4059_v12 = vadd.f32 %v4016_v18, %v259_v2  ;;  %v204_v51 = vmul.f32 %v4001_v7, %v146_v29  ;;  %v260_v56 = vmul.f32 %v4007_v10, %v146_v29 }
 0x147   :  { %v2545_v36 = vmul.f32 -1.442695, %v229_v3  ;;  %v2546_v59 = vmul.f32 -1.442695, %v230_v15  ;;  %v2547_v50 = vmul.f32 -1.442695, %v285_v52  ;;  %v205_v61 = vmul.f32 %v3998_v0, %v153_v27 }
 0x148   :  { %5018 = vst [vmem:[#allocation38_spill] sm:$0xff] %v4056_v23  ;;  %5019 = vst [vmem:[#allocation39_spill] sm:$0xff] %v4059_v12  ;;  %v2548_v55 = vmul.f32 -1.442695, %v286_v45  ;;  %v4066_v39 = vadd.f32 %v4013_v17, %v204_v51  ;;  %v261_v2 = vmul.f32 %v4004_v8, %v153_v27  ;;  %v4071_v15 = vadd.f32 %v4019_v25, %v260_v56 }
 0x149   :  { %3408 = vpow2.f32 %v2545_v36  ;;  %v4074_v45 = vadd.f32 %v4050_v42, %v315_v41  ;;  %v4077_v52 = vadd.f32 %v4053_v37, %v316_v32  ;;  %v4080_v29 = vadd.f32 %v4010_v14, %v205_v61 }
 0x14a   :  { %5020 = vst [vmem:[#allocation40_spill] sm:$0xff] %v4066_v39  ;;  %3410 = vpow2.f32 %v2546_v59  ;;  %v160_v3 = vpop.permute.xlu1 %159  ;;  %5021 = vst [vmem:[#allocation41_spill] sm:$0xff] %v4071_v15  ;;  %v4083_v36 = vadd.f32 %v4016_v18, %v261_v2  ;;  %v206_v51 = vmul.f32 %v4001_v7, %v153_v27  ;;  %v262_v59 = vmul.f32 %v4007_v10, %v153_v27 }
 0x14b   :  { %5022 = vst [vmem:[#allocation42_spill] sm:$0xff] %v4074_v45  ;;  %5023 = vst [vmem:[#allocation43_spill] sm:$0xff] %v4077_v52  ;;  %3412 = vpow2.f32 %v2547_v50  ;;  %v317_v56 = vmul.f32 %v4038_v57, %v153_v27  ;;  %v318_v41 = vmul.f32 %v4041_v60, %v153_v27  ;;  %v207_v50 = vmul.f32 %v3998_v0, %v160_v3 }
 0x14c   :  { %5024 = vst [vmem:[#allocation44_spill] sm:$0xff] %v4080_v29  ;;  %5025 = vst [vmem:[#allocation45_spill] sm:$0xff] %v4083_v36  ;;  %3414 = vpow2.f32 %v2548_v55  ;;  %v4090_v45 = vadd.f32 %v4013_v17, %v206_v51  ;;  %v263_v32 = vmul.f32 %v4004_v8, %v160_v3  ;;  %v208_v61 = vmul.f32 %v4001_v7, %v160_v3 }
 0x14d   :  { %v4096_v36 = vadd.f32 %v4019_v25, %v262_v59  ;;  %v4099_v55 = vadd.f32 %v4050_v42, %v317_v56  ;;  %v4102_v29 = vadd.f32 %v4053_v37, %v318_v41  ;;  %v264_v27 = vmul.f32 %v4007_v10, %v160_v3 }
 0x14e   :  { %5026 = vst [vmem:[#allocation46_spill] sm:$0xff] %v4090_v45  ;;  %v167_v2 = vpop.permute.xlu1 %166  ;;  %v4106_v51 = vadd.f32 %v4010_v14, %v207_v50  ;;  %v4109_v45 = vadd.f32 %v4016_v18, %v263_v32  ;;  %v4112_v52 = vadd.f32 %v4013_v17, %v208_v61  ;;  %v319_v59 = vmul.f32 %v4038_v57, %v160_v3 }
 0x14f   :  { %5027 = vst [vmem:[#allocation47_spill] sm:$0xff] %v4096_v36  ;;  %5028 = vst [vmem:[#allocation48_spill] sm:$0xff] %v4099_v55  ;;  %v4116_v36 = vadd.f32 %v4019_v25, %v264_v27  ;;  %v320_v56 = vmul.f32 %v4041_v60, %v160_v3  ;;  %v209_v41 = vmul.f32 %v3998_v0, %v167_v2 }
 0x150   :  { %5029 = vst [vmem:[#allocation49_spill] sm:$0xff] %v4102_v29  ;;  %5030 = vst [vmem:[#allocation50_spill] sm:$0xff] %v4106_v51  ;;  %v265_v29 = vmul.f32 %v4004_v8, %v167_v2  ;;  %v4122_v50 = vadd.f32 %v4050_v42, %v319_v59  ;;  %v210_v32 = vmul.f32 %v4001_v7, %v167_v2 }
 0x151   :  { %5031 = vst [vmem:[#allocation51_spill] sm:$0xff] %v4109_v45  ;;  %5032 = vst [vmem:[#allocation52_spill] sm:$0xff] %v4112_v52  ;;  %v266_v45 = vmul.f32 %v4007_v10, %v167_v2  ;;  %v321_v61 = vmul.f32 %v4038_v57, %v167_v2  ;;  %v4128_v51 = vadd.f32 %v4053_v37, %v320_v56 }
 0x152   :  { %5033 = vst [vmem:[#allocation53_spill] sm:$0xff] %v4116_v36  ;;  %5034 = vst [vmem:[#allocation54_spill] sm:$0xff] %v4122_v50  ;;  %v174_v52 = vpop.permute.xlu1 %173  ;;  %v4131_v27 = vadd.f32 %v4010_v14, %v209_v41  ;;  %v4134_v3 = vadd.f32 %v4016_v18, %v265_v29  ;;  %v322_v36 = vmul.f32 %v4041_v60, %v167_v2  ;;  %v471_v50 = vld [vmem:[%s4938_s10] sm:$0x3] }
 0x153   :  { %5035 = vst [vmem:[#allocation55_spill] sm:$0xff] %v4128_v51  ;;  %v3409_v59 = vpop.eup %3408  ;;  %v4141_v55 = vadd.f32 %v4013_v17, %v210_v32  ;;  %v4144_v15 = vadd.f32 %v4019_v25, %v266_v45  ;;  %v4147_v56 = vadd.f32 %v4050_v42, %v321_v61  ;;  %v211_v41 = vmul.f32 %v3998_v0, %v174_v52 }
 0x154   :  { %5036 = vst [vmem:[#allocation56_spill] sm:$0xff] %v4131_v27  ;;  %5037 = vst [vmem:[#allocation57_spill] sm:$0xff] %v4134_v3  ;;  %v3411_v29 = vpop.eup %3410  ;;  %v478_v3 = vadd.f32 1.0, %v3409_v59  ;;  %v4151_v2 = vadd.f32 %v4053_v37, %v322_v36  ;;  %v267_v27 = vmul.f32 %v4004_v8, %v174_v52  ;;  %v212_v51 = vmul.f32 %v4001_v7, %v174_v52 }
 0x155   :  { %5038 = vst [vmem:[#allocation58_spill] sm:$0xff] %v4141_v55  ;;  %5039 = vst [vmem:[#allocation59_spill] sm:$0xff] %v4144_v15  ;;  %v3413_v39 = vpop.eup %3412  ;;  %v479_v32 = vadd.f32 1.0, %v3411_v29  ;;  %v4156_v55 = vadd.f32 %v4010_v14, %v211_v41  ;;  %v268_v45 = vmul.f32 %v4007_v10, %v174_v52  ;;  %v323_v61 = vmul.f32 %v4038_v57, %v174_v52 }
 0x156   :  { %5040 = vst [vmem:[#allocation60_spill] sm:$0xff] %v4147_v56  ;;  %5041 = vst [vmem:[#allocation61_spill] sm:$0xff] %v4151_v2  ;;  %v3415_v56 = vpop.eup %3414  ;;  %v4161_v15 = vrot.slane %v471_v50, %v3837_v5  ;;  %3416 = vrcp.f32 %v478_v3  ;;  %v181_v36 = vpop.permute.xlu1 %180  ;;  %v4164_v59 = vadd.f32 %v4016_v18, %v267_v27  ;;  %v4167_v2 = vadd.f32 %v4013_v17, %v212_v51 }
 0x157   :  { %5042 = vst [vmem:[#allocation62_spill] sm:$0xff] %v4156_v55  ;;  %v4170_v29 = vrot.slane %v471_v50, %v3834_v4  ;;  %3418 = vrcp.f32 %v479_v32  ;;  %v4173_v41 = vadd.f32 %v4019_v25, %v268_v45  ;;  %v4176_v55 = vadd.f32 %v4050_v42, %v323_v61 }
 0x158   :  { %5043 = vst [vmem:[#allocation63_spill] sm:$0xff] %v4161_v15  ;;  %5044 = vst [vmem:[#allocation64_spill] sm:$0xff] %v4164_v59  ;;  %v313_v3 = vmul.f32 %v4038_v57, %v4024_v31  ;;  %v324_v12 = vmul.f32 %v4041_v60, %v174_v52  ;;  %v213_v27 = vmul.f32 %v3998_v0, %v181_v36 }
 0x159   :  { %5045 = vst [vmem:[#allocation65_spill] sm:$0xff] %v4167_v2  ;;  %5046 = vst [vmem:[#allocation66_spill] sm:$0xff] %v4170_v29  ;;  %v269_v51 = vmul.f32 %v4004_v8, %v181_v36  ;;  %v314_v50 = vmul.f32 %v4041_v60, %v4024_v31  ;;  %v214_v32 = vmul.f32 %v4001_v7, %v181_v36 }
 0x15a   :  { %5047 = vst [vmem:[#allocation67_spill] sm:$0xff] %v4173_v41  ;;  %5048 = vst [vmem:[#allocation68_spill] sm:$0xff] %v4176_v55  ;;  %v270_v45 = vmul.f32 %v4007_v10, %v181_v36  ;;  %v325_v41 = vmul.f32 %v4038_v57, %v181_v36  ;;  %v188_v61 = vpop.permute.xlu1 %187  ;;  %v4189_v55 = vadd.f32 %v4053_v37, %v324_v12 }
 0x15b   :  { %v4192_v2 = vadd.f32 %v4010_v14, %v213_v27  ;;  %v4195_v52 = vadd.f32 %v4016_v18, %v269_v51  ;;  %v326_v59 = vmul.f32 %v4041_v60, %v181_v36  ;;  %v4199_v31 = vadd.f32 %v4013_v17, %v214_v32 }
 0x15c   :  { %5049 = vst [vmem:[#allocation69_spill] sm:$0xff] %v4189_v55  ;;  %v4202_v23 = vadd.f32 %v4019_v25, %v270_v45  ;;  %v4205_v22 = vadd.f32 %v4050_v42, %v325_v41  ;;  %v215_v12 = vmul.f32 %v3998_v0, %v188_v61  ;;  %v271_v27 = vmul.f32 %v4004_v8, %v188_v61 }
 0x15d   :  { %5050 = vst [vmem:[#allocation70_spill] sm:$0xff] %v4192_v2  ;;  %5051 = vst [vmem:[#allocation71_spill] sm:$0xff] %v4195_v52  ;;  %v4209_v55 = vadd.f32 %v4053_v37, %v326_v59  ;;  %v216_v51 = vmul.f32 %v4001_v7, %v188_v61  ;;  %v272_v36 = vmul.f32 %v4007_v10, %v188_v61  ;;  %v490_v52 = vadd.f32 1.0, %v3413_v39  ;;  %v5071_v2 = vld [vmem:[#allocation34_spill] sm:$0xff] }
 0x15e   :  { %5052 = vst [vmem:[#allocation72_spill] sm:$0xff] %v4199_v31  ;;  %5053 = vst [vmem:[#allocation73_spill] sm:$0xff] %v4202_v23  ;;  %v4215_v32 = vadd.f32 %v4010_v14, %v215_v12  ;;  %v327_v45 = vmul.f32 %v4038_v57, %v188_v61  ;;  %v328_v41 = vmul.f32 %v4041_v60, %v188_v61  ;;  %v5069_v23 = vld [vmem:[#allocation32_spill] sm:$0xff]  ;;  %v5070_v31 = vld [vmem:[#allocation33_spill] sm:$0xff] }
 0x15f   :  { %5054 = vst [vmem:[#allocation74_spill] sm:$0xff] %v4205_v22  ;;  %5055 = vst [vmem:[#allocation75_spill] sm:$0xff] %v4209_v55  ;;  %v491_v22 = vadd.f32 1.0, %v3415_v56  ;;  %v4220_v0 = vadd.f32 %v4016_v18, %v271_v27  ;;  %v4223_v59 = vadd.f32 %v4013_v17, %v216_v51  ;;  %v4226_v8 = vadd.f32 %v4019_v25, %v272_v36  ;;  %v2359_v27 = vld [vmem:[%s4939_s11] sm:$0x3]  ;;  %s3699_s11 = smov [#allocation11]  }
 0x160   :  { %5056 = vst [vmem:[#allocation76_spill] sm:$0xff] %v4215_v32  ;;  %v4229_v7 = vadd.f32 %v4050_v42, %v327_v45  ;;  %v4232_v39 = vadd.f32 %v4053_v37, %v328_v41  ;;  %v3417_v10 = vpop.eup %3416  ;;  %v341_v57 = vadd.f32 %v4050_v42, %v313_v3  ;;  %3420 = vrcp.f32 %v490_v52  ;;  %v433_v45 = vld [vmem:[#allocation9] sm:$0xff]  ;;  %v438_v41 = vld [vmem:[#allocation9 + $0x28] sm:$0xff]  ;;  %v5068_v55 = vld [vmem:[#allocation31_spill] sm:$0xff]  ;;  %s2534_s24 = sshll.u32 %s3699_s11, 4  ;;  %s2535_s24 = int_to_ptr.vmem [resolvable:$true] %s2534_s24 }
 0x161   :  { %5057 = vst [vmem:[#allocation77_spill] sm:$0xff] %v4220_v0  ;;  %5058 = vst [vmem:[#allocation78_spill] sm:$0xff] %v4223_v59  ;;  %v3419_v14 = vpop.eup %3418  ;;  %v507_v60 = vmul.f32 %v3417_v10, %v4161_v15  ;;  %v342_v18 = vadd.f32 %v4053_v37, %v314_v50  ;;  %3422 = vrcp.f32 %v491_v22  ;;  %v435_v37 = vld [vmem:[#allocation9 + $0x10] sm:$0xff]  ;;  %v4242_v50 = vrot.slane %v2359_v27, %v3837_v5  ;;  %v440_v10 = vld [vmem:[#allocation9 + $0x38] sm:$0xff]  ;;  %s3662_s14 = scalar_lea.vmem %s2535_s24, 128  ;;  %p3667_p5 = scmp.lt.s32.totalorder %s2535_s24, %s2535_s24 }
 0x162   :  { %5059 = vst [vmem:[#allocation79_spill] sm:$0xff] %v4226_v8  ;;  %5060 = vst [vmem:[#allocation80_spill] sm:$0xff] %v4229_v7  ;;  %v508_v17 = vmul.f32 %v3419_v14, %v4170_v29  ;;  %v4245_v14 = vrot.slane %v2359_v27, %v3834_v4  ;;  %v437_v5 = vld [vmem:[#allocation9 + $0x20] sm:$0xff]  ;;  %v463_v8 = vld [vmem:[#allocation9 + $0xf0] sm:$0xff]  ;;  %p3663_p4 = scmp.ne.s32.totalorder %s2535_s24, %s3662_s14  ;;  %p3668_p6 = scmp.lt.s32.totalorder %s3662_s14, %s3662_s14 }
 0x163   :  { %5061 = vst [vmem:[#allocation81_spill] sm:$0xff] %v4232_v39  ;;  %v509_v25 = vadd.f32 %v507_v60, %v341_v57  ;;  %v459_v39 = vld [vmem:[#allocation9 + $0xd0] sm:$0xff]  ;;  %v5067_v32 = vld [vmem:[#allocation30_spill] sm:$0xff] }
 0x164   :  { %v510_v56 = vadd.f32 %v508_v17, %v342_v18  ;;  %v4251_v18 = vpack.c.bf16 %v435_v37, %v433_v45  ;;  %v4253_v17 = vpack.c.bf16 %v440_v10, %v438_v41  ;;  %v446_v45 = vld [vmem:[#allocation9 + $0x68] sm:$0xff]  ;;  %v448_v37 = vld [vmem:[#allocation9 + $0x78] sm:$0xff]  ;;  %v445_v10 = vld [vmem:[#allocation9 + $0x60] sm:$0xff]  ;;  %p3669_p7 = por %p3668_p6, %p3667_p5 }
 0x165   :  { %3424 = vtanh.f32 %v509_v25  ;;  %v4280_v41 = vpack.c.bf16 %v448_v37, %v446_v45  ;;  %v453_v37 = vld [vmem:[#allocation9 + $0xa0] sm:$0xff]  ;;  %v467_v0 = vld [vmem:[#allocation9 + $0x110] sm:$0xff] }
 0x166   :  { %3426 = vtanh.f32 %v510_v56  ;;  %v439_v56 = vld [vmem:[#allocation9 + $0x30] sm:$0xff]  ;;  %p3670_p8 = pnand %p3669_p7, %p3663_p4 }
 0x16a   :  { %v3421_v61 = vpop.eup %3420 }
 0x16b   :  { %v3423_v12 = vpop.eup %3422  ;;  %v513_v51 = vsub.f32 1.0, %v3421_v61  ;;  %v442_v61 = vld [vmem:[#allocation9 + $0x48] sm:$0xff] }
 0x16c   :  { %v514_v3 = vsub.f32 1.0, %v3423_v12  ;;  %v444_v12 = vld [vmem:[#allocation9 + $0x58] sm:$0xff] }
 0x16f   :  { %v3425_v42 = vpop.eup %3424 }
 0x170   :  { %v3427_v36 = vpop.eup %3426  ;;  %v515_v52 = vmul.f32 %v3425_v42, %v513_v51  ;;  %v4269_v51 = vpack.c.bf16 %v439_v56, %v437_v5  ;;  %v450_v5 = vld [vmem:[#allocation9 + $0x88] sm:$0xff]  ;;  %v452_v56 = vld [vmem:[#allocation9 + $0x98] sm:$0xff] }
 0x171   :  { %v516_v22 = vmul.f32 %v3427_v36, %v514_v3  ;;  %v4272_v3 = vpack.c.bf16 %v444_v12, %v442_v61  ;;  %v441_v36 = vld [vmem:[#allocation9 + $0x40] sm:$0xff]  ;;  %v4288_v61 = vpack.c.bf16 %v452_v56, %v450_v5  ;;  %v460_v5 = vld [vmem:[#allocation9 + $0xd8] sm:$0xff] }
 0x172   :  { %v4247_v57 = vmax.f32 %v515_v52, 0.0  ;;  %v443_v52 = vld [vmem:[#allocation9 + $0x50] sm:$0xff]  ;;  %v449_v12 = vld [vmem:[#allocation9 + $0x80] sm:$0xff] }
 0x173   :  { %v4249_v60 = vmax.f32 %v516_v22, 0.0  ;;  %v4277_v22 = vpack.c.bf16 %v443_v52, %v441_v36  ;;  %v456_v36 = vld [vmem:[#allocation9 + $0xb8] sm:$0xff] }
 0x174   :  { %v2371_v25 = vmul.f32 %v4242_v50, %v4247_v57 }
 0x175   :  { %2551 = vmatprep.mubr.msk.f32.mxu0 %vm519_vm1, %v4249_v60  ;;  %2554 = vmatprep.mubr.msk.f32.mxu1 %vm519_vm1, %v4249_v60  ;;  %v2372_v4 = vmul.f32 %v4245_v14, %v4249_v60 }
 0x176   :  { %595 = vmatmul.mubr.f32.vlgmr.msra.gmra.mrb[0].mxu0 %v4247_v57  ;;  %672 = vmatmul.mubr.f32.vlgmr.msra.gmra.mrb[0].mxu1 %v4247_v57 }
 0x177   :  { %2716 = vmatpush1.bf16.msra.mxu0 %v4251_v18  ;;  %2557 = vmatprep.mubr.msk.f32.mxu0 %vm519_vm1, %v4249_v60  ;;  %v2387_v27 = vsel %vm519_vm1, %v2372_v4, 0.0 }
 0x178   :  { %2718 = vmatprep.subr.bf16.mxu0 %v4253_v17  ;;  %v2388_v42 = vadd.f32 %v2387_v27, %v2371_v25  ;;  %2752 = vmatpush1.bf16.msra.mxu1 %v3848_v16  ;;  %v447_v25 = vld [vmem:[#allocation9 + $0x70] sm:$0xff] }
 0x179   :  { %2754 = vmatprep.subr.bf16.mxu1 %v3859_v26  ;;  %v4285_v4 = vpack.c.bf16 %v447_v25, %v445_v10  ;;  %v451_v27 = vld [vmem:[#allocation9 + $0x90] sm:$0xff]  ;;  %v458_v25 = vld [vmem:[#allocation9 + $0xc8] sm:$0xff] }
 0x17a   :  { %2389 = vadd.xlane.f32.xlu1 %v2388_v42  ;;  %v454_v42 = vld [vmem:[#allocation9 + $0xa8] sm:$0xff]  ;;  %v4293_v52 = vpack.c.bf16 %v451_v27, %v449_v12  ;;  %v455_v10 = vld [vmem:[#allocation9 + $0xb0] sm:$0xff]  ;;  %v4304_v12 = vpack.c.bf16 %v460_v5, %v458_v25  ;;  %v457_v27 = vld [vmem:[#allocation9 + $0xc0] sm:$0xff] }
 0x17b   :  { %2720 = vmatpush1.bf16.msra.mxu0 %v4269_v51  ;;  %v4296_v45 = vpack.c.bf16 %v456_v36, %v454_v42  ;;  %v4301_v56 = vpack.c.bf16 %v455_v10, %v453_v37  ;;  %v462_v42 = vld [vmem:[#allocation9 + $0xe8] sm:$0xff]  ;;  %v464_v36 = vld [vmem:[#allocation9 + $0xf8] sm:$0xff]  ;;  %v4309_v7 = vpack.c.bf16 %v459_v39, %v457_v27  ;;  %v461_v10 = vld [vmem:[#allocation9 + $0xe0] sm:$0xff] }
 0x17c   :  { %2722 = vmatprep.subr.bf16.mxu0 %v4272_v3  ;;  %2756 = vmatpush1.bf16.msra.mxu1 %v3862_v30  ;;  %v4312_v37 = vpack.c.bf16 %v464_v36, %v462_v42  ;;  %v466_v25 = vld [vmem:[#allocation9 + $0x108] sm:$0xff]  ;;  %v468_v5 = vld [vmem:[#allocation9 + $0x118] sm:$0xff]  ;;  %v4317_v59 = vpack.c.bf16 %v463_v8, %v461_v10  ;;  %v465_v27 = vld [vmem:[#allocation9 + $0x100] sm:$0xff] }
 0x17d   :  { %2758 = vmatprep.subr.bf16.mxu1 %v3873_v40  ;;  %v4320_v39 = vpack.c.bf16 %v468_v5, %v466_v25  ;;  %v4325_v42 = vpack.c.bf16 %v467_v0, %v465_v27  ;;  %v4329_v8 = vld [vmem:[#allocation9 + $0x128] sm:$0x3f]  ;;  %v4335_v36 = vld [vmem:[#allocation9 + $0x120] sm:$0x3f]  ;;  %v5064_v25 = vld [vmem:[#allocation27_spill] sm:$0xff] }
 0x17e   :  { %v5062_v0 = vld [vmem:[#allocation25_spill] sm:$0xff]  ;;  %v5063_v10 = vld [vmem:[#allocation26_spill] sm:$0xff]  ;;  %v5065_v5 = vld [vmem:[#allocation28_spill] sm:$0xff] }
 0x17f   :  { %2724 = vmatpush1.bf16.msra.mxu0 %v4277_v22  ;;  %v5066_v27 = vld [vmem:[#allocation29_spill] sm:$0xff] }
 0x180   :  { %2726 = vmatprep.subr.bf16.mxu0 %v4280_v41  ;;  %2760 = vmatpush1.bf16.msra.mxu1 %v3876_v44 }
 0x181   :  { %2762 = vmatprep.subr.bf16.mxu1 %v3887_v54 }
 0x183   :  { %2728 = vmatpush1.bf16.msra.mxu0 %v4285_v4 }
 0x184   :  { %2730 = vmatprep.subr.bf16.mxu0 %v4288_v61  ;;  %2764 = vmatpush1.bf16.msra.mxu1 %v3890_v58 }
 0x185   :  { %2766 = vmatprep.subr.bf16.mxu1 %v3901_v9 }
 0x187   :  { %2732 = vmatpush1.bf16.msra.mxu0 %v4293_v52 }
 0x188   :  { %2734 = vmatprep.subr.bf16.mxu0 %v4296_v45  ;;  %2768 = vmatpush1.bf16.msra.mxu1 %v3904_v13 }
 0x189   :  { %2770 = vmatprep.subr.bf16.mxu1 %v3915_v28 }
 0x18b   :  { %2736 = vmatpush1.bf16.msra.mxu0 %v4301_v56 }
 0x18c   :  { %2738 = vmatprep.subr.bf16.mxu0 %v4304_v12  ;;  %2772 = vmatpush1.bf16.msra.mxu1 %v3918_v33 }
 0x18d   :  { %2774 = vmatprep.subr.bf16.mxu1 %v3928_v47 }
 0x18f   :  { %2740 = vmatpush1.bf16.msra.mxu0 %v4309_v7 }
 0x190   :  { %2742 = vmatprep.subr.bf16.mxu0 %v4312_v37  ;;  %2776 = vmatpush1.bf16.msra.mxu1 %v3931_v53 }
 0x191   :  { %2778 = vmatprep.subr.bf16.mxu1 %v3939_v1 }
 0x193   :  { %2744 = vmatpush1.bf16.msra.mxu0 %v4317_v59 }
 0x194   :  { %2746 = vmatprep.subr.bf16.mxu0 %v4320_v39  ;;  %2780 = vmatpush1.bf16.msra.mxu1 %v3942_v11 }
 0x195   :  { %2782 = vmatprep.subr.bf16.mxu1 %v3950_v24 }
 0x197   :  { %2748 = vmatpush1.bf16.msra.mxu0 %v4325_v42 }
 0x198   :  { %2555 = vmatprep.subr.msk.mxu0 %vm523_vm0, %v4329_v8  ;;  %2784 = vmatpush1.bf16.msra.mxu1 %v3956_v38 }
 0x199   :  { %2562 = vmatprep.subr.msk.mxu1 %vm523_vm0, %v3963_v43 }
 0x19b   :  { %2556 = vmatpush1.msk.msra.mxu0 %vm523_vm0, %v4335_v36 }
 0x19c   :  { %749 = vmatmul.mubr.f32.vlgmr.msra.gmra.mrb[2].mxu0 %v4247_v57  ;;  %2786 = vmatprep.subr.bf16.mxu0 %v3850_v20 }
 0x19d   :  { %2788 = vmatpush1.bf16.msra.mxu0 %v3852_v21  ;;  %2563 = vmatpush1.msk.msra.mxu1 %vm523_vm0, %v3971_v46 }
 0x19e   :  { %2790 = vmatprep.subr.bf16.mxu0 %v3865_v34  ;;  %2822 = vmatprep.subr.bf16.mxu1 %v3977_v6 }
 0x1a1   :  { %2792 = vmatpush1.bf16.msra.mxu0 %v3867_v35 }
 0x1a2   :  { %2794 = vmatprep.subr.bf16.mxu0 %v3879_v48  ;;  %v5077_v48 = vld [vmem:[#allocation41_spill] sm:$0xff] }
 0x1a5   :  { %2796 = vmatpush1.bf16.msra.mxu0 %v3881_v49  ;;  %v5076_v49 = vld [vmem:[#allocation40_spill] sm:$0xff] }
 0x1a6   :  { %2798 = vmatprep.subr.bf16.mxu0 %v3893_v62 }
 0x1a9   :  { %2800 = vmatpush1.bf16.msra.mxu0 %v3895_v63  ;;  %v5075_v63 = vld [vmem:[#allocation39_spill] sm:$0xff] }
 0x1aa   :  { %2802 = vmatprep.subr.bf16.mxu0 %v3907_v19  ;;  %v5074_v19 = vld [vmem:[#allocation38_spill] sm:$0xff] }
 0x1ad   :  { %2804 = vmatpush1.bf16.msra.mxu0 %v5062_v0  ;;  %v5072_v0 = vld [vmem:[#allocation36_spill] sm:$0xff] }
 0x1ae   :  { %2806 = vmatprep.subr.bf16.mxu0 %v5063_v10  ;;  %v5073_v10 = vld [vmem:[#allocation17_spill] sm:$0xff] }
 0x1b1   :  { %2808 = vmatpush1.bf16.msra.mxu0 %v5064_v25 }
 0x1b2   :  { %2810 = vmatprep.subr.bf16.mxu0 %v5065_v5 }
 0x1b5   :  { %2812 = vmatpush1.bf16.msra.mxu0 %v5066_v27 }
 0x1b6   :  { %2814 = vmatprep.subr.bf16.mxu0 %v5067_v32 }
 0x1b9   :  { %2816 = vmatpush1.bf16.msra.mxu0 %v5068_v55 }
 0x1ba   :  { %2818 = vmatprep.subr.bf16.mxu0 %v5069_v23 }
 0x1bd   :  { %2820 = vmatpush1.bf16.msra.mxu0 %v5070_v31 }
 0x1be   :  { %2565 = vmatprep.subr.msk.mxu0 %vm523_vm0, %v5071_v2 }
 0x1c1   :  { %2566 = vmatpush1.msk.msra.mxu0 %vm523_vm0, %v5072_v0 }
 0x1c2   :  { %2858 = vmatprep.subr.bf16.mxu0 %v5073_v10 }
 0x249   :  { %v596_v25 = vpop.f32.mrb[0].mxu0  ;;  %v673_v5 = vpop.f32.mrb[0].mxu1 }
 0x24a   :  { %v755_v27 = vadd.f32 %v596_v25, %v5074_v19  ;;  %v769_v32 = vadd.f32 %v673_v5, %v5075_v63  ;;  %v598_v62 = vpop.f32.mrb[1].mxu0  ;;  %v675_v55 = vpop.f32.mrb[1].mxu1 }
 0x24b   :  { %v756_v23 = vadd.f32 %v598_v62, %v5076_v49  ;;  %v770_v31 = vadd.f32 %v675_v55, %v5077_v48 }
 0x24c   :  { %v2558_v35 = vmul.f32 -1.442695, %v755_v27  ;;  %v2560_v2 = vmul.f32 -1.442695, %v769_v32 }
 0x24d   :  { %v2559_v6 = vmul.f32 -1.442695, %v756_v23  ;;  %v2561_v0 = vmul.f32 -1.442695, %v770_v31 }
 0x24e   :  { %3428 = vpow2.f32 %v2558_v35 }
 0x24f   :  { %3430 = vpow2.f32 %v2559_v6 }
 0x250   :  { %3432 = vpow2.f32 %v2560_v2 }
 0x251   :  { %3434 = vpow2.f32 %v2561_v0 }
 0x258   :  { %v3429_v34 = vpop.eup %3428 }
 0x259   :  { %v3431_v10 = vpop.eup %3430  ;;  %v763_v46 = vadd.f32 1.0, %v3429_v34  ;;  %v5078_v34 = vld [vmem:[#allocation42_spill] sm:$0xff] }
 0x25a   :  { %v764_v19 = vadd.f32 1.0, %v3431_v10  ;;  %v3433_v63 = vpop.eup %3432 }
 0x25b   :  { %3436 = vrcp.f32 %v763_v46  ;;  %v3435_v25 = vpop.eup %3434  ;;  %v777_v5 = vadd.f32 1.0, %v3433_v63  ;;  %v5079_v46 = vld [vmem:[#allocation43_spill] sm:$0xff] }
 0x25c   :  { %3438 = vrcp.f32 %v764_v19  ;;  %v778_v49 = vadd.f32 1.0, %v3435_v25 }
 0x25d   :  { %3440 = vrcp.f32 %v777_v5 }
 0x25e   :  { %3442 = vrcp.f32 %v778_v49 }
 0x265   :  { %v3437_v35 = vpop.eup %3436 }
 0x266   :  { %v3439_v55 = vpop.eup %3438 }
 0x267   :  { %v3441_v10 = vpop.eup %3440 }
 0x268   :  { %v3443_v27 = vpop.eup %3442  ;;  %v789_v19 = vsub.f32 1.0, %v3441_v10 }
 0x269   :  { %v790_v25 = vsub.f32 1.0, %v3443_v27  ;;  %v794_v5 = vmul.f32 %v3443_v27, %v4249_v60  ;;  %v5080_v60 = vld [vmem:[#allocation35_spill] sm:$0xff]  ;;  %v5089_v27 = vld [vmem:[#allocation25_spill] sm:$0xff] }
 0x26f   :  { %v750_v62 = vpop.f32.mrb[2].mxu0 }
 0x270   :  { %v751_v48 = vadd.f32 %v750_v62, %v4161_v15  ;;  %v752_v23 = vpop.f32.mrb[3].mxu0 }
 0x271   :  { %v753_v6 = vadd.f32 %v752_v23, %v4170_v29  ;;  %v793_v23 = vmul.f32 %v3441_v10, %v4247_v57  ;;  %v5088_v10 = vld [vmem:[#allocation24_spill] sm:$0xff] }
 0x272   :  { %v783_v31 = vmul.f32 %v3437_v35, %v751_v48 }
 0x273   :  { %v784_v2 = vmul.f32 %v3439_v55, %v753_v6 }
 0x274   :  { %v785_v32 = vadd.f32 %v783_v31, %v5078_v34  ;;  %v5081_v31 = vld [vmem:[#allocation18_spill] sm:$0xff]  ;;  %v5083_v34 = vld [vmem:[#allocation19_spill] sm:$0xff] }
 0x275   :  { %v786_v0 = vadd.f32 %v784_v2, %v5079_v46  ;;  %v5082_v2 = vld [vmem:[#allocation37_spill] sm:$0xff]  ;;  %v5086_v46 = vld [vmem:[#allocation22_spill] sm:$0xff] }
 0x276   :  { %3444 = vtanh.f32 %v785_v32  ;;  %v5084_v32 = vld [vmem:[#allocation20_spill] sm:$0xff] }
 0x277   :  { %3446 = vtanh.f32 %v786_v0  ;;  %v5087_v0 = vld [vmem:[#allocation23_spill] sm:$0xff] }
 0x280   :  { %v3445_v63 = vpop.eup %3444 }
 0x281   :  { %v3447_v62 = vpop.eup %3446  ;;  %v791_v15 = vmul.f32 %v3445_v63, %v789_v19  ;;  %v5090_v19 = vld [vmem:[#allocation26_spill] sm:$0xff]  ;;  %v5091_v63 = vld [vmem:[#allocation27_spill] sm:$0xff] }
 0x282   :  { %v792_v29 = vmul.f32 %v3447_v62, %v790_v25  ;;  %v5092_v25 = vld [vmem:[#allocation28_spill] sm:$0xff]  ;;  %v5093_v62 = vld [vmem:[#allocation29_spill] sm:$0xff] }
 0x283   :  { %v795_v49 = vadd.f32 %v793_v23, %v791_v15  ;;  %v5094_v23 = vld [vmem:[#allocation30_spill] sm:$0xff] }
 0x284   :  { %v796_v48 = vadd.f32 %v794_v5, %v792_v29  ;;  %v5095_v5 = vld [vmem:[#allocation31_spill] sm:$0xff] }
 0x285   :  { %v4379_v35 = vmax.f32 %v795_v49, 0.0  ;;  %v5096_v49 = vld [vmem:[#allocation32_spill] sm:$0xff] }
 0x286   :  { %v4381_v6 = vmax.f32 %v796_v48, 0.0  ;;  %v5097_v48 = vld [vmem:[#allocation33_spill] sm:$0xff] }
 0x287   :  { %v2373_v15 = vmul.f32 %v4242_v50, %v4379_v35 }
 0x288   :  { %2564 = vmatprep.mubr.msk.f32.mxu1 %vm519_vm1, %v4381_v6  ;;  %2567 = vmatprep.mubr.msk.f32.mxu0 %vm519_vm1, %v4381_v6  ;;  %v2374_v55 = vmul.f32 %v4245_v14, %v4381_v6 }
 0x289   :  { %867 = vmatmul.mubr.f32.vlgmr.msra.gmra.mrb[2].mxu1 %v4379_v35  ;;  %938 = vmatmul.mubr.f32.vlgmr.msra.gmra.mrb[4].mxu0 %v4379_v35 }
 0x28a   :  { %2824 = vmatpush1.bf16.msra.mxu1 %v4251_v18  ;;  %2570 = vmatprep.mubr.msk.f32.mxu1 %vm519_vm1, %v4381_v6  ;;  %v2391_v29 = vsel %vm519_vm1, %v2374_v55, 0.0  ;;  %v5098_v55 = vld [vmem:[#allocation34_spill] sm:$0xff] }
 0x28b   :  { %2826 = vmatprep.subr.bf16.mxu1 %v4253_v17  ;;  %v2392_v57 = vadd.f32 %v2391_v29, %v2373_v15  ;;  %2860 = vmatpush1.bf16.msra.mxu0 %v3848_v16  ;;  %v5099_v15 = vld [vmem:[#allocation36_spill] sm:$0xff]  ;;  %v5100_v29 = vld [vmem:[#allocation17_spill] sm:$0xff] }
 0x28c   :  { %2862 = vmatprep.subr.bf16.mxu0 %v3859_v26 }
 0x28d   :  { %2393 = vadd.xlane.f32.xlu0 %v2392_v57 }
 0x28e   :  { %2828 = vmatpush1.bf16.msra.mxu1 %v4269_v51 }
 0x28f   :  { %2830 = vmatprep.subr.bf16.mxu1 %v4272_v3  ;;  %2864 = vmatpush1.bf16.msra.mxu0 %v3862_v30 }
 0x290   :  { %2866 = vmatprep.subr.bf16.mxu0 %v3873_v40 }
 0x292   :  { %2832 = vmatpush1.bf16.msra.mxu1 %v4277_v22 }
 0x293   :  { %2834 = vmatprep.subr.bf16.mxu1 %v4280_v41  ;;  %2868 = vmatpush1.bf16.msra.mxu0 %v3876_v44 }
 0x294   :  { %2870 = vmatprep.subr.bf16.mxu0 %v3887_v54 }
 0x296   :  { %2836 = vmatpush1.bf16.msra.mxu1 %v4285_v4 }
 0x297   :  { %2838 = vmatprep.subr.bf16.mxu1 %v4288_v61  ;;  %2872 = vmatpush1.bf16.msra.mxu0 %v3890_v58 }
 0x298   :  { %2874 = vmatprep.subr.bf16.mxu0 %v3901_v9 }
 0x29a   :  { %2840 = vmatpush1.bf16.msra.mxu1 %v4293_v52 }
 0x29b   :  { %2842 = vmatprep.subr.bf16.mxu1 %v4296_v45  ;;  %2876 = vmatpush1.bf16.msra.mxu0 %v3904_v13 }
 0x29c   :  { %2878 = vmatprep.subr.bf16.mxu0 %v3915_v28 }
 0x29e   :  { %2844 = vmatpush1.bf16.msra.mxu1 %v4301_v56 }
 0x29f   :  { %2846 = vmatprep.subr.bf16.mxu1 %v4304_v12  ;;  %2880 = vmatpush1.bf16.msra.mxu0 %v3918_v33 }
 0x2a0   :  { %2882 = vmatprep.subr.bf16.mxu0 %v3928_v47 }
 0x2a2   :  { %2848 = vmatpush1.bf16.msra.mxu1 %v4309_v7 }
 0x2a3   :  { %2850 = vmatprep.subr.bf16.mxu1 %v4312_v37  ;;  %2884 = vmatpush1.bf16.msra.mxu0 %v3931_v53 }
 0x2a4   :  { %2886 = vmatprep.subr.bf16.mxu0 %v3939_v1 }
 0x2a6   :  { %2852 = vmatpush1.bf16.msra.mxu1 %v4317_v59 }
 0x2a7   :  { %2854 = vmatprep.subr.bf16.mxu1 %v4320_v39  ;;  %2888 = vmatpush1.bf16.msra.mxu0 %v3942_v11 }
 0x2a8   :  { %2890 = vmatprep.subr.bf16.mxu0 %v3950_v24 }
 0x2aa   :  { %2856 = vmatpush1.bf16.msra.mxu1 %v4325_v42 }
 0x2ab   :  { %2568 = vmatprep.subr.msk.mxu1 %vm523_vm0, %v4329_v8  ;;  %2892 = vmatpush1.bf16.msra.mxu0 %v3956_v38 }
 0x2ac   :  { %2575 = vmatprep.subr.msk.mxu0 %vm523_vm0, %v3963_v43  ;;  %v5085_v43 = vld [vmem:[#allocation21_spill] sm:$0xff] }
 0x2ae   :  { %2569 = vmatpush1.msk.msra.mxu1 %vm523_vm0, %v4335_v36 }
 0x2af   :  { %1009 = vmatmul.mubr.f32.vlgmr.msra.gmra.mrb[4].mxu1 %v4379_v35  ;;  %2894 = vmatprep.subr.bf16.mxu1 %v3850_v20 }
 0x2b0   :  { %2896 = vmatpush1.bf16.msra.mxu1 %v3852_v21  ;;  %2576 = vmatpush1.msk.msra.mxu0 %vm523_vm0, %v5080_v60 }
 0x2b1   :  { %2898 = vmatprep.subr.bf16.mxu1 %v5081_v31  ;;  %2930 = vmatprep.subr.bf16.mxu0 %v5082_v2 }
 0x2b4   :  { %2900 = vmatpush1.bf16.msra.mxu1 %v5083_v34 }
 0x2b5   :  { %2902 = vmatprep.subr.bf16.mxu1 %v5084_v32 }
 0x2b8   :  { %2904 = vmatpush1.bf16.msra.mxu1 %v5085_v43 }
 0x2b9   :  { %2906 = vmatprep.subr.bf16.mxu1 %v5086_v46 }
 0x2bc   :  { %2908 = vmatpush1.bf16.msra.mxu1 %v5087_v0 }
 0x2bd   :  { %2910 = vmatprep.subr.bf16.mxu1 %v5088_v10  ;;  %v5104_v10 = vld [vmem:[#allocation47_spill] sm:$0xff] }
 0x2c0   :  { %2912 = vmatpush1.bf16.msra.mxu1 %v5089_v27  ;;  %v5103_v27 = vld [vmem:[#allocation46_spill] sm:$0xff] }
 0x2c1   :  { %2914 = vmatprep.subr.bf16.mxu1 %v5090_v19 }
 0x2c4   :  { %2916 = vmatpush1.bf16.msra.mxu1 %v5091_v63  ;;  %v5102_v63 = vld [vmem:[#allocation45_spill] sm:$0xff] }
 0x2c5   :  { %2918 = vmatprep.subr.bf16.mxu1 %v5092_v25  ;;  %v5101_v25 = vld [vmem:[#allocation44_spill] sm:$0xff] }
 0x2c8   :  { %2920 = vmatpush1.bf16.msra.mxu1 %v5093_v62 }
 0x2c9   :  { %2922 = vmatprep.subr.bf16.mxu1 %v5094_v23 }
 0x2cc   :  { %2924 = vmatpush1.bf16.msra.mxu1 %v5095_v5 }
 0x2cd   :  { %2926 = vmatprep.subr.bf16.mxu1 %v5096_v49 }
 0x2d0   :  { %2928 = vmatpush1.bf16.msra.mxu1 %v5097_v48 }
 0x2d1   :  { %2578 = vmatprep.subr.msk.mxu1 %vm523_vm0, %v5098_v55 }
 0x2d4   :  { %2579 = vmatpush1.msk.msra.mxu1 %vm523_vm0, %v5099_v15 }
 0x2d5   :  { %2966 = vmatprep.subr.bf16.mxu1 %v5100_v29 }
 0x35c   :  { %v868_v57 = vpop.f32.mrb[2].mxu1  ;;  %v939_v60 = vpop.f32.mrb[4].mxu0 }
 0x35d   :  { %v1015_v62 = vadd.f32 %v868_v57, %v5101_v25  ;;  %v1029_v23 = vadd.f32 %v939_v60, %v5102_v63  ;;  %v870_v19 = vpop.f32.mrb[3].mxu1  ;;  %v941_v5 = vpop.f32.mrb[5].mxu0 }
 0x35e   :  { %v1016_v49 = vadd.f32 %v870_v19, %v5103_v27  ;;  %v1030_v48 = vadd.f32 %v941_v5, %v5104_v10  ;;  %v5105_v10 = vld [vmem:[#allocation63_spill] sm:$0xff] }
 0x35f   :  { %v2571_v0 = vmul.f32 -1.442695, %v1015_v62  ;;  %v2573_v55 = vmul.f32 -1.442695, %v1029_v23 }
 0x360   :  { %v2572_v46 = vmul.f32 -1.442695, %v1016_v49  ;;  %v2574_v15 = vmul.f32 -1.442695, %v1030_v48 }
 0x361   :  { %3448 = vpow2.f32 %v2571_v0 }
 0x362   :  { %3450 = vpow2.f32 %v2572_v46  ;;  %v5106_v46 = vld [vmem:[#allocation66_spill] sm:$0xff] }
 0x363   :  { %3452 = vpow2.f32 %v2573_v55 }
 0x364   :  { %3454 = vpow2.f32 %v2574_v15 }
 0x36b   :  { %v3449_v43 = vpop.eup %3448 }
 0x36c   :  { %v3451_v29 = vpop.eup %3450  ;;  %v1023_v32 = vadd.f32 1.0, %v3449_v43  ;;  %v5107_v43 = vld [vmem:[#allocation48_spill] sm:$0xff] }
 0x36d   :  { %v1024_v25 = vadd.f32 1.0, %v3451_v29  ;;  %v3453_v63 = vpop.eup %3452 }
 0x36e   :  { %3456 = vrcp.f32 %v1023_v32  ;;  %v3455_v57 = vpop.eup %3454  ;;  %v1037_v60 = vadd.f32 1.0, %v3453_v63  ;;  %v5108_v32 = vld [vmem:[#allocation49_spill] sm:$0xff] }
 0x36f   :  { %3458 = vrcp.f32 %v1024_v25  ;;  %v1038_v27 = vadd.f32 1.0, %v3455_v57 }
 0x370   :  { %3460 = vrcp.f32 %v1037_v60 }
 0x371   :  { %3462 = vrcp.f32 %v1038_v27 }
 0x378   :  { %v3457_v0 = vpop.eup %3456 }
 0x379   :  { %v3459_v49 = vpop.eup %3458 }
 0x37a   :  { %v3461_v25 = vpop.eup %3460 }
 0x37b   :  { %v3463_v63 = vpop.eup %3462  ;;  %v1049_v57 = vsub.f32 1.0, %v3461_v25 }
 0x37c   :  { %v1054_v60 = vmul.f32 %v3463_v63, %v4381_v6 }
 0x382   :  { %v1010_v19 = vpop.f32.mrb[4].mxu1 }
 0x383   :  { %v1011_v62 = vadd.f32 %v1010_v19, %v5105_v10  ;;  %v1012_v5 = vpop.f32.mrb[5].mxu1  ;;  %v1050_v19 = vsub.f32 1.0, %v3463_v63  ;;  %v5118_v63 = vld [vmem:[#allocation26_spill] sm:$0xff] }
 0x384   :  { %v1013_v23 = vadd.f32 %v1012_v5, %v5106_v46  ;;  %v1053_v5 = vmul.f32 %v3461_v25, %v4379_v35  ;;  %v5117_v25 = vld [vmem:[#allocation25_spill] sm:$0xff] }
 0x385   :  { %v1043_v48 = vmul.f32 %v3457_v0, %v1011_v62 }
 0x386   :  { %v1044_v55 = vmul.f32 %v3459_v49, %v1013_v23  ;;  %v5110_v49 = vld [vmem:[#allocation37_spill] sm:$0xff] }
 0x387   :  { %v1045_v29 = vadd.f32 %v1043_v48, %v5107_v43  ;;  %v5111_v48 = vld [vmem:[#allocation19_spill] sm:$0xff]  ;;  %v5113_v43 = vld [vmem:[#allocation21_spill] sm:$0xff] }
 0x388   :  { %v1046_v15 = vadd.f32 %v1044_v55, %v5108_v32  ;;  %v5112_v55 = vld [vmem:[#allocation20_spill] sm:$0xff]  ;;  %v5115_v32 = vld [vmem:[#allocation23_spill] sm:$0xff] }
 0x389   :  { %3464 = vtanh.f32 %v1045_v29  ;;  %v5114_v29 = vld [vmem:[#allocation22_spill] sm:$0xff] }
 0x38a   :  { %3466 = vtanh.f32 %v1046_v15  ;;  %v5116_v15 = vld [vmem:[#allocation24_spill] sm:$0xff] }
 0x393   :  { %v3465_v34 = vpop.eup %3464 }
 0x394   :  { %v3467_v10 = vpop.eup %3466  ;;  %v1051_v2 = vmul.f32 %v3465_v34, %v1049_v57  ;;  %v5119_v57 = vld [vmem:[#allocation27_spill] sm:$0xff] }
 0x395   :  { %v1052_v46 = vmul.f32 %v3467_v10, %v1050_v19  ;;  %v4526_v10 = vld [vmem:[#allocation6 + $0x128] sm:$0x3f]  ;;  %v5120_v19 = vld [vmem:[#allocation28_spill] sm:$0xff] }
 0x396   :  { %v1055_v27 = vadd.f32 %v1053_v5, %v1051_v2  ;;  %v5121_v5 = vld [vmem:[#allocation29_spill] sm:$0xff] }
 0x397   :  { %v1056_v62 = vadd.f32 %v1054_v60, %v1052_v46  ;;  %v4535_v46 = vld [vmem:[#allocation6 + $0x120] sm:$0x3f]  ;;  %v5122_v60 = vld [vmem:[#allocation30_spill] sm:$0xff] }
 0x398   :  { %v4473_v0 = vmax.f32 %v1055_v27, 0.0  ;;  %5109 = vst [vmem:[#allocation38_spill] sm:$0xff] %v4535_v46  ;;  %v5123_v27 = vld [vmem:[#allocation31_spill] sm:$0xff] }
 0x399   :  { %v4475_v23 = vmax.f32 %v1056_v62, 0.0  ;;  %v5124_v62 = vld [vmem:[#allocation32_spill] sm:$0xff] }
 0x39a   :  { %v2375_v35 = vmul.f32 %v4242_v50, %v4473_v0 }
 0x39b   :  { %2577 = vmatprep.mubr.msk.f32.mxu0 %vm519_vm1, %v4475_v23  ;;  %2580 = vmatprep.mubr.msk.f32.mxu1 %vm519_vm1, %v4475_v23  ;;  %v2376_v34 = vmul.f32 %v4245_v14, %v4475_v23 }
 0x39c   :  { %1127 = vmatmul.mubr.f32.vlgmr.msra.gmra.mrb[6].mxu0 %v4473_v0  ;;  %1198 = vmatmul.mubr.f32.vlgmr.msra.gmra.mrb[6].mxu1 %v4473_v0 }
 0x39d   :  { %2932 = vmatpush1.bf16.msra.mxu0 %v4251_v18  ;;  %2583 = vmatprep.mubr.msk.f32.mxu0 %vm519_vm1, %v4475_v23  ;;  %v2395_v6 = vsel %vm519_vm1, %v2376_v34, 0.0  ;;  %v5125_v34 = vld [vmem:[#allocation33_spill] sm:$0xff] }
 0x39e   :  { %2934 = vmatprep.subr.bf16.mxu0 %v4253_v17  ;;  %v2396_v2 = vadd.f32 %v2395_v6, %v2375_v35  ;;  %2968 = vmatpush1.bf16.msra.mxu1 %v3848_v16  ;;  %v4556_v35 = vld [vmem:[#allocation8 + $0x128] sm:$0x3f]  ;;  %v4560_v6 = vld [vmem:[#allocation8 + $0x120] sm:$0x3f] }
 0x39f   :  { %2970 = vmatprep.subr.bf16.mxu1 %v3859_v26  ;;  %5126 = vst [vmem:[#allocation39_spill] sm:$0xff] %v4556_v35  ;;  %5127 = vst [vmem:[#allocation40_spill] sm:$0xff] %v4560_v6 }
 0x3a0   :  { %2397 = vadd.xlane.f32.xlu1 %v2396_v2  ;;  %v5128_v2 = vld [vmem:[#allocation17_spill] sm:$0xff] }
 0x3a1   :  { %2936 = vmatpush1.bf16.msra.mxu0 %v4269_v51 }
 0x3a2   :  { %2938 = vmatprep.subr.bf16.mxu0 %v4272_v3  ;;  %2972 = vmatpush1.bf16.msra.mxu1 %v3862_v30 }
 0x3a3   :  { %2974 = vmatprep.subr.bf16.mxu1 %v3873_v40 }
 0x3a5   :  { %2940 = vmatpush1.bf16.msra.mxu0 %v4277_v22 }
 0x3a6   :  { %2942 = vmatprep.subr.bf16.mxu0 %v4280_v41  ;;  %2976 = vmatpush1.bf16.msra.mxu1 %v3876_v44 }
 0x3a7   :  { %2978 = vmatprep.subr.bf16.mxu1 %v3887_v54 }
 0x3a9   :  { %2944 = vmatpush1.bf16.msra.mxu0 %v4285_v4 }
 0x3aa   :  { %2946 = vmatprep.subr.bf16.mxu0 %v4288_v61  ;;  %2980 = vmatpush1.bf16.msra.mxu1 %v3890_v58 }
 0x3ab   :  { %2982 = vmatprep.subr.bf16.mxu1 %v3901_v9 }
 0x3ad   :  { %2948 = vmatpush1.bf16.msra.mxu0 %v4293_v52 }
 0x3ae   :  { %2950 = vmatprep.subr.bf16.mxu0 %v4296_v45  ;;  %2984 = vmatpush1.bf16.msra.mxu1 %v3904_v13 }
 0x3af   :  { %2986 = vmatprep.subr.bf16.mxu1 %v3915_v28 }
 0x3b1   :  { %2952 = vmatpush1.bf16.msra.mxu0 %v4301_v56 }
 0x3b2   :  { %2954 = vmatprep.subr.bf16.mxu0 %v4304_v12  ;;  %2988 = vmatpush1.bf16.msra.mxu1 %v3918_v33 }
 0x3b3   :  { %2990 = vmatprep.subr.bf16.mxu1 %v3928_v47 }
 0x3b5   :  { %2956 = vmatpush1.bf16.msra.mxu0 %v4309_v7 }
 0x3b6   :  { %2958 = vmatprep.subr.bf16.mxu0 %v4312_v37  ;;  %2992 = vmatpush1.bf16.msra.mxu1 %v3931_v53 }
 0x3b7   :  { %2994 = vmatprep.subr.bf16.mxu1 %v3939_v1 }
 0x3b9   :  { %2960 = vmatpush1.bf16.msra.mxu0 %v4317_v59 }
 0x3ba   :  { %2962 = vmatprep.subr.bf16.mxu0 %v4320_v39  ;;  %2996 = vmatpush1.bf16.msra.mxu1 %v3942_v11 }
 0x3bb   :  { %2998 = vmatprep.subr.bf16.mxu1 %v3950_v24 }
 0x3bd   :  { %2964 = vmatpush1.bf16.msra.mxu0 %v4325_v42 }
 0x3be   :  { %2581 = vmatprep.subr.msk.mxu0 %vm523_vm0, %v4329_v8  ;;  %3000 = vmatpush1.bf16.msra.mxu1 %v3956_v38 }
 0x3bf   :  { %2588 = vmatprep.subr.msk.mxu1 %vm523_vm0, %v4526_v10 }
 0x3c1   :  { %2582 = vmatpush1.msk.msra.mxu0 %vm523_vm0, %v4335_v36 }
 0x3c2   :  { %1269 = vmatmul.mubr.f32.vlgmr.msra.gmra.mrb[8].mxu0 %v4473_v0  ;;  %3002 = vmatprep.subr.bf16.mxu0 %v3850_v20 }
 0x3c3   :  { %3004 = vmatpush1.bf16.msra.mxu0 %v3852_v21  ;;  %2589 = vmatpush1.msk.msra.mxu1 %vm523_vm0, %v4535_v46 }
 0x3c4   :  { %3006 = vmatprep.subr.bf16.mxu0 %v5081_v31  ;;  %3038 = vmatprep.subr.bf16.mxu1 %v5110_v49 }
 0x3c7   :  { %3008 = vmatpush1.bf16.msra.mxu0 %v5111_v48 }
 0x3c8   :  { %3010 = vmatprep.subr.bf16.mxu0 %v5112_v55 }
 0x3cb   :  { %3012 = vmatpush1.bf16.msra.mxu0 %v5113_v43 }
 0x3cc   :  { %3014 = vmatprep.subr.bf16.mxu0 %v5114_v29 }
 0x3cf   :  { %3016 = vmatpush1.bf16.msra.mxu0 %v5115_v32  ;;  %v5132_v32 = vld [vmem:[#allocation53_spill] sm:$0xff] }
 0x3d0   :  { %3018 = vmatprep.subr.bf16.mxu0 %v5116_v15 }
 0x3d3   :  { %3020 = vmatpush1.bf16.msra.mxu0 %v5117_v25  ;;  %v5131_v25 = vld [vmem:[#allocation52_spill] sm:$0xff] }
 0x3d4   :  { %3022 = vmatprep.subr.bf16.mxu0 %v5118_v63 }
 0x3d7   :  { %3024 = vmatpush1.bf16.msra.mxu0 %v5119_v57  ;;  %v5130_v57 = vld [vmem:[#allocation51_spill] sm:$0xff] }
 0x3d8   :  { %3026 = vmatprep.subr.bf16.mxu0 %v5120_v19  ;;  %v5129_v19 = vld [vmem:[#allocation50_spill] sm:$0xff] }
 0x3db   :  { %3028 = vmatpush1.bf16.msra.mxu0 %v5121_v5 }
 0x3dc   :  { %3030 = vmatprep.subr.bf16.mxu0 %v5122_v60 }
 0x3df   :  { %3032 = vmatpush1.bf16.msra.mxu0 %v5123_v27 }
 0x3e0   :  { %3034 = vmatprep.subr.bf16.mxu0 %v5124_v62 }
 0x3e3   :  { %3036 = vmatpush1.bf16.msra.mxu0 %v5125_v34 }
 0x3e4   :  { %2591 = vmatprep.subr.msk.mxu0 %vm523_vm0, %v4556_v35 }
 0x3e7   :  { %2592 = vmatpush1.msk.msra.mxu0 %vm523_vm0, %v4560_v6 }
 0x3e8   :  { %3074 = vmatprep.subr.bf16.mxu0 %v5128_v2 }
 0x46f   :  { %v1128_v5 = vpop.f32.mrb[6].mxu0  ;;  %v1199_v60 = vpop.f32.mrb[6].mxu1 }
 0x470   :  { %v1275_v27 = vadd.f32 %v1128_v5, %v5129_v19  ;;  %v1289_v62 = vadd.f32 %v1199_v60, %v5130_v57  ;;  %v1130_v63 = vpop.f32.mrb[7].mxu0  ;;  %v1201_v34 = vpop.f32.mrb[7].mxu1 }
 0x471   :  { %v1276_v15 = vadd.f32 %v1130_v63, %v5131_v25  ;;  %v1290_v29 = vadd.f32 %v1201_v34, %v5132_v32  ;;  %v5133_v32 = vld [vmem:[#allocation63_spill] sm:$0xff] }
 0x472   :  { %v2584_v35 = vmul.f32 -1.442695, %v1275_v27  ;;  %v2586_v55 = vmul.f32 -1.442695, %v1289_v62 }
 0x473   :  { %v2585_v43 = vmul.f32 -1.442695, %v1276_v15  ;;  %v2587_v6 = vmul.f32 -1.442695, %v1290_v29 }
 0x474   :  { %3468 = vpow2.f32 %v2584_v35 }
 0x475   :  { %3470 = vpow2.f32 %v2585_v43  ;;  %v5134_v43 = vld [vmem:[#allocation66_spill] sm:$0xff] }
 0x476   :  { %3472 = vpow2.f32 %v2586_v55 }
 0x477   :  { %3474 = vpow2.f32 %v2587_v6 }
 0x47e   :  { %v3469_v48 = vpop.eup %3468 }
 0x47f   :  { %v3471_v2 = vpop.eup %3470  ;;  %v1283_v49 = vadd.f32 1.0, %v3469_v48  ;;  %v5135_v48 = vld [vmem:[#allocation54_spill] sm:$0xff] }
 0x480   :  { %v1284_v19 = vadd.f32 1.0, %v3471_v2  ;;  %v3473_v57 = vpop.eup %3472 }
 0x481   :  { %3476 = vrcp.f32 %v1283_v49  ;;  %v3475_v5 = vpop.eup %3474  ;;  %v1297_v60 = vadd.f32 1.0, %v3473_v57  ;;  %v5136_v49 = vld [vmem:[#allocation55_spill] sm:$0xff] }
 0x482   :  { %3478 = vrcp.f32 %v1284_v19  ;;  %v1298_v25 = vadd.f32 1.0, %v3475_v5 }
 0x483   :  { %3480 = vrcp.f32 %v1297_v60 }
 0x484   :  { %3482 = vrcp.f32 %v1298_v25 }
 0x48b   :  { %v3477_v34 = vpop.eup %3476 }
 0x48c   :  { %v3479_v29 = vpop.eup %3478 }
 0x48d   :  { %v3481_v19 = vpop.eup %3480 }
 0x48e   :  { %v3483_v57 = vpop.eup %3482  ;;  %v1309_v5 = vsub.f32 1.0, %v3481_v19 }
 0x48f   :  { %v1314_v60 = vmul.f32 %v3483_v57, %v4475_v23 }
 0x495   :  { %v1270_v63 = vpop.f32.mrb[8].mxu0 }
 0x496   :  { %v1271_v27 = vadd.f32 %v1270_v63, %v5133_v32  ;;  %v1272_v15 = vpop.f32.mrb[9].mxu0  ;;  %v1310_v63 = vsub.f32 1.0, %v3483_v57  ;;  %v5147_v57 = vld [vmem:[#allocation26_spill] sm:$0xff] }
 0x497   :  { %v1273_v62 = vadd.f32 %v1272_v15, %v5134_v43  ;;  %v1313_v15 = vmul.f32 %v3481_v19, %v4473_v0  ;;  %v5146_v19 = vld [vmem:[#allocation25_spill] sm:$0xff] }
 0x498   :  { %v1303_v35 = vmul.f32 %v3477_v34, %v1271_v27 }
 0x499   :  { %v1304_v55 = vmul.f32 %v3479_v29, %v1273_v62  ;;  %v5139_v29 = vld [vmem:[#allocation37_spill] sm:$0xff] }
 0x49a   :  { %v1305_v6 = vadd.f32 %v1303_v35, %v5135_v48  ;;  %v5140_v35 = vld [vmem:[#allocation19_spill] sm:$0xff]  ;;  %v5142_v48 = vld [vmem:[#allocation21_spill] sm:$0xff] }
 0x49b   :  { %v1306_v2 = vadd.f32 %v1304_v55, %v5136_v49  ;;  %v5141_v55 = vld [vmem:[#allocation20_spill] sm:$0xff]  ;;  %v5144_v49 = vld [vmem:[#allocation23_spill] sm:$0xff] }
 0x49c   :  { %3484 = vtanh.f32 %v1305_v6  ;;  %v5143_v6 = vld [vmem:[#allocation22_spill] sm:$0xff] }
 0x49d   :  { %3486 = vtanh.f32 %v1306_v2  ;;  %v5145_v2 = vld [vmem:[#allocation24_spill] sm:$0xff] }
 0x4a6   :  { %v3485_v31 = vpop.eup %3484 }
 0x4a7   :  { %v3487_v32 = vpop.eup %3486  ;;  %v1311_v46 = vmul.f32 %v3485_v31, %v1309_v5  ;;  %v5148_v5 = vld [vmem:[#allocation27_spill] sm:$0xff] }
 0x4a8   :  { %v1312_v43 = vmul.f32 %v3487_v32, %v1310_v63  ;;  %v5137_v32 = vld [vmem:[#allocation38_spill] sm:$0xff]  ;;  %v5149_v63 = vld [vmem:[#allocation28_spill] sm:$0xff] }
 0x4a9   :  { %v1315_v25 = vadd.f32 %v1313_v15, %v1311_v46  ;;  %v5150_v15 = vld [vmem:[#allocation29_spill] sm:$0xff] }
 0x4aa   :  { %v1316_v27 = vadd.f32 %v1314_v60, %v1312_v43  ;;  %v5138_v43 = vld [vmem:[#allocation18_spill] sm:$0xff] }
 0x4ab   :  { %v4575_v34 = vmax.f32 %v1315_v25, 0.0  ;;  %v5151_v60 = vld [vmem:[#allocation30_spill] sm:$0xff]  ;;  %v5152_v25 = vld [vmem:[#allocation31_spill] sm:$0xff] }
 0x4ac   :  { %v4577_v62 = vmax.f32 %v1316_v27, 0.0  ;;  %v5153_v27 = vld [vmem:[#allocation32_spill] sm:$0xff] }
 0x4ad   :  { %v2377_v0 = vmul.f32 %v4242_v50, %v4575_v34 }
 0x4ae   :  { %2590 = vmatprep.mubr.msk.f32.mxu1 %vm519_vm1, %v4577_v62  ;;  %2593 = vmatprep.mubr.msk.f32.mxu0 %vm519_vm1, %v4577_v62  ;;  %v2378_v31 = vmul.f32 %v4245_v14, %v4577_v62 }
 0x4af   :  { %1387 = vmatmul.mubr.f32.vlgmr.msra.gmra.mrb[8].mxu1 %v4575_v34  ;;  %1458 = vmatmul.mubr.f32.vlgmr.msra.gmra.mrb[10].mxu0 %v4575_v34 }
 0x4b0   :  { %3040 = vmatpush1.bf16.msra.mxu1 %v4251_v18  ;;  %2596 = vmatprep.mubr.msk.f32.mxu1 %vm519_vm1, %v4577_v62  ;;  %v2399_v23 = vsel %vm519_vm1, %v2378_v31, 0.0  ;;  %v5154_v31 = vld [vmem:[#allocation33_spill] sm:$0xff] }
 0x4b1   :  { %3042 = vmatprep.subr.bf16.mxu1 %v4253_v17  ;;  %v2400_v46 = vadd.f32 %v2399_v23, %v2377_v0  ;;  %3076 = vmatpush1.bf16.msra.mxu0 %v3848_v16  ;;  %v5155_v0 = vld [vmem:[#allocation39_spill] sm:$0xff]  ;;  %v5156_v23 = vld [vmem:[#allocation40_spill] sm:$0xff] }
 0x4b2   :  { %3078 = vmatprep.subr.bf16.mxu0 %v3859_v26 }
 0x4b3   :  { %2401 = vadd.xlane.f32.xlu1 %v2400_v46  ;;  %v5157_v46 = vld [vmem:[#allocation17_spill] sm:$0xff] }
 0x4b4   :  { %3044 = vmatpush1.bf16.msra.mxu1 %v4269_v51 }
 0x4b5   :  { %3046 = vmatprep.subr.bf16.mxu1 %v4272_v3  ;;  %3080 = vmatpush1.bf16.msra.mxu0 %v3862_v30 }
 0x4b6   :  { %3082 = vmatprep.subr.bf16.mxu0 %v3873_v40 }
 0x4b8   :  { %3048 = vmatpush1.bf16.msra.mxu1 %v4277_v22 }
 0x4b9   :  { %3050 = vmatprep.subr.bf16.mxu1 %v4280_v41  ;;  %3084 = vmatpush1.bf16.msra.mxu0 %v3876_v44 }
 0x4ba   :  { %3086 = vmatprep.subr.bf16.mxu0 %v3887_v54 }
 0x4bc   :  { %3052 = vmatpush1.bf16.msra.mxu1 %v4285_v4 }
 0x4bd   :  { %3054 = vmatprep.subr.bf16.mxu1 %v4288_v61  ;;  %3088 = vmatpush1.bf16.msra.mxu0 %v3890_v58 }
 0x4be   :  { %3090 = vmatprep.subr.bf16.mxu0 %v3901_v9 }
 0x4c0   :  { %3056 = vmatpush1.bf16.msra.mxu1 %v4293_v52 }
 0x4c1   :  { %3058 = vmatprep.subr.bf16.mxu1 %v4296_v45  ;;  %3092 = vmatpush1.bf16.msra.mxu0 %v3904_v13 }
 0x4c2   :  { %3094 = vmatprep.subr.bf16.mxu0 %v3915_v28 }
 0x4c4   :  { %3060 = vmatpush1.bf16.msra.mxu1 %v4301_v56 }
 0x4c5   :  { %3062 = vmatprep.subr.bf16.mxu1 %v4304_v12  ;;  %3096 = vmatpush1.bf16.msra.mxu0 %v3918_v33 }
 0x4c6   :  { %3098 = vmatprep.subr.bf16.mxu0 %v3928_v47 }
 0x4c8   :  { %3064 = vmatpush1.bf16.msra.mxu1 %v4309_v7 }
 0x4c9   :  { %3066 = vmatprep.subr.bf16.mxu1 %v4312_v37  ;;  %3100 = vmatpush1.bf16.msra.mxu0 %v3931_v53 }
 0x4ca   :  { %3102 = vmatprep.subr.bf16.mxu0 %v3939_v1 }
 0x4cc   :  { %3068 = vmatpush1.bf16.msra.mxu1 %v4317_v59 }
 0x4cd   :  { %3070 = vmatprep.subr.bf16.mxu1 %v4320_v39  ;;  %3104 = vmatpush1.bf16.msra.mxu0 %v3942_v11 }
 0x4ce   :  { %3106 = vmatprep.subr.bf16.mxu0 %v3950_v24 }
 0x4d0   :  { %3072 = vmatpush1.bf16.msra.mxu1 %v4325_v42 }
 0x4d1   :  { %2594 = vmatprep.subr.msk.mxu1 %vm523_vm0, %v4329_v8  ;;  %3108 = vmatpush1.bf16.msra.mxu0 %v3956_v38 }
 0x4d2   :  { %2601 = vmatprep.subr.msk.mxu0 %vm523_vm0, %v4526_v10 }
 0x4d4   :  { %2595 = vmatpush1.msk.msra.mxu1 %vm523_vm0, %v4335_v36 }
 0x4d5   :  { %1529 = vmatmul.mubr.f32.vlgmr.msra.gmra.mrb[10].mxu1 %v4575_v34  ;;  %3110 = vmatprep.subr.bf16.mxu1 %v3850_v20 }
 0x4d6   :  { %3112 = vmatpush1.bf16.msra.mxu1 %v3852_v21  ;;  %2602 = vmatpush1.msk.msra.mxu0 %vm523_vm0, %v5137_v32 }
 0x4d7   :  { %3114 = vmatprep.subr.bf16.mxu1 %v5138_v43  ;;  %3146 = vmatprep.subr.bf16.mxu0 %v5139_v29 }
 0x4da   :  { %3116 = vmatpush1.bf16.msra.mxu1 %v5140_v35 }
 0x4db   :  { %3118 = vmatprep.subr.bf16.mxu1 %v5141_v55 }
 0x4de   :  { %3120 = vmatpush1.bf16.msra.mxu1 %v5142_v48 }
 0x4df   :  { %3122 = vmatprep.subr.bf16.mxu1 %v5143_v6  ;;  %v5161_v6 = vld [vmem:[#allocation59_spill] sm:$0xff] }
 0x4e2   :  { %3124 = vmatpush1.bf16.msra.mxu1 %v5144_v49  ;;  %v5160_v49 = vld [vmem:[#allocation58_spill] sm:$0xff] }
 0x4e3   :  { %3126 = vmatprep.subr.bf16.mxu1 %v5145_v2 }
 0x4e6   :  { %3128 = vmatpush1.bf16.msra.mxu1 %v5146_v19  ;;  %v5159_v19 = vld [vmem:[#allocation57_spill] sm:$0xff] }
 0x4e7   :  { %3130 = vmatprep.subr.bf16.mxu1 %v5147_v57  ;;  %v5158_v57 = vld [vmem:[#allocation56_spill] sm:$0xff] }
 0x4ea   :  { %3132 = vmatpush1.bf16.msra.mxu1 %v5148_v5 }
 0x4eb   :  { %3134 = vmatprep.subr.bf16.mxu1 %v5149_v63 }
 0x4ee   :  { %3136 = vmatpush1.bf16.msra.mxu1 %v5150_v15 }
 0x4ef   :  { %3138 = vmatprep.subr.bf16.mxu1 %v5151_v60 }
 0x4f2   :  { %3140 = vmatpush1.bf16.msra.mxu1 %v5152_v25 }
 0x4f3   :  { %3142 = vmatprep.subr.bf16.mxu1 %v5153_v27 }
 0x4f6   :  { %3144 = vmatpush1.bf16.msra.mxu1 %v5154_v31 }
 0x4f7   :  { %2604 = vmatprep.subr.msk.mxu1 %vm523_vm0, %v5155_v0 }
 0x4fa   :  { %2605 = vmatpush1.msk.msra.mxu1 %vm523_vm0, %v5156_v23 }
 0x4fb   :  { %3182 = vmatprep.subr.bf16.mxu1 %v5157_v46 }
 0x582   :  { %v1388_v5 = vpop.f32.mrb[8].mxu1  ;;  %v1459_v63 = vpop.f32.mrb[10].mxu0 }
 0x583   :  { %v1535_v15 = vadd.f32 %v1388_v5, %v5158_v57  ;;  %v1549_v60 = vadd.f32 %v1459_v63, %v5159_v19  ;;  %v1390_v2 = vpop.f32.mrb[9].mxu1  ;;  %v1461_v25 = vpop.f32.mrb[11].mxu0 }
 0x584   :  { %v1536_v27 = vadd.f32 %v1390_v2, %v5160_v49  ;;  %v1550_v31 = vadd.f32 %v1461_v25, %v5161_v6  ;;  %v5162_v6 = vld [vmem:[#allocation63_spill] sm:$0xff] }
 0x585   :  { %v2597_v48 = vmul.f32 -1.442695, %v1535_v15  ;;  %v2599_v0 = vmul.f32 -1.442695, %v1549_v60 }
 0x586   :  { %v2598_v55 = vmul.f32 -1.442695, %v1536_v27  ;;  %v2600_v23 = vmul.f32 -1.442695, %v1550_v31 }
 0x587   :  { %3488 = vpow2.f32 %v2597_v48 }
 0x588   :  { %3490 = vpow2.f32 %v2598_v55  ;;  %v5163_v55 = vld [vmem:[#allocation66_spill] sm:$0xff] }
 0x589   :  { %3492 = vpow2.f32 %v2599_v0 }
 0x58a   :  { %3494 = vpow2.f32 %v2600_v23 }
 0x591   :  { %v3489_v35 = vpop.eup %3488 }
 0x592   :  { %v3491_v46 = vpop.eup %3490  ;;  %v1543_v29 = vadd.f32 1.0, %v3489_v35  ;;  %v5164_v35 = vld [vmem:[#allocation60_spill] sm:$0xff] }
 0x593   :  { %v1544_v57 = vadd.f32 1.0, %v3491_v46  ;;  %v3493_v19 = vpop.eup %3492 }
 0x594   :  { %3496 = vrcp.f32 %v1543_v29  ;;  %v3495_v5 = vpop.eup %3494  ;;  %v1557_v63 = vadd.f32 1.0, %v3493_v19  ;;  %v5165_v29 = vld [vmem:[#allocation61_spill] sm:$0xff] }
 0x595   :  { %3498 = vrcp.f32 %v1544_v57  ;;  %v1558_v49 = vadd.f32 1.0, %v3495_v5 }
 0x596   :  { %3500 = vrcp.f32 %v1557_v63 }
 0x597   :  { %3502 = vrcp.f32 %v1558_v49 }
 0x59e   :  { %v3497_v48 = vpop.eup %3496 }
 0x59f   :  { %v3499_v27 = vpop.eup %3498 }
 0x5a0   :  { %v3501_v57 = vpop.eup %3500 }
 0x5a1   :  { %v3503_v19 = vpop.eup %3502  ;;  %v1569_v5 = vsub.f32 1.0, %v3501_v57 }
 0x5a2   :  { %v1574_v63 = vmul.f32 %v3503_v19, %v4577_v62 }
 0x5a8   :  { %v1530_v2 = vpop.f32.mrb[10].mxu1 }
 0x5a9   :  { %v1531_v15 = vadd.f32 %v1530_v2, %v5162_v6  ;;  %v1532_v25 = vpop.f32.mrb[11].mxu1  ;;  %v1570_v2 = vsub.f32 1.0, %v3503_v19  ;;  %v5178_v19 = vld [vmem:[#allocation28_spill] sm:$0xff] }
 0x5aa   :  { %v1533_v60 = vadd.f32 %v1532_v25, %v5163_v55  ;;  %v1573_v25 = vmul.f32 %v3501_v57, %v4575_v34  ;;  %v5177_v57 = vld [vmem:[#allocation27_spill] sm:$0xff] }
 0x5ab   :  { %v1563_v31 = vmul.f32 %v3497_v48, %v1531_v15 }
 0x5ac   :  { %v1564_v0 = vmul.f32 %v3499_v27, %v1533_v60  ;;  %v5169_v27 = vld [vmem:[#allocation19_spill] sm:$0xff] }
 0x5ad   :  { %v1565_v23 = vadd.f32 %v1563_v31, %v5164_v35  ;;  %v5170_v31 = vld [vmem:[#allocation20_spill] sm:$0xff]  ;;  %v5173_v35 = vld [vmem:[#allocation23_spill] sm:$0xff] }
 0x5ae   :  { %v1566_v46 = vadd.f32 %v1564_v0, %v5165_v29  ;;  %v5171_v0 = vld [vmem:[#allocation21_spill] sm:$0xff] }
 0x5af   :  { %3504 = vtanh.f32 %v1565_v23  ;;  %v5174_v23 = vld [vmem:[#allocation24_spill] sm:$0xff]  ;;  %v5175_v29 = vld [vmem:[#allocation25_spill] sm:$0xff] }
 0x5b0   :  { %3506 = vtanh.f32 %v1566_v46  ;;  %v5176_v46 = vld [vmem:[#allocation26_spill] sm:$0xff] }
 0x5b9   :  { %v3505_v43 = vpop.eup %3504 }
 0x5ba   :  { %v3507_v6 = vpop.eup %3506  ;;  %v1571_v32 = vmul.f32 %v3505_v43, %v1569_v5  ;;  %v5179_v5 = vld [vmem:[#allocation29_spill] sm:$0xff] }
 0x5bb   :  { %v1572_v55 = vmul.f32 %v3507_v6, %v1570_v2  ;;  %v5166_v6 = vld [vmem:[#allocation38_spill] sm:$0xff] }
 0x5bc   :  { %v1575_v49 = vadd.f32 %v1573_v25, %v1571_v32  ;;  %v5180_v2 = vld [vmem:[#allocation30_spill] sm:$0xff]  ;;  %v5181_v25 = vld [vmem:[#allocation31_spill] sm:$0xff] }
 0x5bd   :  { %v1576_v15 = vadd.f32 %v1574_v63, %v1572_v55  ;;  %v5167_v55 = vld [vmem:[#allocation18_spill] sm:$0xff]  ;;  %v5182_v63 = vld [vmem:[#allocation32_spill] sm:$0xff] }
 0x5be   :  { %v4669_v48 = vmax.f32 %v1575_v49, 0.0  ;;  %v5183_v49 = vld [vmem:[#allocation33_spill] sm:$0xff] }
 0x5bf   :  { %v4671_v60 = vmax.f32 %v1576_v15, 0.0  ;;  %v5184_v15 = vld [vmem:[#allocation39_spill] sm:$0xff] }
 0x5c0   :  { %v2379_v34 = vmul.f32 %v4242_v50, %v4669_v48 }
 0x5c1   :  { %2603 = vmatprep.mubr.msk.f32.mxu0 %vm519_vm1, %v4671_v60  ;;  %2606 = vmatprep.mubr.msk.f32.mxu1 %vm519_vm1, %v4671_v60  ;;  %v2380_v43 = vmul.f32 %v4245_v14, %v4671_v60 }
 0x5c2   :  { %1647 = vmatmul.mubr.f32.vlgmr.msra.gmra.mrb[12].mxu0 %v4669_v48  ;;  %1718 = vmatmul.mubr.f32.vlgmr.msra.gmra.mrb[12].mxu1 %v4669_v48 }
 0x5c3   :  { %3148 = vmatpush1.bf16.msra.mxu0 %v4251_v18  ;;  %2609 = vmatprep.mubr.msk.f32.mxu0 %vm519_vm1, %v4671_v60  ;;  %v2403_v62 = vsel %vm519_vm1, %v2380_v43, 0.0  ;;  %v5185_v43 = vld [vmem:[#allocation40_spill] sm:$0xff] }
 0x5c4   :  { %3150 = vmatprep.subr.bf16.mxu0 %v4253_v17  ;;  %v2404_v32 = vadd.f32 %v2403_v62, %v2379_v34  ;;  %3184 = vmatpush1.bf16.msra.mxu1 %v3848_v16  ;;  %v5186_v34 = vld [vmem:[#allocation17_spill] sm:$0xff] }
 0x5c5   :  { %3186 = vmatprep.subr.bf16.mxu1 %v3859_v26 }
 0x5c6   :  { %2405 = vadd.xlane.f32.xlu1 %v2404_v32 }
 0x5c7   :  { %3152 = vmatpush1.bf16.msra.mxu0 %v4269_v51 }
 0x5c8   :  { %3154 = vmatprep.subr.bf16.mxu0 %v4272_v3  ;;  %3188 = vmatpush1.bf16.msra.mxu1 %v3862_v30 }
 0x5c9   :  { %3190 = vmatprep.subr.bf16.mxu1 %v3873_v40 }
 0x5cb   :  { %3156 = vmatpush1.bf16.msra.mxu0 %v4277_v22 }
 0x5cc   :  { %3158 = vmatprep.subr.bf16.mxu0 %v4280_v41  ;;  %3192 = vmatpush1.bf16.msra.mxu1 %v3876_v44 }
 0x5cd   :  { %3194 = vmatprep.subr.bf16.mxu1 %v3887_v54 }
 0x5cf   :  { %3160 = vmatpush1.bf16.msra.mxu0 %v4285_v4 }
 0x5d0   :  { %3162 = vmatprep.subr.bf16.mxu0 %v4288_v61  ;;  %3196 = vmatpush1.bf16.msra.mxu1 %v3890_v58 }
 0x5d1   :  { %3198 = vmatprep.subr.bf16.mxu1 %v3901_v9 }
 0x5d3   :  { %3164 = vmatpush1.bf16.msra.mxu0 %v4293_v52 }
 0x5d4   :  { %3166 = vmatprep.subr.bf16.mxu0 %v4296_v45  ;;  %3200 = vmatpush1.bf16.msra.mxu1 %v3904_v13 }
 0x5d5   :  { %3202 = vmatprep.subr.bf16.mxu1 %v3915_v28 }
 0x5d7   :  { %3168 = vmatpush1.bf16.msra.mxu0 %v4301_v56 }
 0x5d8   :  { %3170 = vmatprep.subr.bf16.mxu0 %v4304_v12  ;;  %3204 = vmatpush1.bf16.msra.mxu1 %v3918_v33 }
 0x5d9   :  { %3206 = vmatprep.subr.bf16.mxu1 %v3928_v47 }
 0x5db   :  { %3172 = vmatpush1.bf16.msra.mxu0 %v4309_v7 }
 0x5dc   :  { %3174 = vmatprep.subr.bf16.mxu0 %v4312_v37  ;;  %3208 = vmatpush1.bf16.msra.mxu1 %v3931_v53 }
 0x5dd   :  { %3210 = vmatprep.subr.bf16.mxu1 %v3939_v1 }
 0x5df   :  { %3176 = vmatpush1.bf16.msra.mxu0 %v4317_v59 }
 0x5e0   :  { %3178 = vmatprep.subr.bf16.mxu0 %v4320_v39  ;;  %3212 = vmatpush1.bf16.msra.mxu1 %v3942_v11 }
 0x5e1   :  { %3214 = vmatprep.subr.bf16.mxu1 %v3950_v24 }
 0x5e3   :  { %3180 = vmatpush1.bf16.msra.mxu0 %v4325_v42 }
 0x5e4   :  { %2607 = vmatprep.subr.msk.mxu0 %vm523_vm0, %v4329_v8  ;;  %3216 = vmatpush1.bf16.msra.mxu1 %v3956_v38  ;;  %v5168_v8 = vld [vmem:[#allocation37_spill] sm:$0xff] }
 0x5e5   :  { %2614 = vmatprep.subr.msk.mxu1 %vm523_vm0, %v4526_v10 }
 0x5e7   :  { %2608 = vmatpush1.msk.msra.mxu0 %vm523_vm0, %v4335_v36  ;;  %v5172_v36 = vld [vmem:[#allocation22_spill] sm:$0xff] }
 0x5e8   :  { %1789 = vmatmul.mubr.f32.vlgmr.msra.gmra.mrb[14].mxu0 %v4669_v48  ;;  %3218 = vmatprep.subr.bf16.mxu0 %v3850_v20 }
 0x5e9   :  { %3220 = vmatpush1.bf16.msra.mxu0 %v3852_v21  ;;  %2615 = vmatpush1.msk.msra.mxu1 %vm523_vm0, %v5166_v6 }
 0x5ea   :  { %3222 = vmatprep.subr.bf16.mxu0 %v5167_v55  ;;  %3254 = vmatprep.subr.bf16.mxu1 %v5168_v8 }
 0x5ed   :  { %3224 = vmatpush1.bf16.msra.mxu0 %v5169_v27 }
 0x5ee   :  { %3226 = vmatprep.subr.bf16.mxu0 %v5170_v31 }
 0x5f1   :  { %3228 = vmatpush1.bf16.msra.mxu0 %v5171_v0 }
 0x5f2   :  { %3230 = vmatprep.subr.bf16.mxu0 %v5172_v36 }
 0x5f5   :  { %3232 = vmatpush1.bf16.msra.mxu0 %v5173_v35 }
 0x5f6   :  { %3234 = vmatprep.subr.bf16.mxu0 %v5174_v23  ;;  %v5190_v23 = vld [vmem:[#allocation67_spill] sm:$0xff] }
 0x5f9   :  { %3236 = vmatpush1.bf16.msra.mxu0 %v5175_v29  ;;  %v5189_v29 = vld [vmem:[#allocation65_spill] sm:$0xff] }
 0x5fa   :  { %3238 = vmatprep.subr.bf16.mxu0 %v5176_v46 }
 0x5fd   :  { %3240 = vmatpush1.bf16.msra.mxu0 %v5177_v57  ;;  %v5188_v57 = vld [vmem:[#allocation64_spill] sm:$0xff] }
 0x5fe   :  { %3242 = vmatprep.subr.bf16.mxu0 %v5178_v19  ;;  %v5187_v19 = vld [vmem:[#allocation62_spill] sm:$0xff] }
 0x601   :  { %3244 = vmatpush1.bf16.msra.mxu0 %v5179_v5 }
 0x602   :  { %3246 = vmatprep.subr.bf16.mxu0 %v5180_v2 }
 0x605   :  { %3248 = vmatpush1.bf16.msra.mxu0 %v5181_v25 }
 0x606   :  { %3250 = vmatprep.subr.bf16.mxu0 %v5182_v63 }
 0x609   :  { %3252 = vmatpush1.bf16.msra.mxu0 %v5183_v49 }
 0x60a   :  { %2617 = vmatprep.subr.msk.mxu0 %vm523_vm0, %v5184_v15 }
 0x60d   :  { %2618 = vmatpush1.msk.msra.mxu0 %vm523_vm0, %v5185_v43 }
 0x60e   :  { %3290 = vmatprep.subr.bf16.mxu0 %v5186_v34 }
 0x695   :  { %v1648_v62 = vpop.f32.mrb[12].mxu0  ;;  %v1719_v32 = vpop.f32.mrb[12].mxu1 }
 0x696   :  { %v1795_v5 = vadd.f32 %v1648_v62, %v5187_v19  ;;  %v1809_v2 = vadd.f32 %v1719_v32, %v5188_v57  ;;  %v1650_v46 = vpop.f32.mrb[13].mxu0  ;;  %v1721_v25 = vpop.f32.mrb[13].mxu1 }
 0x697   :  { %v1796_v63 = vadd.f32 %v1650_v46, %v5189_v29  ;;  %v1810_v49 = vadd.f32 %v1721_v25, %v5190_v23  ;;  %v5191_v23 = vld [vmem:[#allocation63_spill] sm:$0xff] }
 0x698   :  { %v2610_v35 = vmul.f32 -1.442695, %v1795_v5  ;;  %v2612_v15 = vmul.f32 -1.442695, %v1809_v2 }
 0x699   :  { %v2611_v36 = vmul.f32 -1.442695, %v1796_v63  ;;  %v2613_v43 = vmul.f32 -1.442695, %v1810_v49 }
 0x69a   :  { %3508 = vpow2.f32 %v2610_v35 }
 0x69b   :  { %3510 = vpow2.f32 %v2611_v36  ;;  %v5192_v36 = vld [vmem:[#allocation66_spill] sm:$0xff] }
 0x69c   :  { %3512 = vpow2.f32 %v2612_v15 }
 0x69d   :  { %3514 = vpow2.f32 %v2613_v43 }
 0x6a4   :  { %v3509_v0 = vpop.eup %3508 }
 0x6a5   :  { %v3511_v34 = vpop.eup %3510  ;;  %v1803_v31 = vadd.f32 1.0, %v3509_v0  ;;  %v5193_v0 = vld [vmem:[#allocation68_spill] sm:$0xff] }
 0x6a6   :  { %v1804_v19 = vadd.f32 1.0, %v3511_v34  ;;  %v3513_v57 = vpop.eup %3512 }
 0x6a7   :  { %3516 = vrcp.f32 %v1803_v31  ;;  %v3515_v62 = vpop.eup %3514  ;;  %v1817_v32 = vadd.f32 1.0, %v3513_v57  ;;  %v5194_v31 = vld [vmem:[#allocation69_spill] sm:$0xff] }
 0x6a8   :  { %3518 = vrcp.f32 %v1804_v19  ;;  %v1818_v29 = vadd.f32 1.0, %v3515_v62 }
 0x6a9   :  { %3520 = vrcp.f32 %v1817_v32 }
 0x6aa   :  { %3522 = vrcp.f32 %v1818_v29 }
 0x6b1   :  { %v3517_v35 = vpop.eup %3516 }
 0x6b2   :  { %v3519_v63 = vpop.eup %3518 }
 0x6b3   :  { %v3521_v19 = vpop.eup %3520 }
 0x6b4   :  { %v3523_v57 = vpop.eup %3522  ;;  %v1829_v62 = vsub.f32 1.0, %v3521_v19 }
 0x6b5   :  { %v1834_v32 = vmul.f32 %v3523_v57, %v4671_v60 }
 0x6bb   :  { %v1790_v46 = vpop.f32.mrb[14].mxu0 }
 0x6bc   :  { %v1791_v5 = vadd.f32 %v1790_v46, %v5191_v23  ;;  %v1792_v25 = vpop.f32.mrb[15].mxu0  ;;  %v1830_v46 = vsub.f32 1.0, %v3523_v57 }
 0x6bd   :  { %v1793_v2 = vadd.f32 %v1792_v25, %v5192_v36  ;;  %v1833_v25 = vmul.f32 %v3521_v19, %v4669_v48  ;;  %v5216_v19 = vld [vmem:[#allocation73_spill] sm:$0xff] }
 0x6be   :  { %v1823_v49 = vmul.f32 %v3517_v35, %v1791_v5 }
 0x6bf   :  { %v1824_v15 = vmul.f32 %v3519_v63, %v1793_v2 }
 0x6c0   :  { %v1825_v43 = vadd.f32 %v1823_v49, %v5193_v0  ;;  %v5214_v49 = vld [vmem:[#allocation71_spill] sm:$0xff] }
 0x6c1   :  { %v1826_v34 = vadd.f32 %v1824_v15, %v5194_v31  ;;  %v5215_v31 = vld [vmem:[#allocation72_spill] sm:$0xff] }
 0x6c2   :  { %3524 = vtanh.f32 %v1825_v43 }
 0x6c3   :  { %3526 = vtanh.f32 %v1826_v34 }
 0x6cc   :  { %v3525_v27 = vpop.eup %3524 }
 0x6cd   :  { %v3527_v23 = vpop.eup %3526  ;;  %v1831_v8 = vmul.f32 %v3525_v27, %v1829_v62 }
 0x6ce   :  { %v1832_v36 = vmul.f32 %v3527_v23, %v1830_v46 }
 0x6cf   :  { %v1835_v29 = vadd.f32 %v1833_v25, %v1831_v8 }
 0x6d0   :  { %v1836_v5 = vadd.f32 %v1834_v32, %v1832_v36  ;;  %v5213_v36 = vld [vmem:[#allocation70_spill] sm:$0xff] }
 0x6d1   :  { %v4763_v35 = vmax.f32 %v1835_v29, 0.0 }
 0x6d2   :  { %v4765_v2 = vmax.f32 %v1836_v5, 0.0 }
 0x6d3   :  { %v2381_v48 = vmul.f32 %v4242_v50, %v4763_v35 }
 0x6d4   :  { %2616 = vmatprep.mubr.msk.f32.mxu1 %vm519_vm1, %v4765_v2  ;;  %2619 = vmatprep.mubr.msk.f32.mxu0 %vm519_vm1, %v4765_v2  ;;  %v2382_v27 = vmul.f32 %v4245_v14, %v4765_v2 }
 0x6d5   :  { %1907 = vmatmul.mubr.f32.vlgmr.msra.gmra.mrb[14].mxu1 %v4763_v35  ;;  %1978 = vmatmul.mubr.f32.vlgmr.msra.gmra.mrb[16].mxu0 %v4763_v35 }
 0x6d6   :  { %3256 = vmatpush1.bf16.msra.mxu1 %v4251_v18  ;;  %2622 = vmatprep.mubr.msk.f32.mxu1 %vm519_vm1, %v4765_v2  ;;  %v2407_v60 = vsel %vm519_vm1, %v2382_v27, 0.0 }
 0x6d7   :  { %3258 = vmatprep.subr.bf16.mxu1 %v4253_v17  ;;  %v2408_v8 = vadd.f32 %v2407_v60, %v2381_v48  ;;  %3292 = vmatpush1.bf16.msra.mxu0 %v3848_v16  ;;  %v4813_v16 = vld [vmem:[#allocation9 + $0x128] sm:$0x3f] }
 0x6d8   :  { %3294 = vmatprep.subr.bf16.mxu0 %v3859_v26  ;;  %v4820_v26 = vld [vmem:[#allocation9 + $0x120] sm:$0x3f] }
 0x6d9   :  { %2409 = vadd.xlane.f32.xlu0 %v2408_v8 }
 0x6da   :  { %3260 = vmatpush1.bf16.msra.mxu1 %v4269_v51 }
 0x6db   :  { %3262 = vmatprep.subr.bf16.mxu1 %v4272_v3  ;;  %3296 = vmatpush1.bf16.msra.mxu0 %v3862_v30  ;;  %v5195_v30 = vld [vmem:[#allocation37_spill] sm:$0xff] }
 0x6dc   :  { %3298 = vmatprep.subr.bf16.mxu0 %v3873_v40  ;;  %v5196_v40 = vld [vmem:[#allocation19_spill] sm:$0xff] }
 0x6de   :  { %3264 = vmatpush1.bf16.msra.mxu1 %v4277_v22 }
 0x6df   :  { %3266 = vmatprep.subr.bf16.mxu1 %v4280_v41  ;;  %3300 = vmatpush1.bf16.msra.mxu0 %v3876_v44  ;;  %v5197_v44 = vld [vmem:[#allocation20_spill] sm:$0xff] }
 0x6e0   :  { %3302 = vmatprep.subr.bf16.mxu0 %v3887_v54  ;;  %v5198_v54 = vld [vmem:[#allocation21_spill] sm:$0xff] }
 0x6e2   :  { %3268 = vmatpush1.bf16.msra.mxu1 %v4285_v4 }
 0x6e3   :  { %3270 = vmatprep.subr.bf16.mxu1 %v4288_v61  ;;  %3304 = vmatpush1.bf16.msra.mxu0 %v3890_v58  ;;  %v5199_v58 = vld [vmem:[#allocation22_spill] sm:$0xff] }
 0x6e4   :  { %3306 = vmatprep.subr.bf16.mxu0 %v3901_v9  ;;  %v5200_v9 = vld [vmem:[#allocation23_spill] sm:$0xff] }
 0x6e6   :  { %3272 = vmatpush1.bf16.msra.mxu1 %v4293_v52 }
 0x6e7   :  { %3274 = vmatprep.subr.bf16.mxu1 %v4296_v45  ;;  %3308 = vmatpush1.bf16.msra.mxu0 %v3904_v13  ;;  %v5203_v13 = vld [vmem:[#allocation26_spill] sm:$0xff] }
 0x6e8   :  { %3310 = vmatprep.subr.bf16.mxu0 %v3915_v28  ;;  %v5204_v28 = vld [vmem:[#allocation27_spill] sm:$0xff] }
 0x6ea   :  { %3276 = vmatpush1.bf16.msra.mxu1 %v4301_v56 }
 0x6eb   :  { %3278 = vmatprep.subr.bf16.mxu1 %v4304_v12  ;;  %3312 = vmatpush1.bf16.msra.mxu0 %v3918_v33  ;;  %v5205_v33 = vld [vmem:[#allocation28_spill] sm:$0xff] }
 0x6ec   :  { %3314 = vmatprep.subr.bf16.mxu0 %v3928_v47  ;;  %v5206_v47 = vld [vmem:[#allocation29_spill] sm:$0xff] }
 0x6ee   :  { %3280 = vmatpush1.bf16.msra.mxu1 %v4309_v7 }
 0x6ef   :  { %3282 = vmatprep.subr.bf16.mxu1 %v4312_v37  ;;  %3316 = vmatpush1.bf16.msra.mxu0 %v3931_v53  ;;  %v5207_v53 = vld [vmem:[#allocation30_spill] sm:$0xff] }
 0x6f0   :  { %3318 = vmatprep.subr.bf16.mxu0 %v3939_v1  ;;  %v5208_v1 = vld [vmem:[#allocation31_spill] sm:$0xff] }
 0x6f2   :  { %3284 = vmatpush1.bf16.msra.mxu1 %v4317_v59 }
 0x6f3   :  { %3286 = vmatprep.subr.bf16.mxu1 %v4320_v39  ;;  %3320 = vmatpush1.bf16.msra.mxu0 %v3942_v11  ;;  %v5209_v11 = vld [vmem:[#allocation32_spill] sm:$0xff] }
 0x6f4   :  { %3322 = vmatprep.subr.bf16.mxu0 %v3950_v24  ;;  %v5210_v24 = vld [vmem:[#allocation33_spill] sm:$0xff] }
 0x6f6   :  { %3288 = vmatpush1.bf16.msra.mxu1 %v4325_v42 }
 0x6f7   :  { %2620 = vmatprep.subr.msk.mxu1 %vm523_vm0, %v4813_v16  ;;  %3324 = vmatpush1.bf16.msra.mxu0 %v3956_v38  ;;  %v5211_v38 = vld [vmem:[#allocation39_spill] sm:$0xff] }
 0x6f8   :  { %2627 = vmatprep.subr.msk.mxu0 %vm523_vm0, %v4526_v10  ;;  %v5212_v10 = vld [vmem:[#allocation40_spill] sm:$0xff] }
 0x6fa   :  { %2621 = vmatpush1.msk.msra.mxu1 %vm523_vm0, %v4820_v26 }
 0x6fb   :  { %2049 = vmatmul.mubr.f32.vlgmr.msra.gmra.mrb[16].mxu1 %v4763_v35  ;;  %3326 = vmatprep.subr.bf16.mxu1 %v3850_v20  ;;  %v5201_v20 = vld [vmem:[#allocation24_spill] sm:$0xff] }
 0x6fc   :  { %3328 = vmatpush1.bf16.msra.mxu1 %v3852_v21  ;;  %2628 = vmatpush1.msk.msra.mxu0 %vm523_vm0, %v5166_v6  ;;  %v5202_v21 = vld [vmem:[#allocation25_spill] sm:$0xff]  ;;  %v3698_v6 = vmov 0  }
 0x6fd   :  { %3330 = vmatprep.subr.bf16.mxu1 %v5167_v55  ;;  %3362 = vmatprep.subr.bf16.mxu0 %v5195_v30 }
 0x6fe   :  { %3406 = vset.pattern.permute.xlu1 %v3698_v6 }
 0x700   :  { %3332 = vmatpush1.bf16.msra.mxu1 %v5196_v40 }
 0x701   :  { %3334 = vmatprep.subr.bf16.mxu1 %v5197_v44 }
 0x704   :  { %3336 = vmatpush1.bf16.msra.mxu1 %v5198_v54  ;;  %v5217_v54 = vld [vmem:[#allocation63_spill] sm:$0xff] }
 0x705   :  { %3338 = vmatprep.subr.bf16.mxu1 %v5199_v58 }
 0x708   :  { %3340 = vmatpush1.bf16.msra.mxu1 %v5200_v9 }
 0x709   :  { %3342 = vmatprep.subr.bf16.mxu1 %v5201_v20 }
 0x70c   :  { %3344 = vmatpush1.bf16.msra.mxu1 %v5202_v21  ;;  %v5218_v21 = vld [vmem:[#allocation66_spill] sm:$0xff] }
 0x70d   :  { %3346 = vmatprep.subr.bf16.mxu1 %v5203_v13 }
 0x710   :  { %3348 = vmatpush1.bf16.msra.mxu1 %v5204_v28 }
 0x711   :  { %3350 = vmatprep.subr.bf16.mxu1 %v5205_v33 }
 0x714   :  { %3352 = vmatpush1.bf16.msra.mxu1 %v5206_v47 }
 0x715   :  { %3354 = vmatprep.subr.bf16.mxu1 %v5207_v53  ;;  %v5219_v53 = vld [vmem:[#allocation74_spill] sm:$0xff] }
 0x718   :  { %3356 = vmatpush1.bf16.msra.mxu1 %v5208_v1 }
 0x719   :  { %3358 = vmatprep.subr.bf16.mxu1 %v5209_v11  ;;  %v5220_v11 = vld [vmem:[#allocation75_spill] sm:$0xff] }
 0x71c   :  { %3360 = vmatpush1.bf16.msra.mxu1 %v5210_v24 }
 0x71d   :  { %2630 = vmatprep.subr.msk.mxu1 %vm523_vm0, %v5211_v38 }
 0x720   :  { %2631 = vmatpush1.msk.msra.mxu1 %vm523_vm0, %v5212_v10 }
 0x7a8   :  { %v1908_v55 = vpop.f32.mrb[14].mxu1  ;;  %v1979_v23 = vpop.f32.mrb[16].mxu0 }
 0x7a9   :  { %v2055_v63 = vadd.f32 %v1908_v55, %v5213_v36  ;;  %v2069_v15 = vadd.f32 %v1979_v23, %v5214_v49  ;;  %v1910_v0 = vpop.f32.mrb[15].mxu1  ;;  %v1981_v43 = vpop.f32.mrb[17].mxu0 }
 0x7aa   :  { %v2056_v34 = vadd.f32 %v1910_v0, %v5215_v31  ;;  %v2070_v57 = vadd.f32 %v1981_v43, %v5216_v19 }
 0x7ab   :  { %v2623_v62 = vmul.f32 -1.442695, %v2055_v63  ;;  %v2625_v25 = vmul.f32 -1.442695, %v2069_v15 }
 0x7ac   :  { %v2624_v46 = vmul.f32 -1.442695, %v2056_v34  ;;  %v2626_v32 = vmul.f32 -1.442695, %v2070_v57 }
 0x7ad   :  { %3528 = vpow2.f32 %v2623_v62 }
 0x7ae   :  { %3530 = vpow2.f32 %v2624_v46 }
 0x7af   :  { %3532 = vpow2.f32 %v2625_v25 }
 0x7b0   :  { %3534 = vpow2.f32 %v2626_v32 }
 0x7b7   :  { %v3529_v29 = vpop.eup %3528 }
 0x7b8   :  { %v3531_v5 = vpop.eup %3530  ;;  %v2063_v27 = vadd.f32 1.0, %v3529_v29 }
 0x7b9   :  { %v2064_v48 = vadd.f32 1.0, %v3531_v5  ;;  %v3533_v60 = vpop.eup %3532 }
 0x7ba   :  { %3536 = vrcp.f32 %v2063_v27  ;;  %v3535_v8 = vpop.eup %3534  ;;  %v2077_v30 = vadd.f32 1.0, %v3533_v60 }
 0x7bb   :  { %3538 = vrcp.f32 %v2064_v48  ;;  %v2078_v40 = vadd.f32 1.0, %v3535_v8 }
 0x7bc   :  { %3540 = vrcp.f32 %v2077_v30 }
 0x7bd   :  { %3542 = vrcp.f32 %v2078_v40 }
 0x7c4   :  { %v3537_v20 = vpop.eup %3536 }
 0x7c5   :  { %v3539_v28 = vpop.eup %3538 }
 0x7c6   :  { %v3541_v38 = vpop.eup %3540 }
 0x7c7   :  { %v3543_v10 = vpop.eup %3542  ;;  %v2089_v55 = vsub.f32 1.0, %v3541_v38  ;;  %v2093_v15 = vmul.f32 %v3541_v38, %v4763_v35 }
 0x7c8   :  { %v2090_v36 = vsub.f32 1.0, %v3543_v10  ;;  %v2094_v43 = vmul.f32 %v3543_v10, %v4765_v2 }
 0x7ce   :  { %v2050_v44 = vpop.f32.mrb[16].mxu1 }
 0x7cf   :  { %v2051_v58 = vadd.f32 %v2050_v44, %v5217_v54  ;;  %v2052_v9 = vpop.f32.mrb[17].mxu1 }
 0x7d0   :  { %v2053_v13 = vadd.f32 %v2052_v9, %v5218_v21 }
 0x7d1   :  { %v2083_v33 = vmul.f32 %v3537_v20, %v2051_v58 }
 0x7d2   :  { %v2084_v47 = vmul.f32 %v3539_v28, %v2053_v13  ;;  %v5225_v13 = vld [vmem:[#allocation80_spill] sm:$0xff] }
 0x7d3   :  { %v2085_v1 = vadd.f32 %v2083_v33, %v5219_v53  ;;  %v5226_v33 = vld [vmem:[#allocation81_spill] sm:$0xff] }
 0x7d4   :  { %v2086_v24 = vadd.f32 %v2084_v47, %v5220_v11 }
 0x7d5   :  { %3544 = vtanh.f32 %v2085_v1 }
 0x7d6   :  { %3546 = vtanh.f32 %v2086_v24 }
 0x7df   :  { %v3545_v23 = vpop.eup %3544 }
 0x7e0   :  { %v3547_v63 = vpop.eup %3546  ;;  %v2091_v49 = vmul.f32 %v3545_v23, %v2089_v55 }
 0x7e1   :  { %v2092_v0 = vmul.f32 %v3547_v63, %v2090_v36 }
 0x7e2   :  { %v2095_v31 = vadd.f32 %v2093_v15, %v2091_v49 }
 0x7e3   :  { %v2096_v34 = vadd.f32 %v2094_v43, %v2092_v0 }
 0x7e4   :  { %v4861_v19 = vmax.f32 %v2095_v31, 0.0 }
 0x7e5   :  { %v4863_v57 = vmax.f32 %v2096_v34, 0.0 }
 0x7e6   :  { %v2383_v35 = vmul.f32 %v4242_v50, %v4861_v19 }
 0x7e7   :  { %2629 = vmatprep.mubr.msk.f32.mxu0 %vm519_vm1, %v4863_v57  ;;  %2632 = vmatprep.mubr.msk.f32.mxu1 %vm519_vm1, %v4863_v57  ;;  %v2384_v62 = vmul.f32 %v4245_v14, %v4863_v57 }
 0x7e8   :  { %2167 = vmatmul.mubr.f32.vlgmr.msra.gmra.mrb[18].mxu0 %v4861_v19  ;;  %2238 = vmatmul.mubr.f32.vlgmr.msra.gmra.mrb[18].mxu1 %v4861_v19 }
 0x7e9   :  { %3364 = vmatpush1.bf16.msra.mxu0 %v4251_v18  ;;  %2635 = vmatprep.mubr.msk.f32.mxu0 %vm519_vm1, %v4863_v57  ;;  %v2411_v2 = vsel %vm519_vm1, %v2384_v62, 0.0  ;;  %v2640_v18 = vld [vmem:[#allocation2] ss:$0 sm:$0xff]  ;;  %v2390_v62 = vpop.xlane.xlu1 %2389 }
 0x7ea   :  { %3366 = vmatprep.subr.bf16.mxu0 %v4253_v17  ;;  %v2412_v46 = vadd.f32 %v2411_v2, %v2383_v35 }
 0x7ec   :  { %2413 = vadd.xlane.f32.xlu1 %v2412_v46 }
 0x7ed   :  { %3368 = vmatpush1.bf16.msra.mxu0 %v4269_v51  ;;  %v2398_v35 = vpop.xlane.xlu1 %2397 }
 0x7ee   :  { %3370 = vmatprep.subr.bf16.mxu0 %v4272_v3  ;;  %v5221_v3 = vld [vmem:[#allocation76_spill] sm:$0xff] }
 0x7f1   :  { %3372 = vmatpush1.bf16.msra.mxu0 %v4277_v22  ;;  %v5222_v22 = vld [vmem:[#allocation77_spill] sm:$0xff]  ;;  %v2402_v2 = vpop.xlane.xlu1 %2401 }
 0x7f2   :  { %3374 = vmatprep.subr.bf16.mxu0 %v4280_v41 }
 0x7f5   :  { %3376 = vmatpush1.bf16.msra.mxu0 %v4285_v4  ;;  %v2406_v46 = vpop.xlane.xlu1 %2405 }
 0x7f6   :  { %3378 = vmatprep.subr.bf16.mxu0 %v4288_v61  ;;  %v5223_v61 = vld [vmem:[#allocation78_spill] sm:$0xff] }
 0x7f9   :  { %3380 = vmatpush1.bf16.msra.mxu0 %v4293_v52 }
 0x7fa   :  { %3382 = vmatprep.subr.bf16.mxu0 %v4296_v45  ;;  %v5224_v45 = vld [vmem:[#allocation79_spill] sm:$0xff] }
 0x7fd   :  { %3384 = vmatpush1.bf16.msra.mxu0 %v4301_v56  ;;  %2426 = vperm.xlu1 %3406, %v2640_v18   ;;  %v5227_v18 = vlaneseq }
 0x7fe   :  { %3386 = vmatprep.subr.bf16.mxu0 %v4304_v12 }
 0x801   :  { %3388 = vmatpush1.bf16.msra.mxu0 %v4309_v7 }
 0x802   :  { %3390 = vmatprep.subr.bf16.mxu0 %v4312_v37 }
 0x805   :  { %3392 = vmatpush1.bf16.msra.mxu0 %v4317_v59 }
 0x806   :  { %3394 = vmatprep.subr.bf16.mxu0 %v4320_v39 }
 0x809   :  { %3396 = vmatpush1.bf16.msra.mxu0 %v4325_v42 }
 0x80a   :  { %2633 = vmatprep.subr.msk.mxu0 %vm523_vm0, %v4813_v16 }
 0x80d   :  { %2634 = vmatpush1.msk.msra.mxu0 %vm523_vm0, %v4820_v26 }
 0x80e   :  { %2309 = vmatmul.mubr.f32.vlgmr.msra.gmra.mrb[20].mxu0 %v4861_v19 }
 0x8bb   :  { %v2168_v17 = vpop.f32.mrb[18].mxu0  ;;  %v2239_v51 = vpop.f32.mrb[18].mxu1 }
 0x8bc   :  { %v2315_v7 = vadd.f32 %v2168_v17, %v5221_v3  ;;  %v2329_v41 = vadd.f32 %v2239_v51, %v5222_v22  ;;  %v2170_v4 = vpop.f32.mrb[19].mxu0  ;;  %v2241_v59 = vpop.f32.mrb[19].mxu1  ;;  %v2446_v17 = vand.u32 127, %v5227_v18  ;;  %v5228_v3 = vld [vmem:[#allocation16_spill] sm:$0xff] }
 0x8bd   :  { %v2316_v52 = vadd.f32 %v2170_v4, %v5223_v61  ;;  %v2330_v56 = vadd.f32 %v2241_v59, %v5224_v45  ;;  %v2394_v51 = vpop.xlane.xlu0 %2393 }
 0x8be   :  { %v2636_v12 = vmul.f32 -1.442695, %v2315_v7  ;;  %v2638_v39 = vmul.f32 -1.442695, %v2329_v41  ;;  %v2449_v7 = vsub.s32 %v2446_v17, %v5228_v3 }
 0x8bf   :  { %v2637_v37 = vmul.f32 -1.442695, %v2316_v52  ;;  %v2639_v42 = vmul.f32 -1.442695, %v2330_v56 }
 0x8c0   :  { %3548 = vpow2.f32 %v2636_v12 }
 0x8c1   :  { %3550 = vpow2.f32 %v2637_v37  ;;  %v2410_v37 = vpop.xlane.xlu0 %2409 }
 0x8c2   :  { %3552 = vpow2.f32 %v2638_v39 }
 0x8c3   :  { %3554 = vpow2.f32 %v2639_v42 }
 0x8ca   :  { %v3549_v16 = vpop.eup %3548 }
 0x8cb   :  { %v3551_v26 = vpop.eup %3550  ;;  %v2323_v25 = vadd.f32 1.0, %v3549_v16 }
 0x8cc   :  { %v2324_v32 = vadd.f32 1.0, %v3551_v26  ;;  %v3553_v29 = vpop.eup %3552 }
 0x8cd   :  { %3556 = vrcp.f32 %v2323_v25  ;;  %v3555_v5 = vpop.eup %3554  ;;  %v2337_v27 = vadd.f32 1.0, %v3553_v29 }
 0x8ce   :  { %3558 = vrcp.f32 %v2324_v32  ;;  %v2338_v48 = vadd.f32 1.0, %v3555_v5 }
 0x8cf   :  { %3560 = vrcp.f32 %v2337_v27 }
 0x8d0   :  { %3562 = vrcp.f32 %v2338_v48 }
 0x8d7   :  { %v3557_v40 = vpop.eup %3556 }
 0x8d8   :  { %v3559_v58 = vpop.eup %3558 }
 0x8d9   :  { %v3561_v53 = vpop.eup %3560 }
 0x8da   :  { %v3563_v1 = vpop.eup %3562  ;;  %v2349_v11 = vsub.f32 1.0, %v3561_v53 }
 0x8db   :  { %v2354_v23 = vmul.f32 %v3563_v1, %v4863_v57 }
 0x8e1   :  { %v2310_v60 = vpop.f32.mrb[20].mxu0 }
 0x8e2   :  { %v2311_v8 = vadd.f32 %v2310_v60, %v5217_v54  ;;  %v2312_v30 = vpop.f32.mrb[21].mxu0  ;;  %v2350_v54 = vsub.f32 1.0, %v3563_v1 }
 0x8e3   :  { %v2313_v44 = vadd.f32 %v2312_v30, %v5218_v21  ;;  %v2353_v21 = vmul.f32 %v3561_v53, %v4861_v19  ;;  %v2414_v19 = vpop.xlane.xlu1 %2413 }
 0x8e4   :  { %v2343_v9 = vmul.f32 %v3557_v40, %v2311_v8 }
 0x8e5   :  { %v2344_v20 = vmul.f32 %v3559_v58, %v2313_v44 }
 0x8e6   :  { %v2345_v28 = vadd.f32 %v2343_v9, %v5225_v13 }
 0x8e7   :  { %v2346_v47 = vadd.f32 %v2344_v20, %v5226_v33  ;;  %v2427_v57 = vpop.permute.xlu1 %2426 }
 0x8e8   :  { %3564 = vtanh.f32 %v2345_v28  ;;  %v2429_v22 = vadd.f32 %v2427_v57, %v2390_v62  ;;  %v2430_v41 = vadd.f32 %v2427_v57, %v2394_v51  ;;  %v2432_v61 = vadd.f32 %v2427_v57, %v2402_v2 }
 0x8e9   :  { %3566 = vtanh.f32 %v2346_v47  ;;  %v2433_v45 = vadd.f32 %v2427_v57, %v2406_v46  ;;  %v2434_v39 = vadd.f32 %v2427_v57, %v2410_v37  ;;  %v2435_v26 = vadd.f32 %v2427_v57, %v2414_v19 }
 0x8ea   :  { %v2450_v4 = vrot.slane %v2429_v22, %v2449_v7  ;;  %v2462_v12 = vrot.slane %v2432_v61, %v2449_v7 }
 0x8eb   :  { %v2466_v16 = vrot.slane %v2433_v45, %v2449_v7  ;;  %v2470_v32 = vrot.slane %v2434_v39, %v2449_v7  ;;  %v2474_v48 = vrot.slane %v2435_v26, %v2449_v7 }
 0x8f2   :  { %v3565_v24 = vpop.eup %3564 }
 0x8f3   :  { %v3567_v38 = vpop.eup %3566  ;;  %v2351_v10 = vmul.f32 %v3565_v24, %v2349_v11 }
 0x8f4   :  { %v2352_v55 = vmul.f32 %v3567_v38, %v2350_v54 }
 0x8f5   :  { %v2355_v36 = vadd.f32 %v2353_v21, %v2351_v10 }
 0x8f6   :  { %v2356_v63 = vadd.f32 %v2354_v23, %v2352_v55 }
 0x8f7   :  { %v2357_v49 = vmax.f32 %v2355_v36, 0.0 }
 0x8f8   :  { %v2358_v15 = vmax.f32 %v2356_v63, 0.0 }
 0x8f9   :  { %v2385_v43 = vmul.f32 %v4242_v50, %v2357_v49  ;;  %v2454_v50 = vrot.slane %v2430_v41, %v2449_v7 }
 0x8fa   :  { %v2386_v0 = vmul.f32 %v4245_v14, %v2358_v15  ;;  %v2431_v14 = vadd.f32 %v2427_v57, %v2398_v35 }
 0x8fb   :  { %v2480_v52 = vsel %vm2479_vm2, %v2454_v50, %v2450_v4 }
 0x8fc   :  { %v2415_v31 = vsel %vm519_vm1, %v2386_v0, 0.0  ;;  %v2458_v59 = vrot.slane %v2431_v14, %v2449_v7 }
 0x8fd   :  { %v2416_v34 = vadd.f32 %v2415_v31, %v2385_v43 }
 0x8fe   :  { %v2482_v56 = vsel %vm2481_vm3, %v2458_v59, %v2480_v52 }
 0x8ff   :  { %2417 = vadd.xlane.f32.xlu0 %v2416_v34  ;;  %v2484_v42 = vsel %vm2483_vm4, %v2462_v12, %v2482_v56 }
 0x900   :  { %v2486_v25 = vsel %vm2485_vm5, %v2466_v16, %v2484_v42 }
 0x901   :  { %v2488_v27 = vsel %vm2487_vm6, %v2470_v32, %v2486_v25 }
 0x902   :  { %v2490_v8 = vsel %vm2489_vm7, %v2474_v48, %v2488_v27 }
 0x98c   :  { %v2418_v29 = vpop.xlane.xlu0 %2417 }
 0x98d   :  { %v2436_v5 = vadd.f32 %v2427_v57, %v2418_v29 }
 0x98f   :  { %v2478_v60 = vrot.slane %v2436_v5, %v2449_v7 }
 0x991   :  { %v2492_v30 = vsel %vm2491_vm8, %v2478_v60, %v2490_v8 }
 0x992   :  { %2494 = vxpose.xlu0.b32.start.end [1/1] (short) (narrow) %v2492_v30, 8 }
 0x9bb   :  { %3407 = vset.pattern.permute.xlu0 %v3698_v6 }
 0xa12   :  { %v2510_v40 = vpop.trf.xlu0 }
 0xa13   :  { %2527 = vst.msk [vmem:[#allocation11] sm:$0xff] %vm2526_vm9, %v2510_v40 }
 0xa14   :  { %3673 = shalt.err (!%p3670_p8)
}
 0xa15   :  { %s3674_s17 = scalar_lea.hbm %s4941_s13, 128 }
 0xa16   :  { %p3675_p9 = scmp.ne.s32.totalorder %s4941_s13, %s3674_s17  ;;  %p3678_p10 = scmp.lt.u32.totalorder %s3674_s17, %s4941_s13 }
 0xa18   :  { %p3680_p11 = pnand %p3678_p10, %p3675_p9 }
 0xa1a   :  { %3683 = shalt.err (!%p3680_p11)
}
 0xa1b   :  { %2537 = dma.vmem_to_hbm [thread:$0]  %s2535_s24, 128, %s4941_s13, [#allocation5]  }
 0xa1c   :  { %3690 = dma.done.wait [#allocation5], 128  }
 0xa1d   :  { %3691 = vsyncadd [#allocation5], 4294967168 }
 0xa1e   :  { %2541 = vsyncpa [#allocation4], 1 }
 0xa1f   :  { %2542 = vsyncpa [#allocation7], 1 }
 0xa20   :  { %2543 = vsyncpa [#allocation10], 1 }
 0xa21   :  { %2544 = vsyncpa [#allocation5], 1 }

</bundles_post_ra>
